<compile_context>
chip_gen: v6e
topology: v6e:2x2x1
jax: 0.10.0
libtpu: 0.0.40
codegen_flags: <defaults>
</compile_context>

<pallas_src>
import functools

import jax
import jax.numpy as jnp
import numpy as np
from jax.experimental import pallas as pl
from jax.experimental.pallas import tpu as pltpu


def autoencoder_kernel(x_ref, w1_ref, b1_ref, w2_ref, b2_ref,
                       wfc1_ref, bfc1_ref, wd1_ref, bd1_ref, wd2_ref, bd2_ref,
                       out_ref, m_scr, *, L):
    """Fused encoder+decoder forward for one batch tile of Bt rows."""
    Bt = x_ref.shape[0]
    P = L // 2
    R = Bt * L                                       # conv rows: r = b*L + l
    f32 = jnp.float32
    bf16 = jnp.bfloat16

    # ---- conv1: Conv1d(1->16, k=3, pad=1) + ReLU as ONE (R,3)x(3,16) matmul ----
    # x arrives lane-major (Bt, L): the +/-1 position shifts are cheap lane
    # shifts with zero fill; each row is one sample so no cross-batch masking.
    x = x_ref[...]                                   # (Bt, L)
    zc = jnp.zeros((Bt, 1), f32)
    xp = jnp.concatenate([zc, x[:, :L - 1]], axis=1)     # x[b, l-1]
    xn = jnp.concatenate([x[:, 1:], zc], axis=1)         # x[b, l+1]
    # im2col (Bt, L, 3) -> (R, 3); the leading-dim merge is layout-free.
    xcol = jnp.concatenate(
        [xp[:, :, None], x[:, :, None], xn[:, :, None]], axis=2)
    h1 = jnp.dot(xcol.reshape(R, 3), w1_ref[...], preferred_element_type=f32)
    h1 = jnp.maximum(h1 + b1_ref[...], 0.0)          # (R, 16)

    # ---- conv2: Conv1d(16->32, k=3, pad=1) + ReLU as ONE (R,48)x(48,32) matmul ----
    # Shifts done per-batch in (Bt, L, 16): the zero rows provide the conv
    # padding and nothing leaks across batch boundaries. w2 rows are k-major
    # (row index k*16 + c), prepared host-side.
    h1b = h1.reshape(Bt, L, 16)
    zrow = jnp.zeros((Bt, 1, 16), f32)
    h1p = jnp.concatenate([zrow, h1b[:, :L - 1, :]], axis=1)   # h1[b, l-1, :]
    h1n = jnp.concatenate([h1b[:, 1:, :], zrow], axis=1)       # h1[b, l+1, :]
    hcat = jnp.concatenate([h1p, h1b, h1n], axis=2).reshape(R, 48)
    h2 = jnp.dot(hcat.astype(bf16), w2_ref[...], preferred_element_type=f32)
    h2 = jnp.maximum(h2 + b2_ref[...], 0.0)          # (R, 32)

    # ---- MaxPool1d(2, 2): pair-max in vregs, single bulk scratch store ----
    # pairmax[r] = max(h2[r], h2[r+1]); ONLY even rows r = b*L + 2p are read
    # back below. L is even so a pair never crosses a batch boundary, and the
    # zero pad row only touches the last (odd, never-read) row.
    pad_row = jnp.zeros((1, 32), f32)
    pairmax = jnp.maximum(h2, jnp.concatenate([h2[1:, :], pad_row], axis=0))
    m_scr[...] = pairmax

    # ---- flatten: flat[b, p*32 + c] = pool[b, p, c] ----
    # P sublane-strided reads gathered directly into vregs and lane-concatenated
    # (no second scratch, no masked 32-lane stores). torch's (c*P + p) view
    # order is folded into the wfc1 row permutation host-side.
    # TODO(synk): relies on stride-L sublane reads lowering to strided vector
    # loads rather than per-row copies; fine at P=16, revisit if L grows.
    parts = [m_scr[pl.ds(2 * p, Bt, stride=L), :] for p in range(P)]
    flat = jnp.concatenate(parts, axis=1)            # (Bt, 32*P)

    # ---- FC stage: fc1 + ReLU -> decoder linear1 + ReLU -> linear2 ----
    # bf16 MXU operands, f32 accumulation.
    h = jnp.dot(flat.astype(bf16), wfc1_ref[...],
                preferred_element_type=f32) + bfc1_ref[...]
    h = jnp.maximum(h, 0.0)                          # (Bt, E)
    h = jnp.dot(h.astype(bf16), wd1_ref[...],
                preferred_element_type=f32) + bd1_ref[...]
    h = jnp.maximum(h, 0.0)                          # (Bt, 128)
    out_ref[...] = jnp.dot(h.astype(bf16), wd2_ref[...],
                           preferred_element_type=f32) + bd2_ref[...]


def _default_num_batch_tiles(B):
    """1 grid step on 1-TC chips (v5e/v6e); 2 'parallel' tiles on v7x (2 TCs)."""
    try:
        kind = jax.devices()[0].device_kind.lower()
    except Exception:
        return 1
    if "v7" in kind and B % 16 == 0:
        return 2
    return 1


def autoencoder_forward(x, params, *, num_batch_tiles=None):
    B, L = x.shape
    assert L % 2 == 0
    P = L // 2
    E = params["fc1_w"].shape[0]

    if num_batch_tiles is None:
        num_batch_tiles = _default_num_batch_tiles(B)
    assert B % num_batch_tiles == 0
    Bt = B // num_batch_tiles

    f32, bf16 = jnp.float32, jnp.bfloat16
    # --- parameter rearrangement to kernel layouts (host-side layout plumbing) ---
    w1 = params["conv1_w"][:, 0, :].T.astype(f32)                   # (3, 16) w1[k, o]
    b1 = params["conv1_b"][None, :].astype(f32)                     # (1, 16)
    w2 = jnp.transpose(params["conv2_w"], (2, 1, 0)).reshape(48, 32).astype(bf16)
    b2 = params["conv2_b"][None, :].astype(f32)                     # (1, 32)
    # fc1: torch flat index is c*P + p; kernel flat index is p*32 + c.
    wfc1 = jnp.transpose(params["fc1_w"].reshape(E, 32, P),
                         (2, 1, 0)).reshape(32 * P, E).astype(bf16)  # (32*P, E)
    bfc1 = params["fc1_b"][None, :].astype(f32)                     # (1, E)
    wd1 = params["lin1_w"].T.astype(bf16)                           # (E, 128)
    bd1 = params["lin1_b"][None, :].astype(f32)                     # (1, 128)
    wd2 = params["lin2_w"].T.astype(bf16)                           # (128, L)
    bd2 = params["lin2_b"][None, :].astype(f32)                     # (1, L)

    def wspec(shape):
        nd = len(shape)
        return pl.BlockSpec(shape, lambda i, _nd=nd: (0,) * _nd)

    out = pl.pallas_call(
        functools.partial(autoencoder_kernel, L=L),
        out_shape=jax.ShapeDtypeStruct((B, L), jnp.float32),
        grid=(num_batch_tiles,),
        in_specs=[
            pl.BlockSpec((Bt, L), lambda i: (i, 0)),     # x (lane-major, no singleton)
            wspec((3, 16)), wspec((1, 16)),              # conv1
            wspec((48, 32)), wspec((1, 32)),             # conv2 (fused 48x32)
            wspec((32 * P, E)), wspec((1, E)),           # fc1 (permuted rows)
            wspec((E, 128)), wspec((1, 128)),            # decoder linear1
            wspec((128, L)), wspec((1, L)),              # decoder linear2
        ],
        out_specs=pl.BlockSpec((Bt, L), lambda i: (i, 0)),
        scratch_shapes=[
            pltpu.VMEM((Bt * L, 32), jnp.float32),       # pool pair-max rows
        ],
        compiler_params=pltpu.CompilerParams(
            dimension_semantics=("parallel",)),
    )(x.astype(f32), w1, b1, w2, b2, wfc1, bfc1, wd1, bd1, wd2, bd2)
    return out


def init_params(key, input_dim, embedding_dim=64):
    """Deterministic xavier-normal weights / zero biases (torch layouts)."""
    P = input_dim // 2
    keys = jax.random.split(key, 5)

    def xavier(k, shape, fan_in, fan_out):
        std = float(np.sqrt(2.0 / (fan_in + fan_out)))
        return std * jax.random.normal(k, shape, dtype=jnp.float32)

    return {
        "conv1_w": xavier(keys[0], (16, 1, 3), 1 * 3, 16 * 3),
        "conv1_b": jnp.zeros((16,), jnp.float32),
        "conv2_w": xavier(keys[1], (32, 16, 3), 16 * 3, 32 * 3),
        "conv2_b": jnp.zeros((32,), jnp.float32),
        "fc1_w": xavier(keys[2], (embedding_dim, 32 * P), 32 * P, embedding_dim),
        "fc1_b": jnp.zeros((embedding_dim,), jnp.float32),
        "lin1_w": xavier(keys[3], (128, embedding_dim), embedding_dim, 128),
        "lin1_b": jnp.zeros((128,), jnp.float32),
        "lin2_w": xavier(keys[4], (input_dim, 128), 128, input_dim),
        "lin2_b": jnp.zeros((input_dim,), jnp.float32),
    }


def reference_forward(x, p):
    """Pure-JAX reference matching the PyTorch forward (NCW conv layout)."""
    B, L = x.shape
    h = x[:, None, :]
    h = jax.lax.conv_general_dilated(h, p["conv1_w"], window_strides=(1,),
                                     padding=[(1, 1)],
                                     dimension_numbers=("NCH", "OIH", "NCH"))
    h = jax.nn.relu(h + p["conv1_b"][None, :, None])
    h = jax.lax.conv_general_dilated(h, p["conv2_w"], window_strides=(1,),
                                     padding=[(1, 1)],
                                     dimension_numbers=("NCH", "OIH", "NCH"))
    h = jax.nn.relu(h + p["conv2_b"][None, :, None])
    h = h.reshape(B, 32, L // 2, 2).max(axis=-1)       # MaxPool1d(2, 2)
    h = h.reshape(B, -1)                               # x.view(B, -1)
    h = jax.nn.relu(h @ p["fc1_w"].T + p["fc1_b"])
    h = jax.nn.relu(h @ p["lin1_w"].T + p["lin1_b"])
    h = h @ p["lin2_w"].T + p["lin2_b"]
    return h


if __name__ == "__main__":
    key = jax.random.PRNGKey(0)
    B, L, E = 16, 32, 64                   # batch, input_dim, embedding_dim
    pkey, xkey = jax.random.split(key)
    params = init_params(pkey, L, E)
    x = jax.random.normal(xkey, (B, L), dtype=jnp.float32)

    out = jax.block_until_ready(autoencoder_forward(x, params))
    ref = jax.block_until_ready(reference_forward(x, params))

    assert out.shape == (B, L) and out.dtype == jnp.float32
    np.testing.assert_allclose(np.asarray(out), np.asarray(ref),
                               rtol=2e-2, atol=2e-2)
    print("KERNEL_OK")
</pallas_src>

<mosaic_0001>
module attributes {stable_mosaic.version = 11 : i64} {
  func.func @autoencoder_kernel(%arg0: i32, %arg1: memref<16x32xf32, #tpu.memory_space<vmem>>, %arg2: memref<3x16xf32, #tpu.memory_space<vmem>>, %arg3: memref<1x16xf32, #tpu.memory_space<vmem>>, %arg4: memref<48x32xbf16, #tpu.memory_space<vmem>>, %arg5: memref<1x32xf32, #tpu.memory_space<vmem>>, %arg6: memref<512x64xbf16, #tpu.memory_space<vmem>>, %arg7: memref<1x64xf32, #tpu.memory_space<vmem>>, %arg8: memref<64x128xbf16, #tpu.memory_space<vmem>>, %arg9: memref<1x128xf32, #tpu.memory_space<vmem>>, %arg10: memref<128x32xbf16, #tpu.memory_space<vmem>>, %arg11: memref<1x32xf32, #tpu.memory_space<vmem>>, %arg12: memref<16x32xf32, #tpu.memory_space<vmem>>, %arg13: memref<512x32xf32, #tpu.memory_space<vmem>>) attributes {dimension_semantics = [#tpu.dimension_semantics<parallel>], iteration_bounds = array<i64: 1>, scalar_prefetch = 0 : i64, scratch_operands = 1 : i64, tpu.core_type = #tpu.core_type<tc>, window_params = [{transform_indices = @transform_0, window_bounds = array<i64: 16, 32>}, {pipeline_mode = #tpu.pipeline_mode<synchronous>, transform_indices = @transform_1, window_bounds = array<i64: 3, 16>}, {pipeline_mode = #tpu.pipeline_mode<synchronous>, transform_indices = @transform_2, window_bounds = array<i64: 1, 16>}, {pipeline_mode = #tpu.pipeline_mode<synchronous>, transform_indices = @transform_3, window_bounds = array<i64: 48, 32>}, {pipeline_mode = #tpu.pipeline_mode<synchronous>, transform_indices = @transform_4, window_bounds = array<i64: 1, 32>}, {pipeline_mode = #tpu.pipeline_mode<synchronous>, transform_indices = @transform_5, window_bounds = array<i64: 512, 64>}, {pipeline_mode = #tpu.pipeline_mode<synchronous>, transform_indices = @transform_6, window_bounds = array<i64: 1, 64>}, {pipeline_mode = #tpu.pipeline_mode<synchronous>, transform_indices = @transform_7, window_bounds = array<i64: 64, 128>}, {pipeline_mode = #tpu.pipeline_mode<synchronous>, transform_indices = @transform_8, window_bounds = array<i64: 1, 128>}, {pipeline_mode = #tpu.pipeline_mode<synchronous>, transform_indices = @transform_9, window_bounds = array<i64: 128, 32>}, {pipeline_mode = #tpu.pipeline_mode<synchronous>, transform_indices = @transform_10, window_bounds = array<i64: 1, 32>}, {transform_indices = @transform_11, window_bounds = array<i64: 16, 32>}]} {
    %c0 = arith.constant 0 : index
    %c0_0 = arith.constant 0 : index
    %0 = vector.load %arg1[%c0, %c0_0] : memref<16x32xf32, #tpu.memory_space<vmem>>, vector<16x32xf32>
    %cst = arith.constant 0.000000e+00 : f32
    %1 = vector.broadcast %cst : f32 to vector<16x1xf32>
    %2 = vector.extract_strided_slice %0 {offsets = [0, 0], sizes = [16, 31], strides = [1, 1]} : vector<16x32xf32> to vector<16x31xf32>
    %3 = tpu.concatenate %1, %2 in 1 : vector<16x1xf32>, vector<16x31xf32> -> vector<16x32xf32>
    %4 = vector.extract_strided_slice %0 {offsets = [0, 1], sizes = [16, 31], strides = [1, 1]} : vector<16x32xf32> to vector<16x31xf32>
    %5 = tpu.concatenate %4, %1 in 1 : vector<16x31xf32>, vector<16x1xf32> -> vector<16x32xf32>
    %6 = vector.shape_cast %3 : vector<16x32xf32> to vector<16x32x1xf32>
    %7 = vector.shape_cast %0 : vector<16x32xf32> to vector<16x32x1xf32>
    %8 = vector.shape_cast %5 : vector<16x32xf32> to vector<16x32x1xf32>
    %9 = tpu.concatenate %6, %7, %8 in 2 : vector<16x32x1xf32>, vector<16x32x1xf32>, vector<16x32x1xf32> -> vector<16x32x3xf32>
    %10 = vector.shape_cast %9 : vector<16x32x3xf32> to vector<512x3xf32>
    %c0_1 = arith.constant 0 : index
    %c0_2 = arith.constant 0 : index
    %11 = vector.load %arg2[%c0_1, %c0_2] : memref<3x16xf32, #tpu.memory_space<vmem>>, vector<3x16xf32>
    %cst_3 = arith.constant dense<0.000000e+00> : vector<512x16xf32>
    %12 = tpu.matmul %10, %11, %cst_3 {dimension_numbers = #tpu.dot_dimension_numbers<[1], [0], [0], [1], [0, 0, 1, 1], [], []>} : vector<512x3xf32>, vector<3x16xf32>, vector<512x16xf32> -> vector<512x16xf32>
    %c0_4 = arith.constant 0 : index
    %c0_5 = arith.constant 0 : index
    %13 = vector.load %arg3[%c0_4, %c0_5] : memref<1x16xf32, #tpu.memory_space<vmem>>, vector<1x16xf32>
    %14 = vector.broadcast %13 : vector<1x16xf32> to vector<512x16xf32>
    %15 = arith.addf %12, %14 : vector<512x16xf32>
    %cst_6 = arith.constant 0.000000e+00 : f32
    %16 = vector.broadcast %cst_6 : f32 to vector<512x16xf32>
    %17 = arith.maximumf %15, %16 : vector<512x16xf32>
    %18 = vector.shape_cast %17 : vector<512x16xf32> to vector<16x32x16xf32>
    %cst_7 = arith.constant 0.000000e+00 : f32
    %19 = vector.broadcast %cst_7 : f32 to vector<16x1x16xf32>
    %20 = vector.extract_strided_slice %18 {offsets = [0, 0, 0], sizes = [16, 31, 16], strides = [1, 1, 1]} : vector<16x32x16xf32> to vector<16x31x16xf32>
    %21 = tpu.concatenate %19, %20 in 1 : vector<16x1x16xf32>, vector<16x31x16xf32> -> vector<16x32x16xf32>
    %22 = vector.extract_strided_slice %18 {offsets = [0, 1, 0], sizes = [16, 31, 16], strides = [1, 1, 1]} : vector<16x32x16xf32> to vector<16x31x16xf32>
    %23 = tpu.concatenate %22, %19 in 1 : vector<16x31x16xf32>, vector<16x1x16xf32> -> vector<16x32x16xf32>
    %24 = tpu.concatenate %21, %18, %23 in 2 : vector<16x32x16xf32>, vector<16x32x16xf32>, vector<16x32x16xf32> -> vector<16x32x48xf32>
    %25 = vector.shape_cast %24 : vector<16x32x48xf32> to vector<512x48xf32>
    %26 = arith.truncf %25 : vector<512x48xf32> to vector<512x48xbf16>
    %c0_8 = arith.constant 0 : index
    %c0_9 = arith.constant 0 : index
    %27 = vector.load %arg4[%c0_8, %c0_9] : memref<48x32xbf16, #tpu.memory_space<vmem>>, vector<48x32xbf16>
    %cst_10 = arith.constant dense<0.000000e+00> : vector<512x32xf32>
    %28 = tpu.matmul %26, %27, %cst_10 {dimension_numbers = #tpu.dot_dimension_numbers<[1], [0], [0], [1], [0, 0, 1, 1], [], []>} : vector<512x48xbf16>, vector<48x32xbf16>, vector<512x32xf32> -> vector<512x32xf32>
    %c0_11 = arith.constant 0 : index
    %c0_12 = arith.constant 0 : index
    %29 = vector.load %arg5[%c0_11, %c0_12] : memref<1x32xf32, #tpu.memory_space<vmem>>, vector<1x32xf32>
    %30 = vector.broadcast %29 : vector<1x32xf32> to vector<512x32xf32>
    %31 = arith.addf %28, %30 : vector<512x32xf32>
    %cst_13 = arith.constant 0.000000e+00 : f32
    %32 = vector.broadcast %cst_13 : f32 to vector<512x32xf32>
    %33 = arith.maximumf %31, %32 : vector<512x32xf32>
    %cst_14 = arith.constant 0.000000e+00 : f32
    %34 = vector.broadcast %cst_14 : f32 to vector<1x32xf32>
    %35 = vector.extract_strided_slice %33 {offsets = [1, 0], sizes = [511, 32], strides = [1, 1]} : vector<512x32xf32> to vector<511x32xf32>
    %36 = tpu.concatenate %35, %34 in 0 : vector<511x32xf32>, vector<1x32xf32> -> vector<512x32xf32>
    %37 = arith.maximumf %33, %36 : vector<512x32xf32>
    %c0_15 = arith.constant 0 : index
    %c0_16 = arith.constant 0 : index
    %38 = vector.load %arg13[%c0_15, %c0_16] : memref<512x32xf32, #tpu.memory_space<vmem>>, vector<512x32xf32>
    tpu.vector_store %arg13[%c0_15, %c0_16], %37 {strides = array<i32>} : memref<512x32xf32, #tpu.memory_space<vmem>>, vector<512x32xf32>,
    %c0_17 = arith.constant 0 : index
    %c0_18 = arith.constant 0 : index
    %39 = tpu.strided_load %arg13[%c0_17, %c0_18] {strides = array<i32: 32, 1>} : memref<512x32xf32, #tpu.memory_space<vmem>>, vector<16x32xf32>
    %c2 = arith.constant 2 : index
    %c0_19 = arith.constant 0 : index
    %40 = tpu.strided_load %arg13[%c2, %c0_19] {strides = array<i32: 32, 1>} : memref<512x32xf32, #tpu.memory_space<vmem>>, vector<16x32xf32>
    %c4 = arith.constant 4 : index
    %c0_20 = arith.constant 0 : index
    %41 = tpu.strided_load %arg13[%c4, %c0_20] {strides = array<i32: 32, 1>} : memref<512x32xf32, #tpu.memory_space<vmem>>, vector<16x32xf32>
    %c6 = arith.constant 6 : index
    %c0_21 = arith.constant 0 : index
    %42 = tpu.strided_load %arg13[%c6, %c0_21] {strides = array<i32: 32, 1>} : memref<512x32xf32, #tpu.memory_space<vmem>>, vector<16x32xf32>
    %c8 = arith.constant 8 : index
    %c0_22 = arith.constant 0 : index
    %43 = tpu.strided_load %arg13[%c8, %c0_22] {strides = array<i32: 32, 1>} : memref<512x32xf32, #tpu.memory_space<vmem>>, vector<16x32xf32>
    %c10 = arith.constant 10 : index
    %c0_23 = arith.constant 0 : index
    %44 = tpu.strided_load %arg13[%c10, %c0_23] {strides = array<i32: 32, 1>} : memref<512x32xf32, #tpu.memory_space<vmem>>, vector<16x32xf32>
    %c12 = arith.constant 12 : index
    %c0_24 = arith.constant 0 : index
    %45 = tpu.strided_load %arg13[%c12, %c0_24] {strides = array<i32: 32, 1>} : memref<512x32xf32, #tpu.memory_space<vmem>>, vector<16x32xf32>
    %c14 = arith.constant 14 : index
    %c0_25 = arith.constant 0 : index
    %46 = tpu.strided_load %arg13[%c14, %c0_25] {strides = array<i32: 32, 1>} : memref<512x32xf32, #tpu.memory_space<vmem>>, vector<16x32xf32>
    %c16 = arith.constant 16 : index
    %c0_26 = arith.constant 0 : index
    %47 = tpu.strided_load %arg13[%c16, %c0_26] {strides = array<i32: 32, 1>} : memref<512x32xf32, #tpu.memory_space<vmem>>, vector<16x32xf32>
    %c18 = arith.constant 18 : index
    %c0_27 = arith.constant 0 : index
    %48 = tpu.strided_load %arg13[%c18, %c0_27] {strides = array<i32: 32, 1>} : memref<512x32xf32, #tpu.memory_space<vmem>>, vector<16x32xf32>
    %c20 = arith.constant 20 : index
    %c0_28 = arith.constant 0 : index
    %49 = tpu.strided_load %arg13[%c20, %c0_28] {strides = array<i32: 32, 1>} : memref<512x32xf32, #tpu.memory_space<vmem>>, vector<16x32xf32>
    %c22 = arith.constant 22 : index
    %c0_29 = arith.constant 0 : index
    %50 = tpu.strided_load %arg13[%c22, %c0_29] {strides = array<i32: 32, 1>} : memref<512x32xf32, #tpu.memory_space<vmem>>, vector<16x32xf32>
    %c24 = arith.constant 24 : index
    %c0_30 = arith.constant 0 : index
    %51 = tpu.strided_load %arg13[%c24, %c0_30] {strides = array<i32: 32, 1>} : memref<512x32xf32, #tpu.memory_space<vmem>>, vector<16x32xf32>
    %c26 = arith.constant 26 : index
    %c0_31 = arith.constant 0 : index
    %52 = tpu.strided_load %arg13[%c26, %c0_31] {strides = array<i32: 32, 1>} : memref<512x32xf32, #tpu.memory_space<vmem>>, vector<16x32xf32>
    %c28 = arith.constant 28 : index
    %c0_32 = arith.constant 0 : index
    %53 = tpu.strided_load %arg13[%c28, %c0_32] {strides = array<i32: 32, 1>} : memref<512x32xf32, #tpu.memory_space<vmem>>, vector<16x32xf32>
    %c30 = arith.constant 30 : index
    %c0_33 = arith.constant 0 : index
    %54 = tpu.strided_load %arg13[%c30, %c0_33] {strides = array<i32: 32, 1>} : memref<512x32xf32, #tpu.memory_space<vmem>>, vector<16x32xf32>
    %55 = tpu.concatenate %39, %40, %41, %42, %43, %44, %45, %46, %47, %48, %49, %50, %51, %52, %53, %54 in 1 : vector<16x32xf32>, vector<16x32xf32>, vector<16x32xf32>, vector<16x32xf32>, vector<16x32xf32>, vector<16x32xf32>, vector<16x32xf32>, vector<16x32xf32>, vector<16x32xf32>, vector<16x32xf32>, vector<16x32xf32>, vector<16x32xf32>, vector<16x32xf32>, vector<16x32xf32>, vector<16x32xf32>, vector<16x32xf32> -> vector<16x512xf32>
    %56 = arith.truncf %55 : vector<16x512xf32> to vector<16x512xbf16>
    %c0_34 = arith.constant 0 : index
    %c0_35 = arith.constant 0 : index
    %57 = vector.load %arg6[%c0_34, %c0_35] : memref<512x64xbf16, #tpu.memory_space<vmem>>, vector<512x64xbf16>
    %cst_36 = arith.constant dense<0.000000e+00> : vector<16x64xf32>
    %58 = tpu.matmul %56, %57, %cst_36 {dimension_numbers = #tpu.dot_dimension_numbers<[1], [0], [0], [1], [0, 0, 1, 1], [], []>} : vector<16x512xbf16>, vector<512x64xbf16>, vector<16x64xf32> -> vector<16x64xf32>
    %c0_37 = arith.constant 0 : index
    %c0_38 = arith.constant 0 : index
    %59 = vector.load %arg7[%c0_37, %c0_38] : memref<1x64xf32, #tpu.memory_space<vmem>>, vector<1x64xf32>
    %60 = vector.broadcast %59 : vector<1x64xf32> to vector<16x64xf32>
    %61 = arith.addf %58, %60 : vector<16x64xf32>
    %cst_39 = arith.constant 0.000000e+00 : f32
    %62 = vector.broadcast %cst_39 : f32 to vector<16x64xf32>
    %63 = arith.maximumf %61, %62 : vector<16x64xf32>
    %64 = arith.truncf %63 : vector<16x64xf32> to vector<16x64xbf16>
    %c0_40 = arith.constant 0 : index
    %c0_41 = arith.constant 0 : index
    %65 = vector.load %arg8[%c0_40, %c0_41] : memref<64x128xbf16, #tpu.memory_space<vmem>>, vector<64x128xbf16>
    %cst_42 = arith.constant dense<0.000000e+00> : vector<16x128xf32>
    %66 = tpu.matmul %64, %65, %cst_42 {dimension_numbers = #tpu.dot_dimension_numbers<[1], [0], [0], [1], [0, 0, 1, 1], [], []>} : vector<16x64xbf16>, vector<64x128xbf16>, vector<16x128xf32> -> vector<16x128xf32>
    %c0_43 = arith.constant 0 : index
    %c0_44 = arith.constant 0 : index
    %67 = vector.load %arg9[%c0_43, %c0_44] : memref<1x128xf32, #tpu.memory_space<vmem>>, vector<1x128xf32>
    %68 = vector.broadcast %67 : vector<1x128xf32> to vector<16x128xf32>
    %69 = arith.addf %66, %68 : vector<16x128xf32>
    %cst_45 = arith.constant 0.000000e+00 : f32
    %70 = vector.broadcast %cst_45 : f32 to vector<16x128xf32>
    %71 = arith.maximumf %69, %70 : vector<16x128xf32>
    %72 = arith.truncf %71 : vector<16x128xf32> to vector<16x128xbf16>
    %c0_46 = arith.constant 0 : index
    %c0_47 = arith.constant 0 : index
    %73 = vector.load %arg10[%c0_46, %c0_47] : memref<128x32xbf16, #tpu.memory_space<vmem>>, vector<128x32xbf16>
    %cst_48 = arith.constant dense<0.000000e+00> : vector<16x32xf32>
    %74 = tpu.matmul %72, %73, %cst_48 {dimension_numbers = #tpu.dot_dimension_numbers<[1], [0], [0], [1], [0, 0, 1, 1], [], []>} : vector<16x128xbf16>, vector<128x32xbf16>, vector<16x32xf32> -> vector<16x32xf32>
    %c0_49 = arith.constant 0 : index
    %c0_50 = arith.constant 0 : index
    %75 = vector.load %arg11[%c0_49, %c0_50] : memref<1x32xf32, #tpu.memory_space<vmem>>, vector<1x32xf32>
    %76 = vector.broadcast %75 : vector<1x32xf32> to vector<16x32xf32>
    %77 = arith.addf %74, %76 : vector<16x32xf32>
    %c0_51 = arith.constant 0 : index
    %c0_52 = arith.constant 0 : index
    %78 = vector.load %arg12[%c0_51, %c0_52] : memref<16x32xf32, #tpu.memory_space<vmem>>, vector<16x32xf32>
    tpu.vector_store %arg12[%c0_51, %c0_52], %77 {strides = array<i32>} : memref<16x32xf32, #tpu.memory_space<vmem>>, vector<16x32xf32>,
    return
  }
  func.func @transform_0(%arg0: i32) -> (i32, i32) {
    %c0_i32 = arith.constant 0 : i32
    %c0_i32_0 = arith.constant 0 : i32
    return %arg0, %c0_i32 : i32, i32
  }
  func.func @transform_1(%arg0: i32) -> (i32, i32) {
    %c0_i32 = arith.constant 0 : i32
    %c0_i32_0 = arith.constant 0 : i32
    %c0_i32_1 = arith.constant 0 : i32
    return %c0_i32, %c0_i32_0 : i32, i32
  }
  func.func @transform_2(%arg0: i32) -> (i32, i32) {
    %c0_i32 = arith.constant 0 : i32
    %c0_i32_0 = arith.constant 0 : i32
    %c0_i32_1 = arith.constant 0 : i32
    return %c0_i32, %c0_i32_0 : i32, i32
  }
  func.func @transform_3(%arg0: i32) -> (i32, i32) {
    %c0_i32 = arith.constant 0 : i32
    %c0_i32_0 = arith.constant 0 : i32
    %c0_i32_1 = arith.constant 0 : i32
    return %c0_i32, %c0_i32_0 : i32, i32
  }
  func.func @transform_4(%arg0: i32) -> (i32, i32) {
    %c0_i32 = arith.constant 0 : i32
    %c0_i32_0 = arith.constant 0 : i32
    %c0_i32_1 = arith.constant 0 : i32
    return %c0_i32, %c0_i32_0 : i32, i32
  }
  func.func @transform_5(%arg0: i32) -> (i32, i32) {
    %c0_i32 = arith.constant 0 : i32
    %c0_i32_0 = arith.constant 0 : i32
    %c0_i32_1 = arith.constant 0 : i32
    return %c0_i32, %c0_i32_0 : i32, i32
  }
  func.func @transform_6(%arg0: i32) -> (i32, i32) {
    %c0_i32 = arith.constant 0 : i32
    %c0_i32_0 = arith.constant 0 : i32
    %c0_i32_1 = arith.constant 0 : i32
    return %c0_i32, %c0_i32_0 : i32, i32
  }
  func.func @transform_7(%arg0: i32) -> (i32, i32) {
    %c0_i32 = arith.constant 0 : i32
    %c0_i32_0 = arith.constant 0 : i32
    %c0_i32_1 = arith.constant 0 : i32
    return %c0_i32, %c0_i32_0 : i32, i32
  }
  func.func @transform_8(%arg0: i32) -> (i32, i32) {
    %c0_i32 = arith.constant 0 : i32
    %c0_i32_0 = arith.constant 0 : i32
    %c0_i32_1 = arith.constant 0 : i32
    return %c0_i32, %c0_i32_0 : i32, i32
  }
  func.func @transform_9(%arg0: i32) -> (i32, i32) {
    %c0_i32 = arith.constant 0 : i32
    %c0_i32_0 = arith.constant 0 : i32
    %c0_i32_1 = arith.constant 0 : i32
    return %c0_i32, %c0_i32_0 : i32, i32
  }
  func.func @transform_10(%arg0: i32) -> (i32, i32) {
    %c0_i32 = arith.constant 0 : i32
    %c0_i32_0 = arith.constant 0 : i32
    %c0_i32_1 = arith.constant 0 : i32
    return %c0_i32, %c0_i32_0 : i32, i32
  }
  func.func @transform_11(%arg0: i32) -> (i32, i32) {
    %c0_i32 = arith.constant 0 : i32
    %c0_i32_0 = arith.constant 0 : i32
    return %arg0, %c0_i32 : i32, i32
  }
}

</mosaic_0001>

<bundles_post_ra>
// kernel: tpu_custom_call.1
= control target key start
LH: loop header
LB: loop body
LE: loop exit
PB: predicated region body
PF: predicated region fallthrough
CT: control target
= control target key end

     0   :  { %v62_v1 = vlaneseq  ;;  %s5757_s19 = smov 1   ;;  %s5758_s20 = smov 127   ;;  %s7980_s0 = inlined_call_operand.vmem [shape: f32[16,32], index: 0, kind: input, shape index: {}]   ;;  %s7981_s1 = inlined_call_operand.vmem [shape: f32[3,16], index: 1, kind: input, shape index: {}]   ;;  %s7982_s2 = inlined_call_operand.vmem [shape: f32[1,16], index: 2, kind: input, shape index: {}]   ;;  %s7983_s3 = inlined_call_operand.vmem [shape: bf16[48,32], index: 3, kind: input, shape index: {}]   ;;  %s7984_s4 = inlined_call_operand.vmem [shape: f32[1,32], index: 4, kind: input, shape index: {}]   ;;  %s7985_s5 = inlined_call_operand.vmem [shape: bf16[512,64], index: 5, kind: input, shape index: {}]   ;;  %s7986_s6 = inlined_call_operand.vmem [shape: f32[1,64], index: 6, kind: input, shape index: {}]   ;;  %s7987_s7 = inlined_call_operand.vmem [shape: bf16[64,128], index: 7, kind: input, shape index: {}]   ;;  %s7988_s8 = inlined_call_operand.vmem [shape: f32[1,128], index: 8, kind: input, shape index: {}]   ;;  %s7989_s9 = inlined_call_operand.vmem [shape: bf16[128,32], index: 9, kind: input, shape index: {}]   ;;  %s7990_s10 = inlined_call_operand.vmem [shape: f32[1,32], index: 10, kind: input, shape index: {}]   ;;  %s7991_s11 = inlined_call_operand.hbm [shape: f32[16,32], index: 11, kind: output, shape index: {}]  }
   0x1   :  { %v5831_v0 = vld [vmem:[%s7980_s0] sm:$0xff]  ;;  %v5845_v5 = vld [vmem:[%s7980_s0 + $0x8] sm:$0xff] }
   0x2   :  { %44 = vrot.lane.b32.xlu0 %v5831_v0, %s5757_s19  ;;  %v5834_v2 = vshrl.u32 %v62_v1, 7 }
   0x4   :  { %v5837_v3 = vsub.s32 0, %v5834_v2  ;;  %v5850_v6 = vsub.s32 1, %v5834_v2  ;;  %v5855_v8 = vsub.s32 2, %v5834_v2 }
   0x6   :  { %53 = vrot.lane.b32.xlu0 %v5831_v0, %s5758_s20  ;;  %v369_v4 = vrot.slane %v5831_v0, %v5837_v3  ;;  %v388_v7 = vrot.slane %v5831_v0, %v5850_v6 }
   0x8   :  { %371 = vbcast.lane.b32.xlu1 %v369_v4, 256 }
   0xa   :  { %46 = vrot.lane.b32.xlu0 %v5845_v5, %s5757_s19 }
   0xc   :  { %375 = vbcast.lane.b32.xlu1 %v369_v4, 264 }
  0x10   :  { %55 = vrot.lane.b32.xlu1 %v5845_v5, %s5758_s20 }
  0x14   :  { %379 = vbcast.lane.b32.xlu1 %v369_v4, 272 }
  0x18   :  { %383 = vbcast.lane.b32.xlu1 %v369_v4, 280 }
  0x1c   :  { %390 = vbcast.lane.b32.xlu1 %v388_v7, 256 }
  0x20   :  { %394 = vbcast.lane.b32.xlu1 %v388_v7, 264 }
  0x24   :  { %398 = vbcast.lane.b32.xlu1 %v388_v7, 272 }
  0x25   :  { %16 = vsyncpa [#allocation4], 0  ;;  %v407_v9 = vrot.slane %v5831_v0, %v5855_v8  ;;  %v5860_v10 = vsub.s32 3, %v5834_v2  ;;  %v5865_v12 = vsub.s32 4, %v5834_v2  ;;  %v1103_v14 = vld [vmem:[%s7981_s1] sm:$0x7]  ;;  %v521_v62 = vrot.slane %v5845_v5, %v5837_v3 }
  0x26   :  { %vm1304_vm0 = vcmask 1042432   ;;  %vm50_vm1 = vcmask 7168   ;;  %vm59_vm2 = vcmask 252928   ;;  %v5914_v35 = vsub.s32 5, %v5834_v2  ;;  %s5759_s25 = smov 16   ;;  %s5760_s26 = smov 32  }
  0x27   :  { %v426_v11 = vrot.slane %v5831_v0, %v5860_v10  ;;  %v445_v13 = vrot.slane %v5831_v0, %v5865_v12  ;;  %5095 = vmatprep.subr.msk.mxu0 %vm1304_vm0, %v1103_v14  ;;  %v5935_v43 = vsub.s32 6, %v5834_v2  ;;  %v5956_v51 = vsub.s32 7, %v5834_v2  ;;  %s5761_s28 = smov 64  }
  0x28   :  { %402 = vbcast.lane.b32.xlu1 %v388_v7, 280  ;;  %5096 = vmatpush3.msk.msra.mxu0 %vm1304_vm0, %v1103_v14  ;;  %v464_v37 = vrot.slane %v5831_v0, %v5914_v35  ;;  %vm1038_vm3 = vcmask 15360   ;;  %vm1111_vm4 = vcmask 23552   ;;  %vm1821_vm5 = vcmask 1040384  }
  0x29   :  { %v483_v45 = vrot.slane %v5831_v0, %v5935_v43  ;;  %v502_v53 = vrot.slane %v5831_v0, %v5956_v51  ;;  %vm2014_vm6 = vcmask 1046528   ;;  %vm2559_vm7 = vcmask 130048  }
  0x2a   :  { %vm2624_vm8 = vcmask 261120   ;;  %vm2752_vm9 = vcmask 392192   ;;  %vm4195_vm10 = vcmask 523264   ;;  %vm4198_vm11 = vcmask 785408  }
  0x2b   :  { %vm5764_vm12 = vmmov 0  }
  0x2c   :  { %409 = vbcast.lane.b32.xlu1 %v407_v9, 256 }
  0x30   :  { %413 = vbcast.lane.b32.xlu1 %v407_v9, 264 }
  0x34   :  { %417 = vbcast.lane.b32.xlu1 %v407_v9, 272 }
  0x38   :  { %421 = vbcast.lane.b32.xlu1 %v407_v9, 280 }
  0x3c   :  { %428 = vbcast.lane.b32.xlu1 %v426_v11, 256 }
  0x40   :  { %432 = vbcast.lane.b32.xlu1 %v426_v11, 264 }
  0x44   :  { %436 = vbcast.lane.b32.xlu1 %v426_v11, 272 }
  0x48   :  { %440 = vbcast.lane.b32.xlu1 %v426_v11, 280 }
  0x4c   :  { %447 = vbcast.lane.b32.xlu1 %v445_v13, 256 }
  0x50   :  { %451 = vbcast.lane.b32.xlu1 %v445_v13, 264 }
  0x54   :  { %455 = vbcast.lane.b32.xlu1 %v445_v13, 272 }
  0x74   :  { %v45_v15 = vpop.permute.xlu0 %44 }
  0x75   :  { %v5873_v16 = vsel %vm50_vm1, 0.0, %v45_v15 }
  0x76   :  { %v65_v17 = vrot.slane %v5873_v16, %v5837_v3  ;;  %v84_v26 = vrot.slane %v5873_v16, %v5850_v6  ;;  %v103_v34 = vrot.slane %v5873_v16, %v5855_v8  ;;  %v122_v42 = vrot.slane %v5873_v16, %v5860_v10 }
  0x77   :  { %v141_v50 = vrot.slane %v5873_v16, %v5865_v12  ;;  %v160_v61 = vrot.slane %v5873_v16, %v5914_v35 }
  0x78   :  { %71 = vbcast.lane.b32.xlu0 %v65_v17, 264  ;;  %v54_v18 = vpop.permute.xlu0 %53  ;;  %67 = vbcast.lane.b32.xlu1 %v65_v17, 256 }
  0x79   :  { %v5878_v19 = vsel %vm59_vm2, %v54_v18, 0.0 }
  0x7a   :  { %v673_v20 = vrot.slane %v5878_v19, %v5837_v3  ;;  %v5882_v21 = vpop.permute.xlu1 %371  ;;  %v692_v23 = vrot.slane %v5878_v19, %v5850_v6  ;;  %v711_v27 = vrot.slane %v5878_v19, %v5855_v8  ;;  %v730_v30 = vrot.slane %v5878_v19, %v5860_v10 }
  0x7b   :  { %v5906_v32 = vrot.slane %v5878_v19, %v5865_v12  ;;  %v5925_v39 = vrot.slane %v5878_v19, %v5914_v35  ;;  %v5946_v47 = vrot.slane %v5878_v19, %v5935_v43  ;;  %v5968_v55 = vrot.slane %v5878_v19, %v5956_v51 }
  0x7c   :  { %675 = vbcast.lane.b32.xlu0 %v673_v20, 256  ;;  %679 = vbcast.lane.b32.xlu1 %v673_v20, 264  ;;  %v5973_v57 = vpop.permute.xlu0 %46 }
  0x7e   :  { %v5884_v22 = vpop.permute.xlu1 %375 }
  0x80   :  { %75 = vbcast.lane.b32.xlu0 %v65_v17, 272  ;;  %687 = vbcast.lane.b32.xlu1 %v673_v20, 280 }
  0x82   :  { %v5888_v24 = vpop.permute.xlu1 %55 }
  0x84   :  { %79 = vbcast.lane.b32.xlu0 %v65_v17, 280  ;;  %698 = vbcast.lane.b32.xlu1 %v692_v23, 264 }
  0x86   :  { %v5890_v25 = vpop.permute.xlu1 %379 }
  0x88   :  { %683 = vbcast.lane.b32.xlu0 %v673_v20, 272  ;;  %706 = vbcast.lane.b32.xlu1 %v692_v23, 280 }
  0x8a   :  { %v5896_v28 = vpop.permute.xlu1 %383 }
  0x8c   :  { %86 = vbcast.lane.b32.xlu0 %v84_v26, 256  ;;  %717 = vbcast.lane.b32.xlu1 %v711_v27, 264 }
  0x8e   :  { %v5898_v29 = vpop.permute.xlu1 %390 }
  0x90   :  { %90 = vbcast.lane.b32.xlu0 %v84_v26, 264  ;;  %725 = vbcast.lane.b32.xlu1 %v711_v27, 280 }
  0x92   :  { %v5902_v31 = vpop.permute.xlu1 %394 }
  0x94   :  { %694 = vbcast.lane.b32.xlu0 %v692_v23, 256  ;;  %736 = vbcast.lane.b32.xlu1 %v730_v30, 264 }
  0x96   :  { %v5909_v33 = vpop.permute.xlu1 %398 }
  0x98   :  { %94 = vbcast.lane.b32.xlu0 %v84_v26, 272  ;;  %744 = vbcast.lane.b32.xlu1 %v730_v30, 280 }
  0x9a   :  { %v5916_v36 = vpop.permute.xlu1 %402 }
  0x9c   :  { %98 = vbcast.lane.b32.xlu0 %v84_v26, 280  ;;  %755 = vbcast.lane.b32.xlu1 %v5906_v32, 264 }
  0x9e   :  { %v5921_v38 = vpop.permute.xlu1 %409 }
  0xa0   :  { %702 = vbcast.lane.b32.xlu0 %v692_v23, 272  ;;  %459 = vbcast.lane.b32.xlu1 %v445_v13, 280  ;;  %v5993_v13 = vsel %vm59_vm2, %v5888_v24, 0.0 }
  0xa1   :  { %v5998_v17 = vrot.slane %v5993_v13, %v5837_v3 }
  0xa2   :  { %v5927_v40 = vpop.permute.xlu1 %413 }
  0xa4   :  { %105 = vbcast.lane.b32.xlu0 %v103_v34, 256  ;;  %763 = vbcast.lane.b32.xlu1 %v5906_v32, 280 }
  0xa6   :  { %v5930_v41 = vpop.permute.xlu1 %417 }
  0xa8   :  { %109 = vbcast.lane.b32.xlu0 %v103_v34, 264  ;;  %466 = vbcast.lane.b32.xlu1 %v464_v37, 256 }
  0xaa   :  { %v5937_v44 = vpop.permute.xlu1 %421 }
  0xac   :  { %713 = vbcast.lane.b32.xlu0 %v711_v27, 256  ;;  %470 = vbcast.lane.b32.xlu1 %v464_v37, 264 }
  0xae   :  { %v5942_v46 = vpop.permute.xlu1 %428 }
  0xb0   :  { %113 = vbcast.lane.b32.xlu0 %v103_v34, 272  ;;  %774 = vbcast.lane.b32.xlu1 %v5925_v39, 264 }
  0xb2   :  { %v5948_v48 = vpop.permute.xlu1 %432 }
  0xb4   :  { %117 = vbcast.lane.b32.xlu0 %v103_v34, 280  ;;  %474 = vbcast.lane.b32.xlu1 %v464_v37, 272 }
  0xb6   :  { %v5951_v49 = vpop.permute.xlu1 %436 }
  0xb8   :  { %721 = vbcast.lane.b32.xlu0 %v711_v27, 272  ;;  %478 = vbcast.lane.b32.xlu1 %v464_v37, 280 }
  0xba   :  { %v5958_v52 = vpop.permute.xlu1 %440 }
  0xbc   :  { %124 = vbcast.lane.b32.xlu0 %v122_v42, 256  ;;  %782 = vbcast.lane.b32.xlu1 %v5925_v39, 280 }
  0xbe   :  { %v5963_v54 = vpop.permute.xlu1 %447 }
  0xc0   :  { %128 = vbcast.lane.b32.xlu0 %v122_v42, 264  ;;  %485 = vbcast.lane.b32.xlu1 %v483_v45, 256 }
  0xc2   :  { %v5970_v56 = vpop.permute.xlu1 %451 }
  0xc4   :  { %732 = vbcast.lane.b32.xlu0 %v730_v30, 256  ;;  %489 = vbcast.lane.b32.xlu1 %v483_v45, 264 }
  0xc6   :  { %v5975_v58 = vpop.permute.xlu1 %455 }
  0xc8   :  { %132 = vbcast.lane.b32.xlu0 %v122_v42, 272  ;;  %793 = vbcast.lane.b32.xlu1 %v5946_v47, 264 }
  0xcc   :  { %136 = vbcast.lane.b32.xlu0 %v122_v42, 280  ;;  %493 = vbcast.lane.b32.xlu1 %v483_v45, 272 }
  0xd0   :  { %740 = vbcast.lane.b32.xlu0 %v730_v30, 272  ;;  %497 = vbcast.lane.b32.xlu1 %v483_v45, 280  ;;  %v540_v30 = vrot.slane %v5845_v5, %v5850_v6 }
  0xd4   :  { %143 = vbcast.lane.b32.xlu0 %v141_v50, 256  ;;  %801 = vbcast.lane.b32.xlu1 %v5946_v47, 280 }
  0xd8   :  { %147 = vbcast.lane.b32.xlu0 %v141_v50, 264  ;;  %504 = vbcast.lane.b32.xlu1 %v502_v53, 256 }
  0xdc   :  { %751 = vbcast.lane.b32.xlu0 %v5906_v32, 256  ;;  %508 = vbcast.lane.b32.xlu1 %v502_v53, 264 }
  0xe0   :  { %151 = vbcast.lane.b32.xlu0 %v141_v50, 272  ;;  %812 = vbcast.lane.b32.xlu1 %v5968_v55, 264 }
  0xe4   :  { %155 = vbcast.lane.b32.xlu0 %v141_v50, 280  ;;  %512 = vbcast.lane.b32.xlu1 %v502_v53, 272 }
  0xe8   :  { %759 = vbcast.lane.b32.xlu0 %v5906_v32, 272  ;;  %516 = vbcast.lane.b32.xlu1 %v502_v53, 280 }
  0xea   :  { %v72_v59 = vpop.permute.xlu0 %71  ;;  %v68_v60 = vpop.permute.xlu1 %67 }
  0xeb   :  { %v975_v63 = vsel %vm50_vm1, %v72_v59, %v5884_v22  ;;  %v974_v0 = vsel %vm50_vm1, %v68_v60, %v5882_v21  ;;  %v6034_v59 = vrot.slane %v5993_v13, %v5850_v6 }
  0xec   :  { %162 = vbcast.lane.b32.xlu0 %v160_v61, 256  ;;  %820 = vbcast.lane.b32.xlu1 %v5968_v55, 280 }
  0xee   :  { %v676_v1 = vpop.permute.xlu0 %675  ;;  %v680_v2 = vpop.permute.xlu1 %679 }
  0xef   :  { %v1040_v4 = vsel %vm1038_vm3, %v975_v63, %v680_v2  ;;  %v1039_v7 = vsel %vm1038_vm3, %v974_v0, %v676_v1 }
  0xf0   :  { %166 = vbcast.lane.b32.xlu0 %v160_v61, 264  ;;  %523 = vbcast.lane.b32.xlu1 %v521_v62, 256 }
  0xf1   :  { %5097 = vmatprep.mubr.msk.f32.mxu0 %vm1111_vm4, %v1039_v7  ;;  %v198_v7 = vrot.slane %v5873_v16, %v5956_v51 }
  0xf2   :  { %5098 = vmatmul.mubr.msk.f32.vlgmr.msra.gmra.mxu0 %vm1111_vm4, %v1040_v4  ;;  %v76_v9 = vpop.permute.xlu0 %75  ;;  %v688_v11 = vpop.permute.xlu1 %687 }
  0xf3   :  { %v976_v18 = vsel %vm50_vm1, %v76_v9, %v5890_v25  ;;  %v559_v9 = vrot.slane %v5845_v5, %v5855_v8 }
  0xf4   :  { %770 = vbcast.lane.b32.xlu0 %v5925_v39, 256  ;;  %527 = vbcast.lane.b32.xlu1 %v521_v62, 264 }
  0xf6   :  { %v80_v14 = vpop.permute.xlu0 %79  ;;  %v699_v15 = vpop.permute.xlu1 %698 }
  0xf7   :  { %v977_v19 = vsel %vm50_vm1, %v80_v14, %v5896_v28  ;;  %v179_v28 = vrot.slane %v5873_v16, %v5935_v43 }
  0xf8   :  { %170 = vbcast.lane.b32.xlu0 %v160_v61, 272  ;;  %831 = vbcast.lane.b32.xlu1 %v5998_v17, 264  ;;  %v1042_v23 = vsel %vm1038_vm3, %v977_v19, %v688_v11 }
  0xfa   :  { %v684_v20 = vpop.permute.xlu0 %683  ;;  %v707_v21 = vpop.permute.xlu1 %706 }
  0xfb   :  { %v1041_v22 = vsel %vm1038_vm3, %v976_v18, %v684_v20 }
  0xfc   :  { %174 = vbcast.lane.b32.xlu0 %v160_v61, 280  ;;  %531 = vbcast.lane.b32.xlu1 %v521_v62, 272 }
  0xfd   :  { %5100 = vmatprep.mubr.msk.f32.mxu0 %vm1111_vm4, %v1041_v22 }
  0xfe   :  { %5101 = vmatmul.mubr.msk.f32.gmra.mxu0 %vm1111_vm4, %v1042_v23  ;;  %v87_v24 = vpop.permute.xlu0 %86  ;;  %v718_v26 = vpop.permute.xlu1 %717 }
  0xff   :  { %v978_v32 = vsel %vm50_vm1, %v87_v24, %v5898_v29 }
 0x100   :  { %778 = vbcast.lane.b32.xlu0 %v5925_v39, 272  ;;  %535 = vbcast.lane.b32.xlu1 %v521_v62, 280 }
 0x102   :  { %v91_v25 = vpop.permute.xlu0 %90  ;;  %v6010_v27 = vpop.permute.xlu1 %725 }
 0x103   :  { %v979_v34 = vsel %vm50_vm1, %v91_v25, %v5902_v31 }
 0x104   :  { %181 = vbcast.lane.b32.xlu0 %v179_v28, 256  ;;  %839 = vbcast.lane.b32.xlu1 %v5998_v17, 280  ;;  %v1044_v45 = vsel %vm1038_vm3, %v979_v34, %v699_v15 }
 0x106   :  { %v695_v37 = vpop.permute.xlu0 %694  ;;  %v6021_v39 = vpop.permute.xlu1 %736 }
 0x107   :  { %v1043_v42 = vsel %vm1038_vm3, %v978_v32, %v695_v37 }
 0x108   :  { %185 = vbcast.lane.b32.xlu0 %v179_v28, 264  ;;  %542 = vbcast.lane.b32.xlu1 %v540_v30, 256 }
 0x109   :  { %5103 = vmatprep.mubr.msk.f32.mxu0 %vm1111_vm4, %v1043_v42 }
 0x10a   :  { %5104 = vmatmul.mubr.msk.f32.gmra.mxu0 %vm1111_vm4, %v1044_v45  ;;  %v95_v50 = vpop.permute.xlu0 %94  ;;  %v6027_v53 = vpop.permute.xlu1 %744 }
 0x10b   :  { %v980_v60 = vsel %vm50_vm1, %v95_v50, %v5909_v33 }
 0x10c   :  { %789 = vbcast.lane.b32.xlu0 %v5946_v47, 256  ;;  %546 = vbcast.lane.b32.xlu1 %v540_v30, 264 }
 0x10e   :  { %v99_v29 = vpop.permute.xlu0 %98  ;;  %v6030_v31 = vpop.permute.xlu1 %755 }
 0x10f   :  { %v981_v61 = vsel %vm50_vm1, %v99_v29, %v5916_v36 }
 0x110   :  { %189 = vbcast.lane.b32.xlu0 %v179_v28, 272  ;;  %850 = vbcast.lane.b32.xlu1 %v6034_v59, 264  ;;  %v1046_v1 = vsel %vm1038_vm3, %v981_v61, %v707_v21  ;;  %v6074_v21 = vrot.slane %v5993_v13, %v5855_v8  ;;  %v6120_v61 = vrot.slane %v5993_v13, %v5860_v10 }
 0x112   :  { %v703_v62 = vpop.permute.xlu0 %702  ;;  %v6041_v63 = vpop.permute.xlu1 %459 }
 0x113   :  { %v1045_v0 = vsel %vm1038_vm3, %v980_v60, %v703_v62 }
 0x114   :  { %193 = vbcast.lane.b32.xlu0 %v179_v28, 280  ;;  %550 = vbcast.lane.b32.xlu1 %v540_v30, 272 }
 0x115   :  { %5106 = vmatprep.mubr.msk.f32.mxu0 %vm1111_vm4, %v1045_v0 }
 0x116   :  { %5107 = vmatmul.mubr.msk.f32.gmra.mxu0 %vm1111_vm4, %v1046_v1  ;;  %v106_v2 = vpop.permute.xlu0 %105  ;;  %v6047_v4 = vpop.permute.xlu1 %763 }
 0x117   :  { %v982_v11 = vsel %vm50_vm1, %v106_v2, %v5921_v38 }
 0x118   :  { %797 = vbcast.lane.b32.xlu0 %v5946_v47, 272  ;;  %554 = vbcast.lane.b32.xlu1 %v540_v30, 280 }
 0x11a   :  { %v110_v33 = vpop.permute.xlu0 %109  ;;  %v6050_v36 = vpop.permute.xlu1 %466 }
 0x11b   :  { %v983_v14 = vsel %vm50_vm1, %v110_v33, %v5927_v40 }
 0x11c   :  { %200 = vbcast.lane.b32.xlu0 %v198_v7, 256  ;;  %858 = vbcast.lane.b32.xlu1 %v6034_v59, 280  ;;  %v1048_v16 = vsel %vm1038_vm3, %v983_v14, %v718_v26 }
 0x11e   :  { %v714_v47 = vpop.permute.xlu0 %713  ;;  %v6061_v15 = vpop.permute.xlu1 %470 }
 0x11f   :  { %v1047_v18 = vsel %vm1038_vm3, %v982_v11, %v714_v47 }
 0x120   :  { %204 = vbcast.lane.b32.xlu0 %v198_v7, 264  ;;  %561 = vbcast.lane.b32.xlu1 %v559_v9, 256 }
 0x121   :  { %5109 = vmatprep.mubr.msk.f32.mxu0 %vm1111_vm4, %v1047_v18 }
 0x122   :  { %5110 = vmatmul.mubr.msk.f32.gmra.mxu0 %vm1111_vm4, %v1048_v16  ;;  %v114_v19 = vpop.permute.xlu0 %113  ;;  %v6067_v20 = vpop.permute.xlu1 %774 }
 0x123   :  { %v984_v22 = vsel %vm50_vm1, %v114_v19, %v5930_v41  ;;  %v6092_v41 = vsel %vm50_vm1, 0.0, %v5973_v57 }
 0x124   :  { %808 = vbcast.lane.b32.xlu0 %v5968_v55, 256  ;;  %565 = vbcast.lane.b32.xlu1 %v559_v9, 264  ;;  %v217_v37 = vrot.slane %v6092_v41, %v5837_v3  ;;  %v236_v11 = vrot.slane %v6092_v41, %v5850_v6 }
 0x126   :  { %v118_v38 = vpop.permute.xlu0 %117  ;;  %v6070_v40 = vpop.permute.xlu1 %474 }
 0x127   :  { %v985_v23 = vsel %vm50_vm1, %v118_v38, %v5937_v44 }
 0x128   :  { %208 = vbcast.lane.b32.xlu0 %v198_v7, 272  ;;  %869 = vbcast.lane.b32.xlu1 %v6074_v21, 264  ;;  %v1050_v28 = vsel %vm1038_vm3, %v985_v23, %v6010_v27  ;;  %v578_v27 = vrot.slane %v5845_v5, %v5860_v10 }
 0x12a   :  { %v722_v24 = vpop.permute.xlu0 %721  ;;  %v6081_v26 = vpop.permute.xlu1 %478 }
 0x12b   :  { %v1049_v25 = vsel %vm1038_vm3, %v984_v22, %v722_v24  ;;  %v6162_v22 = vrot.slane %v5993_v13, %v5865_v12 }
 0x12c   :  { %212 = vbcast.lane.b32.xlu0 %v198_v7, 280  ;;  %569 = vbcast.lane.b32.xlu1 %v559_v9, 272 }
 0x12d   :  { %5112 = vmatprep.mubr.msk.f32.mxu0 %vm1111_vm4, %v1049_v25 }
 0x12e   :  { %5113 = vmatmul.mubr.msk.f32.gmra.mxu0 %vm1111_vm4, %v1050_v28  ;;  %v125_v30 = vpop.permute.xlu0 %124  ;;  %v6088_v32 = vpop.permute.xlu1 %782 }
 0x12f   :  { %v986_v42 = vsel %vm50_vm1, %v125_v30, %v5942_v46 }
 0x130   :  { %816 = vbcast.lane.b32.xlu0 %v5968_v55, 272  ;;  %573 = vbcast.lane.b32.xlu1 %v559_v9, 280 }
 0x132   :  { %v129_v44 = vpop.permute.xlu0 %128  ;;  %v6095_v34 = vpop.permute.xlu1 %485 }
 0x133   :  { %v987_v57 = vsel %vm50_vm1, %v129_v44, %v5948_v48 }
 0x134   :  { %219 = vbcast.lane.b32.xlu0 %v217_v37, 256  ;;  %877 = vbcast.lane.b32.xlu1 %v6074_v21, 280  ;;  %v1052_v3 = vsel %vm1038_vm3, %v987_v57, %v6021_v39 }
 0x136   :  { %v733_v55 = vpop.permute.xlu0 %732  ;;  %v6106_v45 = vpop.permute.xlu1 %489 }
 0x137   :  { %v1051_v50 = vsel %vm1038_vm3, %v986_v42, %v733_v55 }
 0x138   :  { %223 = vbcast.lane.b32.xlu0 %v217_v37, 264  ;;  %580 = vbcast.lane.b32.xlu1 %v578_v27, 256 }
 0x139   :  { %5115 = vmatprep.mubr.msk.f32.mxu0 %vm1111_vm4, %v1051_v50 }
 0x13a   :  { %5116 = vmatmul.mubr.msk.f32.gmra.mxu0 %vm1111_vm4, %v1052_v3  ;;  %v133_v29 = vpop.permute.xlu0 %132  ;;  %v6113_v60 = vpop.permute.xlu1 %793 }
 0x13b   :  { %v988_v39 = vsel %vm50_vm1, %v133_v29, %v5951_v49 }
 0x13c   :  { %827 = vbcast.lane.b32.xlu0 %v5998_v17, 256  ;;  %584 = vbcast.lane.b32.xlu1 %v578_v27, 264 }
 0x13e   :  { %v137_v46 = vpop.permute.xlu0 %136  ;;  %v6116_v48 = vpop.permute.xlu1 %493 }
 0x13f   :  { %v989_v62 = vsel %vm50_vm1, %v137_v46, %v5958_v52  ;;  %v6204_v46 = vrot.slane %v5993_v13, %v5914_v35 }
 0x140   :  { %227 = vbcast.lane.b32.xlu0 %v217_v37, 272  ;;  %888 = vbcast.lane.b32.xlu1 %v6120_v61, 264  ;;  %v1054_v33 = vsel %vm1038_vm3, %v989_v62, %v6027_v53  ;;  %v597_v53 = vrot.slane %v5845_v5, %v5865_v12 }
 0x142   :  { %v741_v0 = vpop.permute.xlu0 %740  ;;  %v6127_v1 = vpop.permute.xlu1 %497 }
 0x143   :  { %v1053_v2 = vsel %vm1038_vm3, %v988_v39, %v741_v0 }
 0x144   :  { %231 = vbcast.lane.b32.xlu0 %v217_v37, 280  ;;  %588 = vbcast.lane.b32.xlu1 %v578_v27, 272 }
 0x145   :  { %5118 = vmatprep.mubr.msk.f32.mxu0 %vm1111_vm4, %v1053_v2 }
 0x146   :  { %5119 = vmatmul.mubr.msk.f32.gmra.mxu0 %vm1111_vm4, %v1054_v33  ;;  %v144_v7 = vpop.permute.xlu0 %143  ;;  %v6134_v9 = vpop.permute.xlu1 %801 }
 0x147   :  { %v990_v14 = vsel %vm50_vm1, %v144_v7, %v5963_v54 }
 0x148   :  { %835 = vbcast.lane.b32.xlu0 %v5998_v17, 272  ;;  %592 = vbcast.lane.b32.xlu1 %v578_v27, 280  ;;  %v255_v27 = vrot.slane %v6092_v41, %v5855_v8 }
 0x14a   :  { %v148_v49 = vpop.permute.xlu0 %147  ;;  %v6137_v52 = vpop.permute.xlu1 %504 }
 0x14b   :  { %v991_v47 = vsel %vm50_vm1, %v148_v49, %v5970_v56 }
 0x14c   :  { %238 = vbcast.lane.b32.xlu0 %v236_v11, 256  ;;  %896 = vbcast.lane.b32.xlu1 %v6120_v61, 280  ;;  %v1056_v6 = vsel %vm1038_vm3, %v991_v47, %v6030_v31 }
 0x14e   :  { %v752_v17 = vpop.permute.xlu0 %751  ;;  %v6148_v18 = vpop.permute.xlu1 %508 }
 0x14f   :  { %v1055_v16 = vsel %vm1038_vm3, %v990_v14, %v752_v17 }
 0x150   :  { %242 = vbcast.lane.b32.xlu0 %v236_v11, 264  ;;  %599 = vbcast.lane.b32.xlu1 %v597_v53, 256 }
 0x151   :  { %5121 = vmatprep.mubr.msk.f32.mxu0 %vm1111_vm4, %v1055_v16 }
 0x152   :  { %5122 = vmatmul.mubr.msk.f32.gmra.mxu0 %vm1111_vm4, %v1056_v6  ;;  %v152_v19 = vpop.permute.xlu0 %151  ;;  %v6155_v38 = vpop.permute.xlu1 %812 }
 0x153   :  { %v992_v31 = vsel %vm50_vm1, %v152_v19, %v5975_v58  ;;  %v6246_v19 = vrot.slane %v5993_v13, %v5935_v43 }
 0x154   :  { %846 = vbcast.lane.b32.xlu0 %v6034_v59, 256  ;;  %603 = vbcast.lane.b32.xlu1 %v597_v53, 264 }
 0x156   :  { %v156_v54 = vpop.permute.xlu0 %155  ;;  %v6158_v56 = vpop.permute.xlu1 %512 }
 0x157   :  { %v993_v23 = vsel %vm50_vm1, %v156_v54, %v6041_v63 }
 0x158   :  { %246 = vbcast.lane.b32.xlu0 %v236_v11, 272  ;;  %907 = vbcast.lane.b32.xlu1 %v6162_v22, 264  ;;  %v1058_v30 = vsel %vm1038_vm3, %v993_v23, %v6047_v4  ;;  %v616_v4 = vrot.slane %v5845_v5, %v5914_v35 }
 0x15a   :  { %v760_v24 = vpop.permute.xlu0 %759  ;;  %v6169_v25 = vpop.permute.xlu1 %516 }
 0x15b   :  { %v1057_v28 = vsel %vm1038_vm3, %v992_v31, %v760_v24 }
 0x15c   :  { %250 = vbcast.lane.b32.xlu0 %v236_v11, 280  ;;  %607 = vbcast.lane.b32.xlu1 %v597_v53, 272  ;;  %v274_v11 = vrot.slane %v6092_v41, %v5860_v10 }
 0x15d   :  { %5124 = vmatprep.mubr.msk.f32.mxu0 %vm1111_vm4, %v1057_v28 }
 0x15e   :  { %5125 = vmatmul.mubr.msk.f32.gmra.mxu0 %vm1111_vm4, %v1058_v30  ;;  %v163_v44 = vpop.permute.xlu0 %162  ;;  %v6176_v37 = vpop.permute.xlu1 %820 }
 0x15f   :  { %v994_v42 = vsel %vm50_vm1, %v163_v44, %v6050_v36 }
 0x160   :  { %854 = vbcast.lane.b32.xlu0 %v6034_v59, 272  ;;  %611 = vbcast.lane.b32.xlu1 %v597_v53, 280 }
 0x162   :  { %v167_v58 = vpop.permute.xlu0 %166  ;;  %v6179_v63 = vpop.permute.xlu1 %523 }
 0x163   :  { %v995_v57 = vsel %vm50_vm1, %v167_v58, %v6061_v15  ;;  %v293_v58 = vrot.slane %v6092_v41, %v5865_v12 }
 0x164   :  { %257 = vbcast.lane.b32.xlu0 %v255_v27, 256  ;;  %915 = vbcast.lane.b32.xlu1 %v6162_v22, 280  ;;  %v1060_v8 = vsel %vm1038_vm3, %v995_v57, %v6067_v20 }
 0x166   :  { %v771_v59 = vpop.permute.xlu0 %770  ;;  %v6190_v55 = vpop.permute.xlu1 %527 }
 0x167   :  { %v1059_v50 = vsel %vm1038_vm3, %v994_v42, %v771_v59 }
 0x168   :  { %261 = vbcast.lane.b32.xlu0 %v255_v27, 264  ;;  %618 = vbcast.lane.b32.xlu1 %v616_v4, 256 }
 0x169   :  { %5127 = vmatprep.mubr.msk.f32.mxu0 %vm1111_vm4, %v1059_v50  ;;  %v6288_v50 = vrot.slane %v5993_v13, %v5956_v51 }
 0x16a   :  { %5128 = vmatmul.mubr.msk.f32.gmra.mxu0 %vm1111_vm4, %v1060_v8  ;;  %v171_v3 = vpop.permute.xlu0 %170  ;;  %v6197_v29 = vpop.permute.xlu1 %831 }
 0x16b   :  { %v996_v20 = vsel %vm50_vm1, %v171_v3, %v6070_v40 }
 0x16c   :  { %865 = vbcast.lane.b32.xlu0 %v6074_v21, 256  ;;  %622 = vbcast.lane.b32.xlu1 %v616_v4, 264 }
 0x16e   :  { %v175_v36 = vpop.permute.xlu0 %174  ;;  %v6200_v15 = vpop.permute.xlu1 %531 }
 0x16f   :  { %v997_v39 = vsel %vm50_vm1, %v175_v36, %v6081_v26 }
 0x170   :  { %265 = vbcast.lane.b32.xlu0 %v255_v27, 272  ;;  %926 = vbcast.lane.b32.xlu1 %v6204_v46, 264  ;;  %v1062_v33 = vsel %vm1038_vm3, %v997_v39, %v6088_v32  ;;  %v635_v32 = vrot.slane %v5845_v5, %v5935_v43 }
 0x172   :  { %v779_v62 = vpop.permute.xlu0 %778  ;;  %v6211_v0 = vpop.permute.xlu1 %535 }
 0x173   :  { %v1061_v2 = vsel %vm1038_vm3, %v996_v20, %v779_v62 }
 0x174   :  { %269 = vbcast.lane.b32.xlu0 %v255_v27, 280  ;;  %626 = vbcast.lane.b32.xlu1 %v616_v4, 272 }
 0x175   :  { %5130 = vmatprep.mubr.msk.f32.mxu0 %vm1111_vm4, %v1061_v2  ;;  %v312_v2 = vrot.slane %v6092_v41, %v5914_v35  ;;  %v6321_v35 = vld [vmem:[%s7982_s2] ss:$0 sm:$0xff] }
 0x176   :  { %5131 = vmatmul.mubr.msk.f32.gmra.mxu0 %vm1111_vm4, %v1062_v33  ;;  %v182_v7 = vpop.permute.xlu0 %181  ;;  %v6218_v49 = vpop.permute.xlu1 %839 }
 0x177   :  { %v998_v53 = vsel %vm50_vm1, %v182_v7, %v6095_v34 }
 0x178   :  { %873 = vbcast.lane.b32.xlu0 %v6074_v21, 272  ;;  %630 = vbcast.lane.b32.xlu1 %v616_v4, 280 }
 0x17a   :  { %v186_v40 = vpop.permute.xlu0 %185  ;;  %v6221_v26 = vpop.permute.xlu1 %542 }
 0x17b   :  { %v999_v14 = vsel %vm50_vm1, %v186_v40, %v6106_v45 }
 0x17c   :  { %276 = vbcast.lane.b32.xlu0 %v274_v11, 256  ;;  %934 = vbcast.lane.b32.xlu1 %v6204_v46, 280  ;;  %v1064_v10 = vsel %vm1038_vm3, %v999_v14, %v6113_v60 }
 0x17e   :  { %v790_v21 = vpop.permute.xlu0 %789  ;;  %v6232_v47 = vpop.permute.xlu1 %546 }
 0x17f   :  { %v1063_v17 = vsel %vm1038_vm3, %v998_v53, %v790_v21 }
 0x180   :  { %280 = vbcast.lane.b32.xlu0 %v274_v11, 264  ;;  %637 = vbcast.lane.b32.xlu1 %v635_v32, 256 }
 0x181   :  { %5133 = vmatprep.mubr.msk.f32.mxu0 %vm1111_vm4, %v1063_v17 }
 0x182   :  { %5134 = vmatmul.mubr.msk.f32.gmra.mxu0 %vm1111_vm4, %v1064_v10  ;;  %v190_v16 = vpop.permute.xlu0 %189  ;;  %v6239_v6 = vpop.permute.xlu1 %850 }
 0x183   :  { %v1000_v60 = vsel %vm50_vm1, %v190_v16, %v6116_v48 }
 0x184   :  { %884 = vbcast.lane.b32.xlu0 %v6120_v61, 256  ;;  %641 = vbcast.lane.b32.xlu1 %v635_v32, 264 }
 0x186   :  { %v194_v34 = vpop.permute.xlu0 %193  ;;  %v6242_v45 = vpop.permute.xlu1 %550 }
 0x187   :  { %v1001_v54 = vsel %vm50_vm1, %v194_v34, %v6127_v1 }
 0x188   :  { %284 = vbcast.lane.b32.xlu0 %v274_v11, 272  ;;  %945 = vbcast.lane.b32.xlu1 %v6246_v19, 264  ;;  %v1066_v28 = vsel %vm1038_vm3, %v1001_v54, %v6134_v9  ;;  %v654_v9 = vrot.slane %v5845_v5, %v5956_v51 }
 0x18a   :  { %v798_v31 = vpop.permute.xlu0 %797  ;;  %v6253_v23 = vpop.permute.xlu1 %554 }
 0x18b   :  { %v1065_v24 = vsel %vm1038_vm3, %v1000_v60, %v798_v31 }
 0x18c   :  { %288 = vbcast.lane.b32.xlu0 %v274_v11, 280  ;;  %645 = vbcast.lane.b32.xlu1 %v635_v32, 272 }
 0x18d   :  { %5136 = vmatprep.mubr.msk.f32.mxu0 %vm1111_vm4, %v1065_v24 }
 0x18e   :  { %5137 = vmatmul.mubr.msk.f32.gmra.mxu0 %vm1111_vm4, %v1066_v28  ;;  %v201_v30 = vpop.permute.xlu0 %200  ;;  %v6260_v44 = vpop.permute.xlu1 %858 }
 0x18f   :  { %v1002_v27 = vsel %vm50_vm1, %v201_v30, %v6137_v52 }
 0x190   :  { %892 = vbcast.lane.b32.xlu0 %v6120_v61, 272  ;;  %649 = vbcast.lane.b32.xlu1 %v635_v32, 280 }
 0x192   :  { %v205_v48 = vpop.permute.xlu0 %204  ;;  %v6263_v1 = vpop.permute.xlu1 %561 }
 0x193   :  { %v1003_v4 = vsel %vm50_vm1, %v205_v48, %v6148_v18 }
 0x194   :  { %295 = vbcast.lane.b32.xlu0 %v293_v58, 256  ;;  %953 = vbcast.lane.b32.xlu1 %v6246_v19, 280  ;;  %v1068_v12 = vsel %vm1038_vm3, %v1003_v4, %v6155_v38 }
 0x196   :  { %v809_v61 = vpop.permute.xlu0 %808  ;;  %v6274_v42 = vpop.permute.xlu1 %565 }
 0x197   :  { %v1067_v57 = vsel %vm1038_vm3, %v1002_v27, %v809_v61 }
 0x198   :  { %299 = vbcast.lane.b32.xlu0 %v293_v58, 264  ;;  %656 = vbcast.lane.b32.xlu1 %v654_v9, 256 }
 0x199   :  { %5139 = vmatprep.mubr.msk.f32.mxu0 %vm1111_vm4, %v1067_v57 }
 0x19a   :  { %5140 = vmatmul.mubr.msk.f32.gmra.mxu0 %vm1111_vm4, %v1068_v12  ;;  %v209_v5 = vpop.permute.xlu0 %208  ;;  %v6281_v59 = vpop.permute.xlu1 %869 }
 0x19b   :  { %v1004_v38 = vsel %vm50_vm1, %v209_v5, %v6158_v56  ;;  %v331_v5 = vrot.slane %v6092_v41, %v5935_v43 }
 0x19c   :  { %903 = vbcast.lane.b32.xlu0 %v6162_v22, 256  ;;  %660 = vbcast.lane.b32.xlu1 %v654_v9, 264 }
 0x19e   :  { %v213_v52 = vpop.permute.xlu0 %212  ;;  %v6284_v18 = vpop.permute.xlu1 %569 }
 0x19f   :  { %v1005_v8 = vsel %vm50_vm1, %v213_v52, %v6169_v25 }
 0x1a0   :  { %303 = vbcast.lane.b32.xlu0 %v293_v58, 272  ;;  %964 = vbcast.lane.b32.xlu1 %v6288_v50, 264  ;;  %v1070_v13 = vsel %vm1038_vm3, %v1005_v8, %v6176_v37 }
 0x1a2   :  { %v817_v3 = vpop.permute.xlu0 %816  ;;  %v6295_v36 = vpop.permute.xlu1 %573 }
 0x1a3   :  { %v1069_v20 = vsel %vm1038_vm3, %v1004_v38, %v817_v3 }
 0x1a4   :  { %307 = vbcast.lane.b32.xlu0 %v293_v58, 280  ;;  %664 = vbcast.lane.b32.xlu1 %v654_v9, 272 }
 0x1a5   :  { %5142 = vmatprep.mubr.msk.f32.mxu0 %vm1111_vm4, %v1069_v20 }
 0x1a6   :  { %5143 = vmatmul.mubr.msk.f32.gmra.mxu0 %vm1111_vm4, %v1070_v13  ;;  %v220_v39 = vpop.permute.xlu0 %219  ;;  %v6302_v62 = vpop.permute.xlu1 %877 }
 0x1a7   :  { %v1006_v33 = vsel %vm50_vm1, %v220_v39, %v6179_v63 }
 0x1a8   :  { %911 = vbcast.lane.b32.xlu0 %v6162_v22, 272  ;;  %668 = vbcast.lane.b32.xlu1 %v654_v9, 280 }
 0x1aa   :  { %v224_v56 = vpop.permute.xlu0 %223  ;;  %v6305_v25 = vpop.permute.xlu1 %580 }
 0x1ab   :  { %v1007_v37 = vsel %vm50_vm1, %v224_v56, %v6190_v55 }
 0x1ac   :  { %314 = vbcast.lane.b32.xlu0 %v312_v2, 256  ;;  %972 = vbcast.lane.b32.xlu1 %v6288_v50, 280  ;;  %v1072_v11 = vsel %vm1038_vm3, %v1007_v37, %v6197_v29 }
 0x1ae   :  { %v828_v7 = vpop.permute.xlu0 %827  ;;  %v6314_v40 = vpop.permute.xlu1 %584 }
 0x1af   :  { %v1071_v22 = vsel %vm1038_vm3, %v1006_v33, %v828_v7 }
 0x1b0   :  { %318 = vbcast.lane.b32.xlu0 %v312_v2, 264  ;;  %5145 = vmatprep.mubr.msk.f32.mxu0 %vm1111_vm4, %v1071_v22 }
 0x1b1   :  { %5146 = vmatmul.mubr.msk.f32.gmra.mxu0 %vm1111_vm4, %v1072_v11 }
 0x1b2   :  { %v5099_v55 = vpop.f32.mrf.mxu0  ;;  %v228_v63 = vpop.permute.xlu0 %227 }
 0x1b3   :  { %v1380_v32 = vadd.f32 %v5099_v55, %v6321_v35  ;;  %v6327_v53 = vpop.permute.xlu1 %888  ;;  %v1008_v31 = vsel %vm50_vm1, %v228_v63, %v6200_v15 }
 0x1b4   :  { %v1374_v14 = vpop.f32.mrf.mxu0  ;;  %922 = vbcast.lane.b32.xlu0 %v6204_v46, 256 }
 0x1b5   :  { %v6330_v21 = vmax.f32 %v1380_v32, 0.0  ;;  %v1375_v17 = vadd.f32 %v6321_v35, %v1374_v14 }
 0x1b6   :  { %v232_v10 = vpop.permute.xlu0 %231 }
 0x1b7   :  { %v6333_v16 = vmax.f32 %v1375_v17, 0.0  ;;  %v6335_v34 = vpop.permute.xlu1 %588  ;;  %v1823_v29 = vrot.slane %v6330_v21, 7  ;;  %v1009_v54 = vsel %vm50_vm1, %v232_v10, %v6211_v0 }
 0x1b8   :  { %322 = vbcast.lane.b32.xlu0 %v312_v2, 272  ;;  %v1074_v58 = vsel %vm1038_vm3, %v1009_v54, %v6218_v49 }
 0x1b9   :  { %v1822_v60 = vrot.slane %v6333_v16, 7 }
 0x1ba   :  { %v836_v24 = vpop.permute.xlu0 %835 }
 0x1bb   :  { %v1073_v28 = vsel %vm1038_vm3, %v1008_v31, %v836_v24  ;;  %v6344_v30 = vpop.permute.xlu1 %592  ;;  %v6349_v48 = vsel %vm1821_vm5, %v1822_v60, %v1823_v29 }
 0x1bc   :  { %326 = vbcast.lane.b32.xlu0 %v312_v2, 280  ;;  %5148 = vmatprep.mubr.msk.f32.mxu0 %vm1111_vm4, %v1073_v28 }
 0x1bd   :  { %5149 = vmatmul.mubr.msk.f32.gmra.mxu0 %vm1111_vm4, %v1074_v58 }
 0x1be   :  { %v5102_v0 = vpop.f32.mrf.mxu0  ;;  %v239_v15 = vpop.permute.xlu0 %238 }
 0x1bf   :  { %v1390_v9 = vadd.f32 %v5102_v0, %v6321_v35  ;;  %v6356_v27 = vpop.permute.xlu1 %896  ;;  %v1010_v43 = vsel %vm50_vm1, %v239_v15, %v6221_v26 }
 0x1c0   :  { %v1384_v4 = vpop.f32.mrf.mxu0  ;;  %930 = vbcast.lane.b32.xlu0 %v6204_v46, 272 }
 0x1c1   :  { %v1696_v61 = vmax.f32 %v1390_v9, 0.0  ;;  %v1385_v57 = vadd.f32 %v6321_v35, %v1384_v4 }
 0x1c2   :  { %v243_v12 = vpop.permute.xlu0 %242 }
 0x1c3   :  { %v2020_v52 = vrot.slane %v1696_v61, 1  ;;  %v6362_v49 = vmax.f32 %v1385_v57, 0.0  ;;  %v6364_v38 = vpop.permute.xlu1 %599  ;;  %v1011_v46 = vsel %vm50_vm1, %v243_v12, %v6232_v47  ;;  %v1827_v13 = vrot.slane %v1696_v61, 7 }
 0x1c4   :  { %333 = vbcast.lane.b32.xlu0 %v331_v5, 256  ;;  %v1076_v26 = vsel %vm1038_vm3, %v1011_v46, %v6239_v6  ;;  %v350_v46 = vrot.slane %v6092_v41, %v5956_v51 }
 0x1c5   :  { %v5311_v8 = vpack.i.bf16 %v1696_v61, %v6362_v49  ;;  %v1825_v3 = vrot.slane %v6362_v49, 7  ;;  %v2018_v20 = vrot.slane %v6362_v49, 1  ;;  %v2143_v56 = vsel %vm2014_vm6, %v2020_v52, 0.0 }
 0x1c6   :  { %v847_v39 = vpop.permute.xlu0 %846 }
 0x1c7   :  { %v1075_v2 = vsel %vm1038_vm3, %v1010_v43, %v847_v39  ;;  %5312 = vrot.lane.b32.xlu1 %v5311_v8, %s5759_s25  ;;  %v6376_v37 = vpop.permute.xlu1 %603  ;;  %v2021_v33 = vsel %vm2014_vm6, %v2018_v20, %v2020_v52  ;;  %v6382_v47 = vsel %vm1821_vm5, %v1823_v29, %v1825_v3  ;;  %v6388_v22 = vsel %vm1821_vm5, %v1825_v3, %v1827_v13 }
 0x1c8   :  { %337 = vbcast.lane.b32.xlu0 %v331_v5, 264  ;;  %5151 = vmatprep.mubr.msk.f32.mxu0 %vm1111_vm4, %v1075_v2  ;;  %v5321_v7 = vpack.i.bf16 %v2143_v56, %v2021_v33 }
 0x1c9   :  { %5152 = vmatmul.mubr.msk.f32.gmra.mxu0 %vm1111_vm4, %v1076_v26 }
 0x1ca   :  { %v5105_v11 = vpop.f32.mrf.mxu0  ;;  %v247_v55 = vpop.permute.xlu0 %246 }
 0x1cb   :  { %v1400_v63 = vadd.f32 %v5105_v11, %v6321_v35  ;;  %5322 = vrot.lane.b32.xlu1 %v5321_v7, %s5760_s26  ;;  %v6393_v32 = vpop.permute.xlu1 %907  ;;  %v1012_v58 = vsel %vm50_vm1, %v247_v55, %v6242_v45 }
 0x1cc   :  { %v1394_v14 = vpop.f32.mrf.mxu0  ;;  %941 = vbcast.lane.b32.xlu0 %v6246_v19, 256 }
 0x1cd   :  { %v6396_v17 = vmax.f32 %v1400_v63, 0.0  ;;  %v1395_v6 = vadd.f32 %v6321_v35, %v1394_v14 }
 0x1ce   :  { %v251_v10 = vpop.permute.xlu0 %250 }
 0x1cf   :  { %v6399_v29 = vmax.f32 %v1395_v6, 0.0  ;;  %v6401_v54 = vpop.permute.xlu1 %607  ;;  %v1830_v31 = vrot.slane %v6396_v17, 7  ;;  %v1013_v28 = vsel %vm50_vm1, %v251_v10, %v6253_v23 }
 0x1d0   :  { %341 = vbcast.lane.b32.xlu0 %v331_v5, 272  ;;  %v1078_v61 = vsel %vm1038_vm3, %v1013_v28, %v6260_v44 }
 0x1d1   :  { %v1829_v24 = vrot.slane %v6399_v29, 7 }
 0x1d2   :  { %v855_v0 = vpop.permute.xlu0 %854 }
 0x1d3   :  { %v1077_v15 = vsel %vm1038_vm3, %v1012_v58, %v855_v0  ;;  %v6410_v9 = vpop.permute.xlu1 %611  ;;  %v6415_v4 = vsel %vm1821_vm5, %v1829_v24, %v1830_v31 }
 0x1d4   :  { %345 = vbcast.lane.b32.xlu0 %v331_v5, 280  ;;  %5154 = vmatprep.mubr.msk.f32.mxu0 %vm1111_vm4, %v1077_v15  ;;  %v5686_v15 = vld [vmem:[%s7983_s3 + $0x10] sm:$0xff]  }
 0x1d5   :  { %5155 = vmatmul.mubr.msk.f32.gmra.mxu0 %vm1111_vm4, %v1078_v61  ;;  %5193 = vmatprep.subr.bf16.mxu1 %v5686_v15 }
 0x1d6   :  { %v5108_v23 = vpop.f32.mrf.mxu0  ;;  %v258_v45 = vpop.permute.xlu0 %257  ;;  %5194 = vmatpush3.bf16.msra.mxu1 %v5686_v15 }
 0x1d7   :  { %v1410_v57 = vadd.f32 %v5108_v23, %v6321_v35  ;;  %v6422_v12 = vpop.permute.xlu1 %915  ;;  %v1014_v26 = vsel %vm50_vm1, %v258_v45, %v6263_v1 }
 0x1d8   :  { %v1404_v52 = vpop.f32.mrf.mxu0  ;;  %949 = vbcast.lane.b32.xlu0 %v6246_v19, 272 }
 0x1d9   :  { %v1700_v8 = vmax.f32 %v1410_v57, 0.0  ;;  %v1405_v3 = vadd.f32 %v6321_v35, %v1404_v52 }
 0x1da   :  { %v262_v5 = vpop.permute.xlu0 %261 }
 0x1db   :  { %v2027_v13 = vrot.slane %v1700_v8, 1  ;;  %v6428_v44 = vmax.f32 %v1405_v3, 0.0  ;;  %v6430_v43 = vpop.permute.xlu1 %618  ;;  %v1015_v19 = vsel %vm50_vm1, %v262_v5, %v6274_v42  ;;  %v1834_v33 = vrot.slane %v1700_v8, 7  ;;  %v5687_v3 = vld [vmem:[%s7983_s3 + $0x8] sm:$0xff]  }
 0x1dc   :  { %352 = vbcast.lane.b32.xlu0 %v350_v46, 256  ;;  %v1080_v1 = vsel %vm1038_vm3, %v1015_v19, %v6281_v59  ;;  %5195 = vmatprep.subr.bf16.mxu1 %v5687_v3 }
 0x1dd   :  { %v5331_v39 = vpack.i.bf16 %v1700_v8, %v6428_v44  ;;  %v1832_v56 = vrot.slane %v6428_v44, 7  ;;  %v2025_v2 = vrot.slane %v6428_v44, 1  ;;  %v2144_v41 = vsel %vm2014_vm6, %v2027_v13, 0.0  ;;  %5196 = vmatpush3.bf16.msra.mxu1 %v5687_v3 }
 0x1de   :  { %v866_v51 = vpop.permute.xlu0 %865 }
 0x1df   :  { %v1079_v7 = vsel %vm1038_vm3, %v1014_v26, %v866_v51  ;;  %5332 = vrot.lane.b32.xlu1 %v5331_v39, %s5759_s25  ;;  %v6442_v11 = vpop.permute.xlu1 %622  ;;  %v2028_v55 = vsel %vm2014_vm6, %v2025_v2, %v2027_v13  ;;  %v6448_v63 = vsel %vm1821_vm5, %v1830_v31, %v1832_v56  ;;  %v6454_v14 = vsel %vm1821_vm5, %v1832_v56, %v1834_v33 }
 0x1e0   :  { %356 = vbcast.lane.b32.xlu0 %v350_v46, 264  ;;  %5157 = vmatprep.mubr.msk.f32.mxu0 %vm1111_vm4, %v1079_v7  ;;  %v5341_v42 = vpack.i.bf16 %v2144_v41, %v2028_v55 }
 0x1e1   :  { %5158 = vmatmul.mubr.msk.f32.gmra.mxu0 %vm1111_vm4, %v1080_v1 }
 0x1e2   :  { %v5111_v6 = vpop.f32.mrf.mxu0  ;;  %v266_v10 = vpop.permute.xlu0 %265 }
 0x1e3   :  { %v1420_v28 = vadd.f32 %v5111_v6, %v6321_v35  ;;  %5342 = vrot.lane.b32.xlu1 %v5341_v42, %s5760_s26  ;;  %v6459_v31 = vpop.permute.xlu1 %926  ;;  %v1016_v5 = vsel %vm50_vm1, %v266_v10, %v6284_v18  ;;  %v5688_v18 = vld [vmem:[%s7983_s3] sm:$0xff]   ;;  %v5306_v42 = vpack.i.bf16 %v6330_v21, %v6333_v16 }
 0x1e4   :  { %v1414_v58 = vpop.f32.mrf.mxu0  ;;  %960 = vbcast.lane.b32.xlu0 %v6288_v50, 256  ;;  %5197 = vmatprep.subr.bf16.mxu1 %v5688_v18 }
 0x1e5   :  { %v6462_v0 = vmax.f32 %v1420_v28, 0.0  ;;  %v1415_v59 = vadd.f32 %v6321_v35, %v1414_v58  ;;  %5198 = vmatpush3.bf16.msra.mxu1 %v5688_v18 }
 0x1e6   :  { %v270_v61 = vpop.permute.xlu0 %269 }
 0x1e7   :  { %v6468_v23 = vmax.f32 %v1415_v59, 0.0  ;;  %v6470_v45 = vpop.permute.xlu1 %626  ;;  %v1837_v57 = vrot.slane %v6462_v0, 7  ;;  %v1017_v8 = vsel %vm50_vm1, %v270_v61, %v6295_v36 }
 0x1e8   :  { %360 = vbcast.lane.b32.xlu0 %v350_v46, 272  ;;  %v1082_v36 = vsel %vm1038_vm3, %v1017_v8, %v6302_v62  ;;  %v2016_v62 = vrot.slane %v6330_v21, 1 }
 0x1e9   :  { %v1836_v52 = vrot.slane %v6468_v23, 7  ;;  %v2029_v44 = vrot.slane %v6468_v23, 1 }
 0x1ea   :  { %v874_v13 = vpop.permute.xlu0 %873  ;;  %v2019_v59 = vsel %vm2014_vm6, %v2016_v62, %v2018_v20 }
 0x1eb   :  { %v1081_v39 = vsel %vm1038_vm3, %v1016_v5, %v874_v13  ;;  %v6482_v56 = vpop.permute.xlu1 %630  ;;  %v6487_v19 = vsel %vm1821_vm5, %v1836_v52, %v1837_v57 }
 0x1ec   :  { %364 = vbcast.lane.b32.xlu0 %v350_v46, 280  ;;  %5160 = vmatprep.mubr.msk.f32.mxu0 %vm1111_vm4, %v1081_v39  ;;  %v2015_v46 = vrot.slane %v6333_v16, 1 }
 0x1ed   :  { %5161 = vmatmul.mubr.msk.f32.gmra.mxu0 %vm1111_vm4, %v1082_v36 }
 0x1ee   :  { %v5114_v33 = vpop.f32.mrf.mxu0  ;;  %v277_v26 = vpop.permute.xlu0 %276 }
 0x1ef   :  { %v1430_v51 = vadd.f32 %v5114_v33, %v6321_v35  ;;  %v6497_v41 = vpop.permute.xlu1 %934  ;;  %v1018_v5 = vsel %vm50_vm1, %v277_v26, %v6305_v25  ;;  %v2023_v26 = vrot.slane %v6396_v17, 1 }
 0x1f0   :  { %v1424_v7 = vpop.f32.mrf.mxu0  ;;  %968 = vbcast.lane.b32.xlu0 %v6288_v50, 272  ;;  %v2017_v50 = vsel %vm2014_vm6, %v2015_v46, %v2016_v62 }
 0x1f1   :  { %v1704_v55 = vmax.f32 %v1430_v51, 0.0  ;;  %v1425_v1 = vadd.f32 %v6321_v35, %v1424_v7  ;;  %v5316_v39 = vpack.i.bf16 %v2019_v59, %v2017_v50  ;;  %v2022_v51 = vrot.slane %v6399_v29, 1 }
 0x1f2   :  { %v281_v6 = vpop.permute.xlu0 %280 }
 0x1f3   :  { %v2034_v10 = vrot.slane %v1704_v55, 1  ;;  %v1703_v28 = vmax.f32 %v1425_v1, 0.0  ;;  %v6505_v58 = vpop.permute.xlu1 %637  ;;  %v1019_v3 = vsel %vm50_vm1, %v281_v6, %v6314_v40  ;;  %v1841_v21 = vrot.slane %v1704_v55, 7 }
 0x1f4   :  { %5307 = vrot.lane.b32.xlu0 %v5306_v42, %s5759_s25  ;;  %v1084_v25 = vsel %vm1038_vm3, %v1019_v3, %v6327_v53  ;;  %v2026_v53 = vsel %vm2014_vm6, %v2023_v26, %v2025_v2 }
 0x1f5   :  { %v5351_v15 = vpack.i.bf16 %v1704_v55, %v1703_v28  ;;  %v1839_v61 = vrot.slane %v1703_v28, 7  ;;  %v2032_v8 = vrot.slane %v1703_v28, 1  ;;  %v2145_v49 = vsel %vm2014_vm6, %v2034_v10, 0.0 }
 0x1f6   :  { %v885_v13 = vpop.permute.xlu0 %884 }
 0x1f7   :  { %v1083_v20 = vsel %vm1038_vm3, %v1018_v5, %v885_v13  ;;  %5352 = vrot.lane.b32.xlu1 %v5351_v15, %s5759_s25  ;;  %v2035_v36 = vsel %vm2014_vm6, %v2032_v8, %v2034_v10  ;;  %v6521_v18 = vsel %vm1821_vm5, %v1837_v57, %v1839_v61  ;;  %v6528_v33 = vsel %vm1821_vm5, %v1839_v61, %v1841_v21  ;;  %v6532_v46 = vpop.permute.xlu1 %641 }
 0x1f8   :  { %5317 = vrot.lane.b32.xlu0 %v5316_v39, %s5760_s26  ;;  %5163 = vmatprep.mubr.msk.f32.mxu0 %vm1111_vm4, %v1083_v20  ;;  %v5361_v40 = vpack.i.bf16 %v2145_v49, %v2035_v36  ;;  %v5326_v57 = vpack.i.bf16 %v6396_v17, %v6399_v29  ;;  %v2024_v10 = vsel %vm2014_vm6, %v2022_v51, %v2023_v26  ;;  %v2030_v15 = vrot.slane %v6462_v0, 1 }
 0x1f9   :  { %5164 = vmatmul.mubr.msk.f32.gmra.mxu0 %vm1111_vm4, %v1084_v25  ;;  %v5336_v17 = vpack.i.bf16 %v2026_v53, %v2024_v10  ;;  %v5346_v21 = vpack.i.bf16 %v6462_v0, %v6468_v23 }
 0x1fa   :  { %v5117_v7 = vpop.f32.mrf.mxu0  ;;  %v285_v62 = vpop.permute.xlu0 %284  ;;  %v2033_v49 = vsel %vm2014_vm6, %v2030_v15, %v2032_v8 }
 0x1fb   :  { %v1440_v55 = vadd.f32 %v5117_v7, %v6321_v35  ;;  %5362 = vrot.lane.b32.xlu1 %v5361_v40, %s5760_s26  ;;  %v6545_v59 = vpop.permute.xlu1 %945  ;;  %v1020_v5 = vsel %vm50_vm1, %v285_v62, %v6335_v34  ;;  %v2031_v34 = vsel %vm2014_vm6, %v2029_v44, %v2030_v15 }
 0x1fc   :  { %v1434_v1 = vpop.f32.mrf.mxu0  ;;  %5327 = vrot.lane.b32.xlu0 %v5326_v57, %s5759_s25  ;;  %v5356_v25 = vpack.i.bf16 %v2033_v49, %v2031_v34 }
 0x1fd   :  { %v1706_v42 = vmax.f32 %v1440_v55, 0.0  ;;  %v1435_v6 = vadd.f32 %v6321_v35, %v1434_v1 }
 0x1fe   :  { %v289_v28 = vpop.permute.xlu0 %288 }
 0x1ff   :  { %v6547_v50 = vmax.f32 %v1435_v6, 0.0  ;;  %v1844_v2 = vrot.slane %v1706_v42, 7  ;;  %v1021_v3 = vsel %vm50_vm1, %v289_v28, %v6344_v30  ;;  %v6570_v0 = vpop.permute.xlu1 %645  ;;  %v2037_v6 = vrot.slane %v1706_v42, 1 }
 0x200   :  { %5337 = vrot.lane.b32.xlu0 %v5336_v17, %s5760_s26  ;;  %v1086_v30 = vsel %vm1038_vm3, %v1021_v3, %v6356_v27 }
 0x201   :  { %v1843_v61 = vrot.slane %v6547_v50, 7  ;;  %v5366_v7 = vpack.i.bf16 %v1706_v42, %v6547_v50  ;;  %v2036_v27 = vrot.slane %v6547_v50, 1 }
 0x202   :  { %v893_v13 = vpop.permute.xlu0 %892 }
 0x203   :  { %v1085_v39 = vsel %vm1038_vm3, %v1020_v5, %v893_v13  ;;  %v6564_v20 = vsel %vm1821_vm5, %v1843_v61, %v1844_v2  ;;  %v6579_v55 = vpop.permute.xlu1 %649  ;;  %v2038_v13 = vsel %vm2014_vm6, %v2036_v27, %v2037_v6 }
 0x204   :  { %5347 = vrot.lane.b32.xlu0 %v5346_v21, %s5759_s25  ;;  %5166 = vmatprep.mubr.msk.f32.mxu0 %vm1111_vm4, %v1085_v39 }
 0x205   :  { %5167 = vmatmul.mubr.msk.f32.gmra.mxu0 %vm1111_vm4, %v1086_v30 }
 0x206   :  { %v5120_v36 = vpop.f32.mrf.mxu0  ;;  %v296_v8 = vpop.permute.xlu0 %295 }
 0x207   :  { %v1450_v40 = vadd.f32 %v5120_v36, %v6321_v35  ;;  %v1022_v21 = vsel %vm50_vm1, %v296_v8, %v6364_v38  ;;  %v6601_v8 = vpop.permute.xlu1 %953 }
 0x208   :  { %v1444_v26 = vpop.f32.mrf.mxu0  ;;  %5357 = vrot.lane.b32.xlu0 %v5356_v25, %s5760_s26 }
 0x209   :  { %v1708_v51 = vmax.f32 %v1450_v40, 0.0  ;;  %v1445_v57 = vadd.f32 %v6321_v35, %v1444_v26 }
 0x20a   :  { %v300_v62 = vpop.permute.xlu0 %299 }
 0x20b   :  { %v2041_v53 = vrot.slane %v1708_v51, 1  ;;  %v1707_v1 = vmax.f32 %v1445_v57, 0.0  ;;  %v1023_v15 = vsel %vm50_vm1, %v300_v62, %v6376_v37  ;;  %v1848_v44 = vrot.slane %v1708_v51, 7 }
 0x20c   :  { %5367 = vrot.lane.b32.xlu0 %v5366_v7, %s5759_s25  ;;  %v1088_v38 = vsel %vm1038_vm3, %v1023_v15, %v6393_v32  ;;  %v6608_v7 = vpop.permute.xlu1 %656 }
 0x20d   :  { %v5371_v10 = vpack.i.bf16 %v1708_v51, %v1707_v1  ;;  %v1846_v28 = vrot.slane %v1707_v1, 7  ;;  %v2039_v17 = vrot.slane %v1707_v1, 1  ;;  %v2146_v3 = vsel %vm2014_vm6, %v2041_v53, 0.0 }
 0x20e   :  { %v904_v5 = vpop.permute.xlu0 %903 }
 0x20f   :  { %v1087_v39 = vsel %vm1038_vm3, %v1022_v21, %v904_v5  ;;  %5372 = vrot.lane.b32.xlu1 %v5371_v10, %s5759_s25  ;;  %v2040_v42 = vsel %vm2014_vm6, %v2037_v6, %v2039_v17  ;;  %v2042_v49 = vsel %vm2014_vm6, %v2039_v17, %v2041_v53  ;;  %v6593_v30 = vsel %vm1821_vm5, %v1844_v2, %v1846_v28 }
 0x210   :  { %5169 = vmatprep.mubr.msk.f32.mxu0 %vm1111_vm4, %v1087_v39  ;;  %v5376_v37 = vpack.i.bf16 %v2040_v42, %v2038_v13  ;;  %v5381_v34 = vpack.i.bf16 %v2146_v3, %v2042_v49  ;;  %v6599_v36 = vsel %vm1821_vm5, %v1846_v28, %v1848_v44  ;;  %v6628_v3 = vpop.permute.xlu1 %660 }
 0x211   :  { %5170 = vmatmul.mubr.msk.f32.gmra.mxu0 %vm1111_vm4, %v1088_v38 }
 0x212   :  { %5377 = vrot.lane.b32.xlu0 %v5376_v37, %s5760_s26  ;;  %v5123_v25 = vpop.f32.mrf.mxu0  ;;  %v304_v40 = vpop.permute.xlu0 %303 }
 0x213   :  { %v1460_v2 = vadd.f32 %v5123_v25, %v6321_v35  ;;  %5382 = vrot.lane.b32.xlu1 %v5381_v34, %s5760_s26  ;;  %v1024_v10 = vsel %vm50_vm1, %v304_v40, %v6401_v54 }
 0x214   :  { %v1454_v26 = vpop.f32.mrf.mxu0  ;;  %v6634_v37 = vpop.permute.xlu1 %964 }
 0x215   :  { %v1710_v51 = vmax.f32 %v1460_v2, 0.0  ;;  %v1455_v32 = vadd.f32 %v6321_v35, %v1454_v26 }
 0x216   :  { %v308_v57 = vpop.permute.xlu0 %307 }
 0x217   :  { %v6610_v27 = vmax.f32 %v1455_v32, 0.0  ;;  %v1851_v62 = vrot.slane %v1710_v51, 7  ;;  %v1025_v6 = vsel %vm50_vm1, %v308_v57, %v6410_v9 }
 0x218   :  { %v1090_v44 = vsel %vm1038_vm3, %v1025_v6, %v6422_v12  ;;  %v2044_v12 = vrot.slane %v1710_v51, 1 }
 0x219   :  { %v5386_v53 = vpack.i.bf16 %v1710_v51, %v6610_v27  ;;  %v1850_v1 = vrot.slane %v6610_v27, 7  ;;  %v2043_v42 = vrot.slane %v6610_v27, 1 }
 0x21a   :  { %v912_v28 = vpop.permute.xlu0 %911 }
 0x21b   :  { %v1089_v17 = vsel %vm1038_vm3, %v1024_v10, %v912_v28  ;;  %5387 = vrot.lane.b32.xlu0 %v5386_v53, %s5759_s25  ;;  %v6623_v15 = vsel %vm1821_vm5, %v1850_v1, %v1851_v62  ;;  %v2045_v10 = vsel %vm2014_vm6, %v2043_v42, %v2044_v12 }
 0x21c   :  { %5172 = vmatprep.mubr.msk.f32.mxu0 %vm1111_vm4, %v1089_v17 }
 0x21d   :  { %5173 = vmatmul.mubr.msk.f32.gmra.mxu0 %vm1111_vm4, %v1090_v44 }
 0x21e   :  { %v5126_v54 = vpop.f32.mrf.mxu0  ;;  %v315_v9 = vpop.permute.xlu0 %314 }
 0x21f   :  { %v1470_v21 = vadd.f32 %v5126_v54, %v6321_v35  ;;  %v1026_v53 = vsel %vm50_vm1, %v315_v9, %v6430_v43 }
 0x220   :  { %v1464_v5 = vpop.f32.mrf.mxu0 }
 0x221   :  { %v1712_v13 = vmax.f32 %v1470_v21, 0.0  ;;  %v1465_v39 = vadd.f32 %v6321_v35, %v1464_v5  ;;  %v6655_v21 = vpop.permute.xlu1 %664 }
 0x222   :  { %v319_v49 = vpop.permute.xlu0 %318 }
 0x223   :  { %v2048_v38 = vrot.slane %v1712_v13, 1  ;;  %v1711_v34 = vmax.f32 %v1465_v39, 0.0  ;;  %v1027_v26 = vsel %vm50_vm1, %v319_v49, %v6442_v11  ;;  %v1855_v32 = vrot.slane %v1712_v13, 7 }
 0x224   :  { %v1092_v43 = vsel %vm1038_vm3, %v1027_v26, %v6459_v31 }
 0x225   :  { %v5391_v25 = vpack.i.bf16 %v1712_v13, %v1711_v34  ;;  %v1853_v40 = vrot.slane %v1711_v34, 7  ;;  %v2046_v2 = vrot.slane %v1711_v34, 1  ;;  %v2147_v57 = vsel %vm2014_vm6, %v2048_v38, 0.0 }
 0x226   :  { %v923_v6 = vpop.permute.xlu0 %922 }
 0x227   :  { %v1091_v28 = vsel %vm1038_vm3, %v1026_v53, %v923_v6  ;;  %5392 = vrot.lane.b32.xlu1 %v5391_v25, %s5759_s25  ;;  %v2047_v51 = vsel %vm2014_vm6, %v2044_v12, %v2046_v2  ;;  %v2049_v17 = vsel %vm2014_vm6, %v2046_v2, %v2048_v38  ;;  %v6647_v44 = vsel %vm1821_vm5, %v1851_v62, %v1853_v40  ;;  %v6662_v38 = vpop.permute.xlu1 %668 }
 0x228   :  { %5175 = vmatprep.mubr.msk.f32.mxu0 %vm1111_vm4, %v1091_v28  ;;  %v5396_v11 = vpack.i.bf16 %v2047_v51, %v2045_v10  ;;  %v5401_v54 = vpack.i.bf16 %v2147_v57, %v2049_v17  ;;  %v6653_v9 = vsel %vm1821_vm5, %v1853_v40, %v1855_v32 }
 0x229   :  { %5176 = vmatmul.mubr.msk.f32.gmra.mxu0 %vm1111_vm4, %v1092_v43 }
 0x22a   :  { %5397 = vrot.lane.b32.xlu0 %v5396_v11, %s5760_s26  ;;  %v5129_v5 = vpop.f32.mrf.mxu0  ;;  %v323_v13 = vpop.permute.xlu0 %322 }
 0x22b   :  { %v1480_v62 = vadd.f32 %v5129_v5, %v6321_v35  ;;  %5402 = vrot.lane.b32.xlu1 %v5401_v54, %s5760_s26  ;;  %v1028_v26 = vsel %vm50_vm1, %v323_v13, %v6470_v45  ;;  %v6682_v10 = vpop.permute.xlu1 %972 }
 0x22c   :  { %v1474_v39 = vpop.f32.mrf.mxu0 }
 0x22d   :  { %v1714_v42 = vmax.f32 %v1480_v62, 0.0  ;;  %v1475_v31 = vadd.f32 %v6321_v35, %v1474_v39 }
 0x22e   :  { %v327_v49 = vpop.permute.xlu0 %326 }
 0x22f   :  { %v6664_v34 = vmax.f32 %v1475_v31, 0.0  ;;  %v1858_v12 = vrot.slane %v1714_v42, 7  ;;  %v1029_v2 = vsel %vm50_vm1, %v327_v49, %v6482_v56  ;;  %v2051_v5 = vrot.slane %v1714_v42, 1 }
 0x230   :  { %v1094_v6 = vsel %vm1038_vm3, %v1029_v2, %v6497_v41 }
 0x231   :  { %v5406_v25 = vpack.i.bf16 %v1714_v42, %v6664_v34  ;;  %v1857_v40 = vrot.slane %v6664_v34, 7  ;;  %v2050_v51 = vrot.slane %v6664_v34, 1 }
 0x232   :  { %v931_v32 = vpop.permute.xlu0 %930 }
 0x233   :  { %v1093_v57 = vsel %vm1038_vm3, %v1028_v26, %v931_v32  ;;  %5407 = vrot.lane.b32.xlu0 %v5406_v25, %s5759_s25  ;;  %v6677_v53 = vsel %vm1821_vm5, %v1857_v40, %v1858_v12  ;;  %v2052_v32 = vsel %vm2014_vm6, %v2050_v51, %v2051_v5 }
 0x234   :  { %5178 = vmatprep.mubr.msk.f32.mxu0 %vm1111_vm4, %v1093_v57 }
 0x235   :  { %5179 = vmatmul.mubr.msk.f32.gmra.mxu0 %vm1111_vm4, %v1094_v6 }
 0x236   :  { %v5132_v45 = vpop.f32.mrf.mxu0  ;;  %v334_v56 = vpop.permute.xlu0 %333 }
 0x237   :  { %v1490_v28 = vadd.f32 %v5132_v45, %v6321_v35  ;;  %v1030_v2 = vsel %vm50_vm1, %v334_v56, %v6505_v58 }
 0x238   :  { %v1484_v17 = vpop.f32.mrf.mxu0 }
 0x239   :  { %v1716_v11 = vmax.f32 %v1490_v28, 0.0  ;;  %v1485_v43 = vadd.f32 %v6321_v35, %v1484_v17  ;;  %v5313_v54 = vpop.permute.xlu1 %5312 }
 0x23a   :  { %v5315_v13 = vunpack.i.h.bf16 %v5313_v54  ;;  %v5314_v62 = vunpack.i.l.bf16 %v5313_v54  ;;  %v338_v41 = vpop.permute.xlu0 %337 }
 0x23b   :  { %v2055_v39 = vrot.slane %v1716_v11, 1  ;;  %v1715_v31 = vmax.f32 %v1485_v43, 0.0  ;;  %v1031_v49 = vsel %vm50_vm1, %v338_v41, %v6532_v46  ;;  %v1862_v25 = vrot.slane %v1716_v11, 7 }
 0x23c   :  { %v2563_v26 = vsel %vm2559_vm7, %v6388_v22, %v5315_v13  ;;  %v2562_v45 = vsel %vm2559_vm7, %v6382_v47, %v5314_v62  ;;  %v1096_v58 = vsel %vm1038_vm3, %v1031_v49, %v6545_v59 }
 0x23d   :  { %v5411_v57 = vpack.i.bf16 %v1716_v11, %v1715_v31  ;;  %v1860_v42 = vrot.slane %v1715_v31, 7  ;;  %v2053_v6 = vrot.slane %v1715_v31, 1  ;;  %v5323_v28 = vpop.permute.xlu1 %5322  ;;  %v2148_v17 = vsel %vm2014_vm6, %v2055_v39, 0.0 }
 0x23e   :  { %v5325_v46 = vunpack.i.h.bf16 %v5323_v28  ;;  %v5324_v43 = vunpack.i.l.bf16 %v5323_v28  ;;  %v942_v54 = vpop.permute.xlu0 %941 }
 0x23f   :  { %v1095_v56 = vsel %vm1038_vm3, %v1030_v2, %v942_v54  ;;  %5412 = vrot.lane.b32.xlu1 %v5411_v57, %s5759_s25  ;;  %v2054_v22 = vsel %vm2014_vm6, %v2051_v5, %v2053_v6  ;;  %v2056_v51 = vsel %vm2014_vm6, %v2053_v6, %v2055_v39  ;;  %v6705_v11 = vsel %vm1821_vm5, %v1858_v12, %v1860_v42 }
 0x240   :  { %v6708_v47 = vsel %vm2624_vm8, %v2562_v45, %v5324_v43  ;;  %v6711_v13 = vsel %vm2624_vm8, %v2563_v26, %v5325_v46  ;;  %5181 = vmatprep.mubr.msk.f32.mxu0 %vm1111_vm4, %v1095_v56  ;;  %v5416_v59 = vpack.i.bf16 %v2054_v22, %v2052_v32  ;;  %v5421_v62 = vpack.i.bf16 %v2148_v17, %v2056_v51 }
 0x241   :  { %v2690_v41 = vpack.c.bf16 %v6711_v13, %v6708_v47  ;;  %5182 = vmatmul.mubr.msk.f32.gmra.mxu0 %vm1111_vm4, %v1096_v58  ;;  %v6718_v5 = vsel %vm1821_vm5, %v1860_v42, %v1862_v25 }
 0x242   :  { %5417 = vrot.lane.b32.xlu0 %v5416_v59, %s5760_s26  ;;  %v5135_v12 = vpop.f32.mrf.mxu0  ;;  %v342_v39 = vpop.permute.xlu0 %341 }
 0x243   :  { %v1500_v31 = vadd.f32 %v5135_v12, %v6321_v35  ;;  %5422 = vrot.lane.b32.xlu1 %v5421_v62, %s5760_s26  ;;  %v1032_v28 = vsel %vm50_vm1, %v342_v39, %v6570_v0 }
 0x244   :  { %v1494_v49 = vpop.f32.mrf.mxu0 }
 0x245   :  { %v1718_v2 = vmax.f32 %v1500_v31, 0.0  ;;  %v1495_v26 = vadd.f32 %v6321_v35, %v1494_v49 }
 0x246   :  { %v346_v32 = vpop.permute.xlu0 %345 }
 0x247   :  { %v6724_v57 = vmax.f32 %v1495_v26, 0.0  ;;  %v1865_v6 = vrot.slane %v1718_v2, 7  ;;  %v1033_v42 = vsel %vm50_vm1, %v346_v32, %v6579_v55  ;;  %v2058_v12 = vrot.slane %v1718_v2, 1 }
 0x248   :  { %v1098_v54 = vsel %vm1038_vm3, %v1033_v42, %v6601_v8 }
 0x249   :  { %v5426_v45 = vpack.i.bf16 %v1718_v2, %v6724_v57  ;;  %v7993_v25 = vrot.slane %v6724_v57, 7  ;;  %v2057_v56 = vrot.slane %v6724_v57, 1 }
 0x24a   :  { %v950_v17 = vpop.permute.xlu0 %949 }
 0x24b   :  { %v1097_v46 = vsel %vm1038_vm3, %v1032_v28, %v950_v17  ;;  %5427 = vrot.lane.b32.xlu0 %v5426_v45, %s5759_s25  ;;  %v6737_v43 = vsel %vm1821_vm5, %v7993_v25, %v1865_v6  ;;  %v2059_v17 = vsel %vm2014_vm6, %v2057_v56, %v2058_v12 }
 0x24c   :  { %5184 = vmatprep.mubr.msk.f32.mxu0 %vm1111_vm4, %v1097_v46 }
 0x24d   :  { %5185 = vmatmul.mubr.msk.f32.gmra.mxu0 %vm1111_vm4, %v1098_v54 }
 0x24e   :  { %v5138_v55 = vpop.f32.mrf.mxu0  ;;  %v353_v58 = vpop.permute.xlu0 %352 }
 0x24f   :  { %v1510_v0 = vadd.f32 %v5138_v55, %v6321_v35  ;;  %v1034_v42 = vsel %vm50_vm1, %v353_v58, %v6608_v7 }
 0x250   :  { %v1504_v22 = vpop.f32.mrf.mxu0 }
 0x251   :  { %v1720_v51 = vmax.f32 %v1510_v0, 0.0  ;;  %v1505_v59 = vadd.f32 %v6321_v35, %v1504_v22  ;;  %v5333_v62 = vpop.permute.xlu1 %5332 }
 0x252   :  { %v5335_v39 = vunpack.i.h.bf16 %v5333_v62  ;;  %v5334_v31 = vunpack.i.l.bf16 %v5333_v62  ;;  %v357_v49 = vpop.permute.xlu0 %356 }
 0x253   :  { %v2062_v26 = vrot.slane %v1720_v51, 1  ;;  %v1719_v32 = vmax.f32 %v1505_v59, 0.0  ;;  %v1035_v8 = vsel %vm50_vm1, %v357_v49, %v6628_v3  ;;  %v1869_v45 = vrot.slane %v1720_v51, 7 }
 0x254   :  { %v2567_v28 = vsel %vm2559_vm7, %v6454_v14, %v5335_v39  ;;  %v2566_v55 = vsel %vm2559_vm7, %v6448_v63, %v5334_v31  ;;  %v1100_v7 = vsel %vm1038_vm3, %v1035_v8, %v6634_v37 }
 0x255   :  { %v5431_v46 = vpack.i.bf16 %v1720_v51, %v1719_v32  ;;  %v1867_v54 = vrot.slane %v1719_v32, 7  ;;  %v2060_v2 = vrot.slane %v1719_v32, 1  ;;  %v5343_v0 = vpop.permute.xlu1 %5342  ;;  %v2149_v22 = vsel %vm2014_vm6, %v2062_v26, 0.0 }
 0x256   :  { %v5345_v59 = vunpack.i.h.bf16 %v5343_v0  ;;  %v5344_v3 = vunpack.i.l.bf16 %v5343_v0  ;;  %v961_v62 = vpop.permute.xlu0 %960 }
 0x257   :  { %v1099_v58 = vsel %vm1038_vm3, %v1034_v42, %v961_v62  ;;  %5432 = vrot.lane.b32.xlu1 %v5431_v46, %s5759_s25  ;;  %v2061_v14 = vsel %vm2014_vm6, %v2058_v12, %v2060_v2  ;;  %v2063_v56 = vsel %vm2014_vm6, %v2060_v2, %v2062_v26  ;;  %v6763_v51 = vsel %vm1821_vm5, %v1865_v6, %v1867_v54 }
 0x258   :  { %v6766_v63 = vsel %vm2624_vm8, %v2566_v55, %v5344_v3  ;;  %v6769_v39 = vsel %vm2624_vm8, %v2567_v28, %v5345_v59  ;;  %5187 = vmatprep.mubr.msk.f32.mxu0 %vm1111_vm4, %v1099_v58  ;;  %v5436_v37 = vpack.i.bf16 %v2061_v14, %v2059_v17  ;;  %v5441_v31 = vpack.i.bf16 %v2149_v22, %v2063_v56 }
 0x259   :  { %v2692_v49 = vpack.c.bf16 %v6769_v39, %v6766_v63  ;;  %5188 = vmatmul.mubr.msk.f32.gmra.mxu0 %vm1111_vm4, %v1100_v7  ;;  %v6776_v12 = vsel %vm1821_vm5, %v1867_v54, %v1869_v45 }
 0x25a   :  { %5437 = vrot.lane.b32.xlu0 %v5436_v37, %s5760_s26  ;;  %v5141_v6 = vpop.f32.mrf.mxu0  ;;  %v361_v26 = vpop.permute.xlu0 %360 }
 0x25b   :  { %v1520_v32 = vadd.f32 %v5141_v6, %v6321_v35  ;;  %5442 = vrot.lane.b32.xlu1 %v5441_v31, %s5760_s26  ;;  %v1036_v0 = vsel %vm50_vm1, %v361_v26, %v6655_v21 }
 0x25c   :  { %v1514_v8 = vpop.f32.mrf.mxu0 }
 0x25d   :  { %v6781_v42 = vmax.f32 %v1520_v32, 0.0  ;;  %v1515_v28 = vadd.f32 %v6321_v35, %v1514_v8 }
 0x25e   :  { %v365_v17 = vpop.permute.xlu0 %364 }
 0x25f   :  { %v6784_v46 = vmax.f32 %v1515_v28, 0.0  ;;  %v1872_v2 = vrot.slane %v6781_v42, 7  ;;  %v1037_v55 = vsel %vm50_vm1, %v365_v17, %v6662_v38  ;;  %v2065_v37 = vrot.slane %v6781_v42, 1 }
 0x260   :  { %v1102_v38 = vsel %vm1038_vm3, %v1037_v55, %v6682_v10  ;;  %v1998_v10 = vsel %vm1821_vm5, 0.0, %v1822_v60 }
 0x261   :  { %v5446_v45 = vpack.i.bf16 %v6781_v42, %v6784_v46  ;;  %v7992_v54 = vrot.slane %v6784_v46, 7  ;;  %v2064_v21 = vrot.slane %v6784_v46, 1 }
 0x262   :  { %v969_v22 = vpop.permute.xlu0 %968 }
 0x263   :  { %v1101_v59 = vsel %vm1038_vm3, %v1036_v0, %v969_v22  ;;  %5447 = vrot.lane.b32.xlu0 %v5446_v45, %s5759_s25  ;;  %v6801_v3 = vsel %vm1821_vm5, %v7992_v54, %v1872_v2  ;;  %v2066_v55 = vsel %vm2014_vm6, %v2064_v21, %v2065_v37 }
 0x264   :  { %5190 = vmatprep.mubr.msk.f32.mxu0 %vm1111_vm4, %v1101_v59 }
 0x265   :  { %5191 = vmatmul.mubr.msk.f32.gmra.mxu0 %vm1111_vm4, %v1102_v38 }
 0x266   :  { %v5144_v62 = vpop.f32.mrf.mxu0  ;;  %v5308_v7 = vpop.permute.xlu0 %5307 }
 0x267   :  { %v1530_v58 = vadd.f32 %v5144_v62, %v6321_v35  ;;  %v5310_v14 = vunpack.i.h.bf16 %v5308_v7  ;;  %v5309_v56 = vunpack.i.l.bf16 %v5308_v7 }
 0x268   :  { %v1524_v31 = vpop.f32.mrf.mxu0 }
 0x269   :  { %v1724_v6 = vmax.f32 %v1530_v58, 0.0  ;;  %v1525_v26 = vadd.f32 %v6321_v35, %v1524_v31  ;;  %v5353_v32 = vpop.permute.xlu1 %5352  ;;  %v2560_v45 = vsel %vm2559_vm7, %v1998_v10, %v5309_v56  ;;  %v2561_v38 = vsel %vm2559_vm7, %v6349_v48, %v5310_v14 }
 0x26a   :  { %v5355_v8 = vunpack.i.h.bf16 %v5353_v32  ;;  %v5354_v28 = vunpack.i.l.bf16 %v5353_v32  ;;  %v5318_v17 = vpop.permute.xlu0 %5317 }
 0x26b   :  { %v2069_v0 = vrot.slane %v1724_v6, 1  ;;  %v1723_v22 = vmax.f32 %v1525_v26, 0.0  ;;  %v5320_v59 = vunpack.i.h.bf16 %v5318_v17  ;;  %v1876_v35 = vrot.slane %v1724_v6, 7 }
 0x26c   :  { %v2571_v16 = vsel %vm2559_vm7, %v6528_v33, %v5355_v8  ;;  %v2570_v60 = vsel %vm2559_vm7, %v6521_v18, %v5354_v28  ;;  %v5319_v62 = vunpack.i.l.bf16 %v5318_v17 }
 0x26d   :  { %v2150_v7 = vsel %vm2014_vm6, %v2069_v0, 0.0  ;;  %v5451_v58 = vpack.i.bf16 %v1724_v6, %v1723_v22  ;;  %v1874_v56 = vrot.slane %v1723_v22, 7  ;;  %v2067_v31 = vrot.slane %v1723_v22, 1  ;;  %v5363_v21 = vpop.permute.xlu1 %5362 }
 0x26e   :  { %v5365_v32 = vunpack.i.h.bf16 %v5363_v21  ;;  %v5364_v26 = vunpack.i.l.bf16 %v5363_v21  ;;  %v5328_v10 = vpop.permute.xlu0 %5327  ;;  %v2625_v54 = vsel %vm2624_vm8, %v2560_v45, %v5319_v62  ;;  %v2626_v48 = vsel %vm2624_vm8, %v2561_v38, %v5320_v59 }
 0x26f   :  { %v5330_v14 = vunpack.i.h.bf16 %v5328_v10  ;;  %v5329_v25 = vunpack.i.l.bf16 %v5328_v10  ;;  %5452 = vrot.lane.b32.xlu1 %v5451_v58, %s5759_s25  ;;  %v2689_v33 = vpack.c.bf16 %v2626_v48, %v2625_v54  ;;  %v2068_v18 = vsel %vm2014_vm6, %v2065_v37, %v2067_v31  ;;  %v6841_v54 = vld [vmem:[%s7982_s2] ss:$0 sm:$0xff] }
 0x270   :  { %v6828_v8 = vsel %vm2624_vm8, %v2570_v60, %v5364_v26  ;;  %v6831_v6 = vsel %vm2624_vm8, %v2571_v16, %v5365_v32  ;;  %v5456_v28 = vpack.i.bf16 %v2068_v18, %v2066_v55  ;;  %v2070_v17 = vsel %vm2014_vm6, %v2067_v31, %v2069_v0 }
 0x271   :  { %v2694_v45 = vpack.c.bf16 %v6831_v6, %v6828_v8  ;;  %5199 = vmatprep.mubr.msk.bf16.mxu1 %vm2752_vm9, %v2689_v33  ;;  %v5147_v22 = vpop.f32.mrf.mxu0  ;;  %v5461_v59 = vpack.i.bf16 %v2150_v7, %v2070_v17  ;;  %v6851_v0 = vsel %vm1821_vm5, %v1872_v2, %v1874_v56  ;;  %v6854_v38 = vsel %vm1821_vm5, %v1874_v56, %v1876_v35 }
 0x272   :  { %5457 = vrot.lane.b32.xlu0 %v5456_v28, %s5760_s26  ;;  %v1540_v37 = vadd.f32 %v6841_v54, %v5147_v22  ;;  %5200 = vmatmul.mubr.msk.bf16.vlgmr.msra.gmra.mxu1 %vm2752_vm9, %v2690_v41  ;;  %v5338_v55 = vpop.permute.xlu0 %5337  ;;  %v1999_v16 = vsel %vm1821_vm5, 0.0, %v1829_v24  ;;  %v2565_v41 = vsel %vm2559_vm7, %v6415_v4, %v5330_v14  ;;  %v2000_v10 = vsel %vm1821_vm5, 0.0, %v1836_v52 }
 0x273   :  { %v5340_v60 = vunpack.i.h.bf16 %v5338_v55  ;;  %v5339_v62 = vunpack.i.l.bf16 %v5338_v55  ;;  %5462 = vrot.lane.b32.xlu1 %v5461_v59, %s5760_s26  ;;  %v1534_v47 = vpop.f32.mrf.mxu0  ;;  %v2564_v13 = vsel %vm2559_vm7, %v1999_v16, %v5329_v25 }
 0x274   :  { %v6863_v42 = vmax.f32 %v1540_v37, 0.0  ;;  %v1535_v2 = vadd.f32 %v6841_v54, %v1534_v47 }
 0x275   :  { %v2630_v35 = vsel %vm2624_vm8, %v2565_v41, %v5340_v60  ;;  %v2629_v29 = vsel %vm2624_vm8, %v2564_v13, %v5339_v62 }
 0x276   :  { %v2691_v7 = vpack.c.bf16 %v2630_v35, %v2629_v29  ;;  %v6868_v24 = vmax.f32 %v1535_v2, 0.0  ;;  %v5348_v58 = vpop.permute.xlu0 %5347  ;;  %v1879_v56 = vrot.slane %v6863_v42, 7  ;;  %v2072_v59 = vrot.slane %v6863_v42, 1 }
 0x277   :  { %v5350_v4 = vunpack.i.h.bf16 %v5348_v58  ;;  %v5349_v21 = vunpack.i.l.bf16 %v5348_v58 }
 0x278   :  { %v5466_v25 = vpack.i.bf16 %v6863_v42, %v6868_v24  ;;  %v1878_v31 = vrot.slane %v6868_v24, 7  ;;  %5203 = vmatprep.mubr.msk.bf16.mxu1 %vm2752_vm9, %v2691_v7  ;;  %v2071_v8 = vrot.slane %v6868_v24, 1 }
 0x279   :  { %v2568_v63 = vsel %vm2559_vm7, %v2000_v10, %v5349_v21  ;;  %v2569_v39 = vsel %vm2559_vm7, %v6487_v19, %v5350_v4  ;;  %v2001_v19 = vsel %vm1821_vm5, 0.0, %v1843_v61 }
 0x27a   :  { %5204 = vmatmul.mubr.msk.bf16.gmra.mxu1 %vm2752_vm9, %v2692_v49  ;;  %v5358_v32 = vpop.permute.xlu0 %5357  ;;  %5467 = vrot.lane.b32.xlu0 %v5466_v25, %s5759_s25  ;;  %v6885_v26 = vsel %vm1821_vm5, %v1878_v31, %v1879_v56  ;;  %v2073_v13 = vsel %vm2014_vm6, %v2071_v8, %v2072_v59 }
 0x27b   :  { %v5360_v48 = vunpack.i.h.bf16 %v5358_v32  ;;  %v5359_v14 = vunpack.i.l.bf16 %v5358_v32 }
 0x27d   :  { %v2634_v49 = vsel %vm2624_vm8, %v2569_v39, %v5360_v48  ;;  %v2633_v33 = vsel %vm2624_vm8, %v2568_v63, %v5359_v14  ;;  %v5150_v18 = vpop.f32.mrf.mxu0 }
 0x27e   :  { %v2693_v6 = vpack.c.bf16 %v2634_v49, %v2633_v33  ;;  %v1550_v28 = vadd.f32 %v6841_v54, %v5150_v18  ;;  %v5368_v23 = vpop.permute.xlu0 %5367 }
 0x27f   :  { %v5370_v17 = vunpack.i.h.bf16 %v5368_v23  ;;  %v5369_v52 = vunpack.i.l.bf16 %v5368_v23  ;;  %v1544_v22 = vpop.f32.mrf.mxu0 }
 0x280   :  { %v1728_v37 = vmax.f32 %v1550_v28, 0.0  ;;  %v1545_v55 = vadd.f32 %v6841_v54, %v1544_v22  ;;  %5207 = vmatprep.mubr.msk.bf16.mxu1 %vm2752_vm9, %v2693_v6 }
 0x281   :  { %v5373_v16 = vpop.permute.xlu1 %5372  ;;  %v2572_v2 = vsel %vm2559_vm7, %v2001_v19, %v5369_v52  ;;  %v2573_v35 = vsel %vm2559_vm7, %v6564_v20, %v5370_v17 }
 0x282   :  { %v2076_v60 = vrot.slane %v1728_v37, 1  ;;  %v1727_v62 = vmax.f32 %v1545_v55, 0.0  ;;  %v5375_v47 = vunpack.i.h.bf16 %v5373_v16  ;;  %5208 = vmatmul.mubr.msk.bf16.gmra.mxu1 %vm2752_vm9, %v2694_v45  ;;  %v1883_v41 = vrot.slane %v1728_v37, 7 }
 0x283   :  { %v5374_v29 = vunpack.i.l.bf16 %v5373_v16 }
 0x284   :  { %v2151_v7 = vsel %vm2014_vm6, %v2076_v60, 0.0  ;;  %v5471_v50 = vpack.i.bf16 %v1728_v37, %v1727_v62  ;;  %v1881_v58 = vrot.slane %v1727_v62, 7  ;;  %v2074_v61 = vrot.slane %v1727_v62, 1  ;;  %v5378_v25 = vpop.permute.xlu0 %5377 }
 0x285   :  { %v2575_v4 = vsel %vm2559_vm7, %v6599_v36, %v5375_v47  ;;  %v2574_v45 = vsel %vm2559_vm7, %v6593_v30, %v5374_v29  ;;  %v5380_v21 = vunpack.i.h.bf16 %v5378_v25  ;;  %v5379_v32 = vunpack.i.l.bf16 %v5378_v25  ;;  %v5383_v10 = vpop.permute.xlu1 %5382 }
 0x286   :  { %v5385_v48 = vunpack.i.h.bf16 %v5383_v10  ;;  %v5384_v14 = vunpack.i.l.bf16 %v5383_v10  ;;  %5472 = vrot.lane.b32.xlu1 %v5471_v50, %s5759_s25  ;;  %v2075_v20 = vsel %vm2014_vm6, %v2072_v59, %v2074_v61  ;;  %v2077_v63 = vsel %vm2014_vm6, %v2074_v61, %v2076_v60 }
 0x287   :  { %v2638_v39 = vsel %vm2624_vm8, %v2573_v35, %v5380_v21  ;;  %v2637_v49 = vsel %vm2624_vm8, %v2572_v2, %v5379_v32  ;;  %v5476_v33 = vpack.i.bf16 %v2075_v20, %v2073_v13  ;;  %v5481_v36 = vpack.i.bf16 %v2151_v7, %v2077_v63 }
 0x288   :  { %v2695_v18 = vpack.c.bf16 %v2638_v39, %v2637_v49  ;;  %v2639_v30 = vsel %vm2624_vm8, %v2574_v45, %v5384_v14  ;;  %v2640_v8 = vsel %vm2624_vm8, %v2575_v4, %v5385_v48  ;;  %v6923_v6 = vsel %vm1821_vm5, %v1879_v56, %v1881_v58 }
 0x289   :  { %v2696_v28 = vpack.c.bf16 %v2640_v8, %v2639_v30  ;;  %5477 = vrot.lane.b32.xlu0 %v5476_v33, %s5760_s26  ;;  %v5153_v23 = vpop.f32.mrf.mxu0  ;;  %v6927_v17 = vsel %vm1821_vm5, %v1881_v58, %v1883_v41  ;;  %v2002_v50 = vsel %vm1821_vm5, 0.0, %v1850_v1 }
 0x28a   :  { %v1560_v52 = vadd.f32 %v6841_v54, %v5153_v23  ;;  %5211 = vmatprep.mubr.msk.bf16.mxu1 %vm2752_vm9, %v2695_v18  ;;  %5482 = vrot.lane.b32.xlu1 %v5481_v36, %s5760_s26 }
 0x28b   :  { %5212 = vmatmul.mubr.msk.bf16.gmra.mxu1 %vm2752_vm9, %v2696_v28  ;;  %v1554_v22 = vpop.f32.mrf.mxu0 }
 0x28c   :  { %v1730_v42 = vmax.f32 %v1560_v52, 0.0  ;;  %v1555_v56 = vadd.f32 %v6841_v54, %v1554_v22 }
 0x28d   :  { %v5388_v60 = vpop.permute.xlu0 %5387 }
 0x28e   :  { %v6934_v59 = vmax.f32 %v1555_v56, 0.0  ;;  %v1886_v37 = vrot.slane %v1730_v42, 7  ;;  %v5390_v47 = vunpack.i.h.bf16 %v5388_v60  ;;  %v5389_v2 = vunpack.i.l.bf16 %v5388_v60 }
 0x28f   :  { %v2079_v58 = vrot.slane %v1730_v42, 1 }
 0x290   :  { %v5486_v55 = vpack.i.bf16 %v1730_v42, %v6934_v59  ;;  %v1885_v19 = vrot.slane %v6934_v59, 7  ;;  %v2078_v41 = vrot.slane %v6934_v59, 1  ;;  %v2577_v25 = vsel %vm2559_vm7, %v6623_v15, %v5390_v47 }
 0x291   :  { %v2576_v32 = vsel %vm2559_vm7, %v2002_v50, %v5389_v2 }
 0x292   :  { %5487 = vrot.lane.b32.xlu0 %v5486_v55, %s5759_s25  ;;  %v6942_v16 = vsel %vm1821_vm5, %v1885_v19, %v1886_v37  ;;  %v2080_v14 = vsel %vm2014_vm6, %v2078_v41, %v2079_v58 }
 0x295   :  { %v5156_v62 = vpop.f32.mrf.mxu0 }
 0x296   :  { %v1570_v13 = vadd.f32 %v6841_v54, %v5156_v62 }
 0x297   :  { %v1564_v35 = vpop.f32.mrf.mxu0 }
 0x298   :  { %v1732_v29 = vmax.f32 %v1570_v13, 0.0  ;;  %v1565_v7 = vadd.f32 %v6841_v54, %v1564_v35 }
 0x299   :  { %v5393_v61 = vpop.permute.xlu1 %5392 }
 0x29a   :  { %v2083_v4 = vrot.slane %v1732_v29, 1  ;;  %v1731_v45 = vmax.f32 %v1565_v7, 0.0  ;;  %v5395_v21 = vunpack.i.h.bf16 %v5393_v61  ;;  %v1890_v10 = vrot.slane %v1732_v29, 7 }
 0x29b   :  { %v5394_v48 = vunpack.i.l.bf16 %v5393_v61 }
 0x29c   :  { %v2152_v20 = vsel %vm2014_vm6, %v2083_v4, 0.0  ;;  %v5491_v63 = vpack.i.bf16 %v1732_v29, %v1731_v45  ;;  %v1888_v27 = vrot.slane %v1731_v45, 7  ;;  %v2081_v39 = vrot.slane %v1731_v45, 1  ;;  %v5398_v1 = vpop.permute.xlu0 %5397 }
 0x29d   :  { %v2579_v49 = vsel %vm2559_vm7, %v6653_v9, %v5395_v21  ;;  %v2578_v15 = vsel %vm2559_vm7, %v6647_v44, %v5394_v48  ;;  %v5400_v33 = vunpack.i.h.bf16 %v5398_v1  ;;  %v5399_v36 = vunpack.i.l.bf16 %v5398_v1  ;;  %v5403_v18 = vpop.permute.xlu1 %5402 }
 0x29e   :  { %v5405_v30 = vunpack.i.h.bf16 %v5403_v18  ;;  %v5404_v8 = vunpack.i.l.bf16 %v5403_v18  ;;  %5492 = vrot.lane.b32.xlu1 %v5491_v63, %s5759_s25  ;;  %v2082_v28 = vsel %vm2014_vm6, %v2079_v58, %v2081_v39  ;;  %v2084_v23 = vsel %vm2014_vm6, %v2081_v39, %v2083_v4 }
 0x29f   :  { %v2642_v52 = vsel %vm2624_vm8, %v2577_v25, %v5400_v33  ;;  %v2641_v22 = vsel %vm2624_vm8, %v2576_v32, %v5399_v36  ;;  %v5496_v42 = vpack.i.bf16 %v2082_v28, %v2080_v14  ;;  %v5501_v9 = vpack.i.bf16 %v2152_v20, %v2084_v23 }
 0x2a0   :  { %v2697_v56 = vpack.c.bf16 %v2642_v52, %v2641_v22  ;;  %v2643_v44 = vsel %vm2624_vm8, %v2578_v15, %v5404_v8  ;;  %v2644_v55 = vsel %vm2624_vm8, %v2579_v49, %v5405_v30  ;;  %v6967_v60 = vsel %vm1821_vm5, %v1886_v37, %v1888_v27 }
 0x2a1   :  { %v2698_v62 = vpack.c.bf16 %v2644_v55, %v2643_v44  ;;  %5497 = vrot.lane.b32.xlu0 %v5496_v42, %s5760_s26  ;;  %v5159_v47 = vpop.f32.mrf.mxu0  ;;  %v6971_v13 = vsel %vm1821_vm5, %v1888_v27, %v1890_v10  ;;  %v2003_v63 = vsel %vm1821_vm5, 0.0, %v1857_v40 }
 0x2a2   :  { %v1580_v41 = vadd.f32 %v6841_v54, %v5159_v47  ;;  %5215 = vmatprep.mubr.msk.bf16.mxu1 %vm2752_vm9, %v2697_v56  ;;  %5502 = vrot.lane.b32.xlu1 %v5501_v9, %s5760_s26 }
 0x2a3   :  { %5216 = vmatmul.mubr.msk.bf16.gmra.mxu1 %vm2752_vm9, %v2698_v62  ;;  %v1574_v2 = vpop.f32.mrf.mxu0 }
 0x2a4   :  { %v1734_v35 = vmax.f32 %v1580_v41, 0.0  ;;  %v1575_v37 = vadd.f32 %v6841_v54, %v1574_v2 }
 0x2a5   :  { %v5408_v25 = vpop.permute.xlu0 %5407 }
 0x2a6   :  { %v6978_v29 = vmax.f32 %v1575_v37, 0.0  ;;  %v1893_v7 = vrot.slane %v1734_v35, 7  ;;  %v5410_v45 = vunpack.i.h.bf16 %v5408_v25  ;;  %v5409_v10 = vunpack.i.l.bf16 %v5408_v25 }
 0x2a7   :  { %v2086_v27 = vrot.slane %v1734_v35, 1 }
 0x2a8   :  { %v5506_v50 = vpack.i.bf16 %v1734_v35, %v6978_v29  ;;  %v1892_v58 = vrot.slane %v6978_v29, 7  ;;  %v2085_v32 = vrot.slane %v6978_v29, 1  ;;  %v2581_v1 = vsel %vm2559_vm7, %v6677_v53, %v5410_v45 }
 0x2a9   :  { %v2580_v36 = vsel %vm2559_vm7, %v2003_v63, %v5409_v10 }
 0x2aa   :  { %5507 = vrot.lane.b32.xlu0 %v5506_v50, %s5759_s25  ;;  %v6986_v61 = vsel %vm1821_vm5, %v1892_v58, %v1893_v7  ;;  %v2087_v8 = vsel %vm2014_vm6, %v2085_v32, %v2086_v27 }
 0x2ad   :  { %v5162_v4 = vpop.f32.mrf.mxu0 }
 0x2ae   :  { %v1590_v21 = vadd.f32 %v6841_v54, %v5162_v4 }
 0x2af   :  { %v1584_v48 = vpop.f32.mrf.mxu0 }
 0x2b0   :  { %v1736_v14 = vmax.f32 %v1590_v21, 0.0  ;;  %v1585_v20 = vadd.f32 %v6841_v54, %v1584_v48 }
 0x2b1   :  { %v5413_v39 = vpop.permute.xlu1 %5412 }
 0x2b2   :  { %v2090_v49 = vrot.slane %v1736_v14, 1  ;;  %v1735_v15 = vmax.f32 %v1585_v20, 0.0  ;;  %v5415_v33 = vunpack.i.h.bf16 %v5413_v39  ;;  %v1897_v18 = vrot.slane %v1736_v14, 7 }
 0x2b3   :  { %v5414_v30 = vunpack.i.l.bf16 %v5413_v39 }
 0x2b4   :  { %v2153_v28 = vsel %vm2014_vm6, %v2090_v49, 0.0  ;;  %v5511_v23 = vpack.i.bf16 %v1736_v14, %v1735_v15  ;;  %v1895_v34 = vrot.slane %v1735_v15, 7  ;;  %v2088_v52 = vrot.slane %v1735_v15, 1  ;;  %v5418_v40 = vpop.permute.xlu0 %5417 }
 0x2b5   :  { %v2583_v22 = vsel %vm2559_vm7, %v6718_v5, %v5415_v33  ;;  %v2582_v53 = vsel %vm2559_vm7, %v6705_v11, %v5414_v30  ;;  %v5420_v42 = vunpack.i.h.bf16 %v5418_v40  ;;  %v5419_v9 = vunpack.i.l.bf16 %v5418_v40  ;;  %v5423_v56 = vpop.permute.xlu1 %5422 }
 0x2b6   :  { %v5425_v44 = vunpack.i.h.bf16 %v5423_v56  ;;  %v5424_v55 = vunpack.i.l.bf16 %v5423_v56  ;;  %5512 = vrot.lane.b32.xlu1 %v5511_v23, %s5759_s25  ;;  %v2089_v62 = vsel %vm2014_vm6, %v2086_v27, %v2088_v52  ;;  %v2091_v47 = vsel %vm2014_vm6, %v2088_v52, %v2090_v49 }
 0x2b7   :  { %v2646_v41 = vsel %vm2624_vm8, %v2581_v1, %v5420_v42  ;;  %v2645_v2 = vsel %vm2624_vm8, %v2580_v36, %v5419_v9  ;;  %v5516_v35 = vpack.i.bf16 %v2089_v62, %v2087_v8  ;;  %v5521_v5 = vpack.i.bf16 %v2153_v28, %v2091_v47 }
 0x2b8   :  { %v2699_v37 = vpack.c.bf16 %v2646_v41, %v2645_v2  ;;  %v2647_v11 = vsel %vm2624_vm8, %v2582_v53, %v5424_v55  ;;  %v2648_v50 = vsel %vm2624_vm8, %v2583_v22, %v5425_v44  ;;  %v7011_v25 = vsel %vm1821_vm5, %v1893_v7, %v1895_v34 }
 0x2b9   :  { %v2700_v4 = vpack.c.bf16 %v2648_v50, %v2647_v11  ;;  %5517 = vrot.lane.b32.xlu0 %v5516_v35, %s5760_s26  ;;  %v5165_v45 = vpop.f32.mrf.mxu0  ;;  %v7015_v21 = vsel %vm1821_vm5, %v1895_v34, %v1897_v18  ;;  %v7994_v23 = vrot.slane %v6724_v57, 7 }
 0x2ba   :  { %v1600_v32 = vadd.f32 %v6841_v54, %v5165_v45  ;;  %5219 = vmatprep.mubr.msk.bf16.mxu1 %vm2752_vm9, %v2699_v37  ;;  %5522 = vrot.lane.b32.xlu1 %v5521_v5, %s5760_s26 }
 0x2bb   :  { %5220 = vmatmul.mubr.msk.bf16.gmra.mxu1 %vm2752_vm9, %v2700_v4  ;;  %v1594_v10 = vpop.f32.mrf.mxu0  ;;  %v2004_v34 = vsel %vm1821_vm5, 0.0, %v7994_v23 }
 0x2bc   :  { %v1738_v48 = vmax.f32 %v1600_v32, 0.0  ;;  %v1595_v7 = vadd.f32 %v6841_v54, %v1594_v10 }
 0x2bd   :  { %v5428_v1 = vpop.permute.xlu0 %5427 }
 0x2be   :  { %v7022_v14 = vmax.f32 %v1595_v7, 0.0  ;;  %v1900_v20 = vrot.slane %v1738_v48, 7  ;;  %v5430_v15 = vunpack.i.h.bf16 %v5428_v1  ;;  %v5429_v18 = vunpack.i.l.bf16 %v5428_v1 }
 0x2bf   :  { %v2093_v52 = vrot.slane %v1738_v48, 1 }
 0x2c0   :  { %v5526_v63 = vpack.i.bf16 %v1738_v48, %v7022_v14  ;;  %v1899_v27 = vrot.slane %v7022_v14, 7  ;;  %v2092_v36 = vrot.slane %v7022_v14, 1  ;;  %v2585_v22 = vsel %vm2559_vm7, %v6737_v43, %v5430_v15 }
 0x2c1   :  { %v2584_v56 = vsel %vm2559_vm7, %v2004_v34, %v5429_v18 }
 0x2c2   :  { %5527 = vrot.lane.b32.xlu0 %v5526_v63, %s5759_s25  ;;  %v7030_v39 = vsel %vm1821_vm5, %v1899_v27, %v1900_v20  ;;  %v2094_v62 = vsel %vm2014_vm6, %v2092_v36, %v2093_v52 }
 0x2c5   :  { %v5168_v49 = vpop.f32.mrf.mxu0 }
 0x2c6   :  { %v1610_v33 = vadd.f32 %v6841_v54, %v5168_v49 }
 0x2c7   :  { %v1604_v30 = vpop.f32.mrf.mxu0 }
 0x2c8   :  { %v1740_v8 = vmax.f32 %v1610_v33, 0.0  ;;  %v1605_v28 = vadd.f32 %v6841_v54, %v1604_v30 }
 0x2c9   :  { %v5433_v40 = vpop.permute.xlu1 %5432 }
 0x2ca   :  { %v2097_v53 = vrot.slane %v1740_v8, 1  ;;  %v1739_v42 = vmax.f32 %v1605_v28, 0.0  ;;  %v5435_v9 = vunpack.i.h.bf16 %v5433_v40  ;;  %v1904_v44 = vrot.slane %v1740_v8, 7 }
 0x2cb   :  { %v5434_v55 = vunpack.i.l.bf16 %v5433_v40 }
 0x2cc   :  { %v2154_v47 = vsel %vm2014_vm6, %v2097_v53, 0.0  ;;  %v5531_v41 = vpack.i.bf16 %v1740_v8, %v1739_v42  ;;  %v1902_v57 = vrot.slane %v1739_v42, 7  ;;  %v2095_v2 = vrot.slane %v1739_v42, 1  ;;  %v5438_v35 = vpop.permute.xlu0 %5437 }
 0x2cd   :  { %v2587_v5 = vsel %vm2559_vm7, %v6776_v12, %v5435_v9  ;;  %v2586_v43 = vsel %vm2559_vm7, %v6763_v51, %v5434_v55  ;;  %v5440_v37 = vunpack.i.h.bf16 %v5438_v35  ;;  %v5439_v11 = vunpack.i.l.bf16 %v5438_v35  ;;  %v5443_v50 = vpop.permute.xlu1 %5442 }
 0x2ce   :  { %v5445_v4 = vunpack.i.h.bf16 %v5443_v50  ;;  %v5444_v45 = vunpack.i.l.bf16 %v5443_v50  ;;  %5532 = vrot.lane.b32.xlu1 %v5531_v41, %s5759_s25  ;;  %v2096_v32 = vsel %vm2014_vm6, %v2093_v52, %v2095_v2  ;;  %v2098_v10 = vsel %vm2014_vm6, %v2095_v2, %v2097_v53 }
 0x2cf   :  { %v2650_v48 = vsel %vm2624_vm8, %v2585_v22, %v5440_v37  ;;  %v2649_v7 = vsel %vm2624_vm8, %v2584_v56, %v5439_v11  ;;  %v5536_v63 = vpack.i.bf16 %v2096_v32, %v2094_v62  ;;  %v5541_v12 = vpack.i.bf16 %v2154_v47, %v2098_v10 }
 0x2d0   :  { %v2701_v1 = vpack.c.bf16 %v2650_v48, %v2649_v7  ;;  %v2651_v51 = vsel %vm2624_vm8, %v2586_v43, %v5444_v45  ;;  %v2652_v49 = vsel %vm2624_vm8, %v2587_v5, %v5445_v4  ;;  %v7055_v15 = vsel %vm1821_vm5, %v1900_v20, %v1902_v57 }
 0x2d1   :  { %v2702_v33 = vpack.c.bf16 %v2652_v49, %v2651_v51  ;;  %5537 = vrot.lane.b32.xlu0 %v5536_v63, %s5760_s26  ;;  %v5171_v36 = vpop.f32.mrf.mxu0  ;;  %v7059_v18 = vsel %vm1821_vm5, %v1902_v57, %v1904_v44  ;;  %v7995_v57 = vrot.slane %v6784_v46, 7 }
 0x2d2   :  { %v1620_v30 = vadd.f32 %v6841_v54, %v5171_v36  ;;  %5223 = vmatprep.mubr.msk.bf16.mxu1 %vm2752_vm9, %v2701_v1  ;;  %5542 = vrot.lane.b32.xlu1 %v5541_v12, %s5760_s26 }
 0x2d3   :  { %5224 = vmatmul.mubr.msk.bf16.gmra.mxu1 %vm2752_vm9, %v2702_v33  ;;  %v1614_v8 = vpop.f32.mrf.mxu0  ;;  %v2005_v2 = vsel %vm1821_vm5, 0.0, %v7995_v57 }
 0x2d4   :  { %v1742_v28 = vmax.f32 %v1620_v30, 0.0  ;;  %v1615_v20 = vadd.f32 %v6841_v54, %v1614_v8 }
 0x2d5   :  { %v5448_v53 = vpop.permute.xlu0 %5447 }
 0x2d6   :  { %v7066_v23 = vmax.f32 %v1615_v20, 0.0  ;;  %v1907_v34 = vrot.slane %v1742_v28, 7  ;;  %v5450_v9 = vunpack.i.h.bf16 %v5448_v53  ;;  %v5449_v55 = vunpack.i.l.bf16 %v5448_v53 }
 0x2d7   :  { %v2100_v35 = vrot.slane %v1742_v28, 1 }
 0x2d8   :  { %v5546_v52 = vpack.i.bf16 %v1742_v28, %v7066_v23  ;;  %v1906_v40 = vrot.slane %v7066_v23, 7  ;;  %v2099_v44 = vrot.slane %v7066_v23, 1  ;;  %v2589_v43 = vsel %vm2559_vm7, %v6801_v3, %v5450_v9 }
 0x2d9   :  { %v2588_v4 = vsel %vm2559_vm7, %v2005_v2, %v5449_v55 }
 0x2da   :  { %5547 = vrot.lane.b32.xlu0 %v5546_v52, %s5759_s25  ;;  %v7074_v22 = vsel %vm1821_vm5, %v1906_v40, %v1907_v34  ;;  %v2101_v10 = vsel %vm2014_vm6, %v2099_v44, %v2100_v35 }
 0x2dd   :  { %v5174_v42 = vpop.f32.mrf.mxu0 }
 0x2de   :  { %v1630_v56 = vadd.f32 %v6841_v54, %v5174_v42 }
 0x2df   :  { %v1624_v62 = vpop.f32.mrf.mxu0 }
 0x2e0   :  { %v1744_v47 = vmax.f32 %v1630_v56, 0.0  ;;  %v1625_v41 = vadd.f32 %v6841_v54, %v1624_v62 }
 0x2e1   :  { %v5453_v5 = vpop.permute.xlu1 %5452 }
 0x2e2   :  { %v2104_v37 = vrot.slane %v1744_v47, 1  ;;  %v1743_v11 = vmax.f32 %v1625_v41, 0.0  ;;  %v5455_v50 = vunpack.i.h.bf16 %v5453_v5  ;;  %v1911_v45 = vrot.slane %v1744_v47, 7 }
 0x2e3   :  { %v5454_v32 = vunpack.i.l.bf16 %v5453_v5 }
 0x2e4   :  { %v2155_v48 = vsel %vm2014_vm6, %v2104_v37, 0.0  ;;  %v5551_v7 = vpack.i.bf16 %v1744_v47, %v1743_v11  ;;  %v1909_v46 = vrot.slane %v1743_v11, 7  ;;  %v2102_v63 = vrot.slane %v1743_v11, 1  ;;  %v5458_v12 = vpop.permute.xlu0 %5457 }
 0x2e5   :  { %v2591_v1 = vsel %vm2559_vm7, %v6854_v38, %v5455_v50  ;;  %v2590_v3 = vsel %vm2559_vm7, %v6851_v0, %v5454_v32  ;;  %v5460_v51 = vunpack.i.h.bf16 %v5458_v12  ;;  %v5459_v49 = vunpack.i.l.bf16 %v5458_v12  ;;  %v5463_v33 = vpop.permute.xlu1 %5462 }
 0x2e6   :  { %v5465_v36 = vunpack.i.h.bf16 %v5463_v33  ;;  %v5464_v30 = vunpack.i.l.bf16 %v5463_v33  ;;  %5552 = vrot.lane.b32.xlu1 %v5551_v7, %s5759_s25  ;;  %v2103_v8 = vsel %vm2014_vm6, %v2100_v35, %v2102_v63  ;;  %v2105_v28 = vsel %vm2014_vm6, %v2102_v63, %v2104_v37 }
 0x2e7   :  { %v2654_v20 = vsel %vm2624_vm8, %v2589_v43, %v5460_v51  ;;  %v2653_v52 = vsel %vm2624_vm8, %v2588_v4, %v5459_v49  ;;  %v5556_v53 = vpack.i.bf16 %v2103_v8, %v2101_v10  ;;  %v5561_v38 = vpack.i.bf16 %v2155_v48, %v2105_v28 }
 0x2e8   :  { %v2703_v42 = vpack.c.bf16 %v2654_v20, %v2653_v52  ;;  %v2655_v0 = vsel %vm2624_vm8, %v2590_v3, %v5464_v30  ;;  %v2656_v9 = vsel %vm2624_vm8, %v2591_v1, %v5465_v36  ;;  %v7099_v56 = vsel %vm1821_vm5, %v1907_v34, %v1909_v46 }
 0x2e9   :  { %v2704_v44 = vpack.c.bf16 %v2656_v9, %v2655_v0  ;;  %5557 = vrot.lane.b32.xlu0 %v5556_v53, %s5760_s26  ;;  %v5177_v55 = vpop.f32.mrf.mxu0  ;;  %v7103_v62 = vsel %vm1821_vm5, %v1909_v46, %v1911_v45  ;;  %v2006_v12 = vsel %vm1821_vm5, 0.0, %v1878_v31 }
 0x2ea   :  { %v1640_v47 = vadd.f32 %v6841_v54, %v5177_v55  ;;  %5227 = vmatprep.mubr.msk.bf16.mxu1 %vm2752_vm9, %v2703_v42  ;;  %5562 = vrot.lane.b32.xlu1 %v5561_v38, %s5760_s26 }
 0x2eb   :  { %5228 = vmatmul.mubr.msk.bf16.gmra.mxu1 %vm2752_vm9, %v2704_v44  ;;  %v1634_v41 = vpop.f32.mrf.mxu0 }
 0x2ec   :  { %v1746_v57 = vmax.f32 %v1640_v47, 0.0  ;;  %v1635_v34 = vadd.f32 %v6841_v54, %v1634_v41  ;;  %v5468_v11 = vpop.permute.xlu0 %5467 }
 0x2ed   :  { %v5470_v4 = vunpack.i.h.bf16 %v5468_v11  ;;  %v5469_v45 = vunpack.i.l.bf16 %v5468_v11 }
 0x2ee   :  { %v7110_v2 = vmax.f32 %v1635_v34, 0.0  ;;  %v1914_v35 = vrot.slane %v1746_v57, 7  ;;  %v2107_v1 = vrot.slane %v1746_v57, 1 }
 0x2ef   :  { %v2592_v49 = vsel %vm2559_vm7, %v2006_v12, %v5469_v45  ;;  %v2593_v33 = vsel %vm2559_vm7, %v6885_v26, %v5470_v4 }
 0x2f0   :  { %v5566_v5 = vpack.i.bf16 %v1746_v57, %v7110_v2  ;;  %v1913_v43 = vrot.slane %v7110_v2, 7  ;;  %v2106_v10 = vrot.slane %v7110_v2, 1 }
 0x2f2   :  { %5567 = vrot.lane.b32.xlu0 %v5566_v5, %s5759_s25  ;;  %v7118_v37 = vsel %vm1821_vm5, %v1913_v43, %v1914_v35  ;;  %v2108_v31 = vsel %vm2014_vm6, %v2106_v10, %v2107_v1 }
 0x2f5   :  { %v5180_v50 = vpop.f32.mrf.mxu0 }
 0x2f6   :  { %v1650_v32 = vadd.f32 %v6841_v54, %v5180_v50 }
 0x2f7   :  { %v1644_v48 = vpop.f32.mrf.mxu0 }
 0x2f8   :  { %v1748_v7 = vmax.f32 %v1650_v32, 0.0  ;;  %v1645_v46 = vadd.f32 %v6841_v54, %v1644_v48  ;;  %v5473_v63 = vpop.permute.xlu1 %5472 }
 0x2f9   :  { %v5475_v3 = vunpack.i.h.bf16 %v5473_v63  ;;  %v5474_v51 = vunpack.i.l.bf16 %v5473_v63 }
 0x2fa   :  { %v2111_v36 = vrot.slane %v1748_v7, 1  ;;  %v1747_v30 = vmax.f32 %v1645_v46, 0.0  ;;  %v1918_v8 = vrot.slane %v1748_v7, 7 }
 0x2fb   :  { %v2595_v28 = vsel %vm2559_vm7, %v6927_v17, %v5475_v3  ;;  %v2594_v20 = vsel %vm2559_vm7, %v6923_v6, %v5474_v51  ;;  %v5478_v24 = vpop.permute.xlu0 %5477 }
 0x2fc   :  { %v2156_v52 = vsel %vm2014_vm6, %v2111_v36, 0.0  ;;  %v5571_v53 = vpack.i.bf16 %v1748_v7, %v1747_v30  ;;  %v1916_v38 = vrot.slane %v1747_v30, 7  ;;  %v2109_v42 = vrot.slane %v1747_v30, 1  ;;  %v5483_v0 = vpop.permute.xlu1 %5482 }
 0x2fd   :  { %v5480_v9 = vunpack.i.h.bf16 %v5478_v24  ;;  %v5479_v26 = vunpack.i.l.bf16 %v5478_v24  ;;  %v5485_v44 = vunpack.i.h.bf16 %v5483_v0  ;;  %v5484_v55 = vunpack.i.l.bf16 %v5483_v0 }
 0x2fe   :  { %5572 = vrot.lane.b32.xlu1 %v5571_v53, %s5759_s25  ;;  %v2110_v17 = vsel %vm2014_vm6, %v2107_v1, %v2109_v42  ;;  %v2112_v47 = vsel %vm2014_vm6, %v2109_v42, %v2111_v36  ;;  %v7139_v6 = vsel %vm1821_vm5, %v1914_v35, %v1916_v38  ;;  %v7142_v41 = vsel %vm1821_vm5, %v1916_v38, %v1918_v8 }
 0x2ff   :  { %v2658_v57 = vsel %vm2624_vm8, %v2593_v33, %v5480_v9  ;;  %v2657_v34 = vsel %vm2624_vm8, %v2592_v49, %v5479_v26  ;;  %v2659_v5 = vsel %vm2624_vm8, %v2594_v20, %v5484_v55  ;;  %v2660_v11 = vsel %vm2624_vm8, %v2595_v28, %v5485_v44 }
 0x300   :  { %v2705_v50 = vpack.c.bf16 %v2658_v57, %v2657_v34  ;;  %v2706_v4 = vpack.c.bf16 %v2660_v11, %v2659_v5  ;;  %v5576_v45 = vpack.i.bf16 %v2110_v17, %v2108_v31  ;;  %v5581_v32 = vpack.i.bf16 %v2156_v52, %v2112_v47 }
 0x301   :  { %v5183_v10 = vpop.f32.mrf.mxu0  ;;  %v2007_v53 = vsel %vm1821_vm5, 0.0, %v1885_v19 }
 0x302   :  { %5577 = vrot.lane.b32.xlu0 %v5576_v45, %s5760_s26  ;;  %v1660_v35 = vadd.f32 %v6841_v54, %v5183_v10  ;;  %5231 = vmatprep.mubr.msk.bf16.mxu1 %vm2752_vm9, %v2705_v50 }
 0x303   :  { %5582 = vrot.lane.b32.xlu1 %v5581_v32, %s5760_s26  ;;  %5232 = vmatmul.mubr.msk.bf16.gmra.mxu1 %vm2752_vm9, %v2706_v4  ;;  %v1654_v48 = vpop.f32.mrf.mxu0 }
 0x304   :  { %v1750_v7 = vmax.f32 %v1660_v35, 0.0  ;;  %v1655_v46 = vadd.f32 %v6841_v54, %v1654_v48  ;;  %v5488_v49 = vpop.permute.xlu0 %5487 }
 0x305   :  { %v5490_v36 = vunpack.i.h.bf16 %v5488_v49  ;;  %v5489_v30 = vunpack.i.l.bf16 %v5488_v49 }
 0x306   :  { %v7154_v63 = vmax.f32 %v1655_v46, 0.0  ;;  %v1921_v12 = vrot.slane %v1750_v7, 7  ;;  %v2114_v38 = vrot.slane %v1750_v7, 1 }
 0x307   :  { %v2596_v9 = vsel %vm2559_vm7, %v2007_v53, %v5489_v30  ;;  %v2597_v26 = vsel %vm2559_vm7, %v6942_v16, %v5490_v36 }
 0x308   :  { %v5586_v1 = vpack.i.bf16 %v1750_v7, %v7154_v63  ;;  %v1920_v3 = vrot.slane %v7154_v63, 7  ;;  %v2113_v28 = vrot.slane %v7154_v63, 1 }
 0x30a   :  { %5587 = vrot.lane.b32.xlu0 %v5586_v1, %s5759_s25  ;;  %v7162_v51 = vsel %vm1821_vm5, %v1920_v3, %v1921_v12  ;;  %v2115_v19 = vsel %vm2014_vm6, %v2113_v28, %v2114_v38 }
 0x30d   :  { %v5186_v33 = vpop.f32.mrf.mxu0 }
 0x30e   :  { %v1670_v8 = vadd.f32 %v6841_v54, %v5186_v33 }
 0x30f   :  { %v1664_v20 = vpop.f32.mrf.mxu0 }
 0x310   :  { %v1752_v24 = vmax.f32 %v1670_v8, 0.0  ;;  %v1665_v31 = vadd.f32 %v6841_v54, %v1664_v20  ;;  %v5493_v52 = vpop.permute.xlu1 %5492 }
 0x311   :  { %v5495_v42 = vunpack.i.h.bf16 %v5493_v52  ;;  %v5494_v0 = vunpack.i.l.bf16 %v5493_v52 }
 0x312   :  { %v2118_v44 = vrot.slane %v1752_v24, 1  ;;  %v1751_v55 = vmax.f32 %v1665_v31, 0.0  ;;  %v1925_v17 = vrot.slane %v1752_v24, 7 }
 0x313   :  { %v2599_v47 = vsel %vm2559_vm7, %v6971_v13, %v5495_v42  ;;  %v2598_v57 = vsel %vm2559_vm7, %v6967_v60, %v5494_v0  ;;  %v5498_v59 = vpop.permute.xlu0 %5497 }
 0x314   :  { %v2157_v34 = vsel %vm2014_vm6, %v2118_v44, 0.0  ;;  %v5591_v5 = vpack.i.bf16 %v1752_v24, %v1751_v55  ;;  %v1923_v11 = vrot.slane %v1751_v55, 7  ;;  %v2116_v50 = vrot.slane %v1751_v55, 1  ;;  %v5503_v4 = vpop.permute.xlu1 %5502 }
 0x315   :  { %v5500_v45 = vunpack.i.h.bf16 %v5498_v59  ;;  %v5499_v16 = vunpack.i.l.bf16 %v5498_v59  ;;  %v5505_v32 = vunpack.i.h.bf16 %v5503_v4  ;;  %v5504_v10 = vunpack.i.l.bf16 %v5503_v4 }
 0x316   :  { %5592 = vrot.lane.b32.xlu1 %v5591_v5, %s5759_s25  ;;  %v2117_v13 = vsel %vm2014_vm6, %v2114_v38, %v2116_v50  ;;  %v2119_v35 = vsel %vm2014_vm6, %v2116_v50, %v2118_v44  ;;  %v7183_v60 = vsel %vm1821_vm5, %v1921_v12, %v1923_v11  ;;  %v7186_v48 = vsel %vm1821_vm5, %v1923_v11, %v1925_v17 }
 0x317   :  { %v2662_v7 = vsel %vm2624_vm8, %v2597_v26, %v5500_v45  ;;  %v2661_v46 = vsel %vm2624_vm8, %v2596_v9, %v5499_v16  ;;  %v2663_v1 = vsel %vm2624_vm8, %v2598_v57, %v5504_v10  ;;  %v2664_v49 = vsel %vm2624_vm8, %v2599_v47, %v5505_v32 }
 0x318   :  { %v2707_v33 = vpack.c.bf16 %v2662_v7, %v2661_v46  ;;  %v2708_v36 = vpack.c.bf16 %v2664_v49, %v2663_v1  ;;  %v5596_v30 = vpack.i.bf16 %v2117_v13, %v2115_v19  ;;  %v5601_v8 = vpack.i.bf16 %v2157_v34, %v2119_v35 }
 0x319   :  { %v5189_v28 = vpop.f32.mrf.mxu0  ;;  %v2008_v5 = vsel %vm1821_vm5, 0.0, %v1892_v58 }
 0x31a   :  { %5597 = vrot.lane.b32.xlu0 %v5596_v30, %s5760_s26  ;;  %v1680_v12 = vadd.f32 %v6841_v54, %v5189_v28  ;;  %5235 = vmatprep.mubr.msk.bf16.mxu1 %vm2752_vm9, %v2707_v33 }
 0x31b   :  { %5602 = vrot.lane.b32.xlu1 %v5601_v8, %s5760_s26  ;;  %5236 = vmatmul.mubr.msk.bf16.gmra.mxu1 %vm2752_vm9, %v2708_v36  ;;  %v1674_v20 = vpop.f32.mrf.mxu0 }
 0x31c   :  { %v1754_v24 = vmax.f32 %v1680_v12, 0.0  ;;  %v1675_v31 = vadd.f32 %v6841_v54, %v1674_v20  ;;  %v5508_v9 = vpop.permute.xlu0 %5507 }
 0x31d   :  { %v5510_v44 = vunpack.i.h.bf16 %v5508_v9  ;;  %v5509_v55 = vunpack.i.l.bf16 %v5508_v9 }
 0x31e   :  { %v7198_v52 = vmax.f32 %v1675_v31, 0.0  ;;  %v1928_v53 = vrot.slane %v1754_v24, 7  ;;  %v2121_v11 = vrot.slane %v1754_v24, 1 }
 0x31f   :  { %v2600_v45 = vsel %vm2559_vm7, %v2008_v5, %v5509_v55  ;;  %v2601_v16 = vsel %vm2559_vm7, %v6986_v61, %v5510_v44 }
 0x320   :  { %v5606_v38 = vpack.i.bf16 %v1754_v24, %v7198_v52  ;;  %v1927_v42 = vrot.slane %v7198_v52, 7  ;;  %v2120_v47 = vrot.slane %v7198_v52, 1 }
 0x322   :  { %5607 = vrot.lane.b32.xlu0 %v5606_v38, %s5759_s25  ;;  %v7206_v0 = vsel %vm1821_vm5, %v1927_v42, %v1928_v53  ;;  %v2122_v58 = vsel %vm2014_vm6, %v2120_v47, %v2121_v11 }
 0x325   :  { %v5192_v26 = vpop.f32.mrf.mxu0 }
 0x326   :  { %v1690_v17 = vadd.f32 %v6841_v54, %v5192_v26 }
 0x327   :  { %v1684_v57 = vpop.f32.mrf.mxu0 }
 0x328   :  { %v1756_v59 = vmax.f32 %v1690_v17, 0.0  ;;  %v1685_v19 = vadd.f32 %v6841_v54, %v1684_v57  ;;  %v5513_v34 = vpop.permute.xlu1 %5512 }
 0x329   :  { %v5515_v50 = vunpack.i.h.bf16 %v5513_v34  ;;  %v5514_v4 = vunpack.i.l.bf16 %v5513_v34 }
 0x32a   :  { %v2125_v32 = vrot.slane %v1756_v59, 1  ;;  %v1755_v10 = vmax.f32 %v1685_v19, 0.0  ;;  %v1932_v13 = vrot.slane %v1756_v59, 7 }
 0x32b   :  { %v2603_v35 = vsel %vm2559_vm7, %v7015_v21, %v5515_v50  ;;  %v2602_v54 = vsel %vm2559_vm7, %v7011_v25, %v5514_v4  ;;  %v5518_v29 = vpop.permute.xlu0 %5517 }
 0x32c   :  { %v2158_v7 = vsel %vm2014_vm6, %v2125_v32, 0.0  ;;  %v5611_v46 = vpack.i.bf16 %v1756_v59, %v1755_v10  ;;  %v1930_v1 = vrot.slane %v1755_v10, 7  ;;  %v2123_v49 = vrot.slane %v1755_v10, 1  ;;  %v5523_v33 = vpop.permute.xlu1 %5522 }
 0x32d   :  { %v5520_v36 = vunpack.i.h.bf16 %v5518_v29  ;;  %v5519_v61 = vunpack.i.l.bf16 %v5518_v29  ;;  %v5525_v30 = vunpack.i.h.bf16 %v5523_v33  ;;  %v5524_v8 = vunpack.i.l.bf16 %v5523_v33 }
 0x32e   :  { %5612 = vrot.lane.b32.xlu1 %v5611_v46, %s5759_s25  ;;  %v2124_v21 = vsel %vm2014_vm6, %v2121_v11, %v2123_v49  ;;  %v2126_v28 = vsel %vm2014_vm6, %v2123_v49, %v2125_v32  ;;  %v7227_v25 = vsel %vm1821_vm5, %v1928_v53, %v1930_v1  ;;  %v7230_v12 = vsel %vm1821_vm5, %v1930_v1, %v1932_v13  ;;  %v7239_v53 = vld [vmem:[%s7984_s4] ss:$0 sm:$0xff] }
 0x32f   :  { %v2666_v20 = vsel %vm2624_vm8, %v2601_v16, %v5520_v36  ;;  %v2665_v24 = vsel %vm2624_vm8, %v2600_v45, %v5519_v61  ;;  %v2667_v31 = vsel %vm2624_vm8, %v2602_v54, %v5524_v8  ;;  %v2668_v38 = vsel %vm2624_vm8, %v2603_v35, %v5525_v30 }
 0x330   :  { %v2709_v9 = vpack.c.bf16 %v2666_v20, %v2665_v24  ;;  %v2710_v26 = vpack.c.bf16 %v2668_v38, %v2667_v31  ;;  %v5616_v44 = vpack.i.bf16 %v2124_v21, %v2122_v58  ;;  %v5621_v55 = vpack.i.bf16 %v2158_v7, %v2126_v28 }
 0x332   :  { %5617 = vrot.lane.b32.xlu0 %v5616_v44, %s5760_s26  ;;  %v5201_v17 = vpop.f32.mrf.mxu1  ;;  %5239 = vmatprep.mubr.msk.bf16.mxu1 %vm2752_vm9, %v2709_v9 }
 0x333   :  { %5622 = vrot.lane.b32.xlu1 %v5621_v55, %s5760_s26  ;;  %5240 = vmatmul.mubr.msk.bf16.gmra.mxu1 %vm2752_vm9, %v2710_v26  ;;  %v2892_v47 = vadd.f32 %v5201_v17, %v7239_v53  ;;  %v2009_v26 = vsel %vm1821_vm5, 0.0, %v1899_v27 }
 0x334   :  { %v2883_v57 = vpop.f32.mrf.mxu1  ;;  %v5528_v32 = vpop.permute.xlu0 %5527 }
 0x335   :  { %v2884_v59 = vadd.f32 %v7239_v53, %v2883_v57  ;;  %v3140_v34 = vmax.f32 %v2892_v47, 0.0  ;;  %v5530_v1 = vunpack.i.h.bf16 %v5528_v32  ;;  %v5529_v49 = vunpack.i.l.bf16 %v5528_v32 }
 0x336   :  { %v5202_v19 = vpop.f32.mrf.mxu1 }
 0x337   :  { %v2895_v5 = vadd.f32 %v5202_v19, %v7239_v53  ;;  %v3138_v50 = vmax.f32 %v2884_v59, 0.0  ;;  %v3269_v35 = vrot.slane %v3140_v34, 1  ;;  %v2604_v17 = vsel %vm2559_vm7, %v2009_v26, %v5529_v49 }
 0x338   :  { %v2886_v11 = vpop.f32.mrf.mxu1  ;;  %v2605_v47 = vsel %vm2559_vm7, %v7030_v39, %v5530_v1 }
 0x339   :  { %v2887_v4 = vadd.f32 %v7239_v53, %v2886_v11  ;;  %v3141_v45 = vmax.f32 %v2895_v5, 0.0  ;;  %v3266_v58 = vrot.slane %v3138_v50, 1 }
 0x33a   :  { %v5205_v16 = vpop.f32.mrf.mxu1 }
 0x33b   :  { %v3139_v10 = vmax.f32 %v2887_v4, 0.0  ;;  %v2908_v13 = vadd.f32 %v5205_v16, %v7239_v53  ;;  %v3271_v54 = vrot.slane %v3141_v45, 1 }
 0x33c   :  { %v2899_v29 = vpop.f32.mrf.mxu1 }
 0x33d   :  { %v3267_v7 = vrot.slane %v3139_v10, 1  ;;  %v2900_v46 = vadd.f32 %v7239_v53, %v2899_v29  ;;  %v3272_v33 = vsel %vm2014_vm6, %v3269_v35, %v3271_v54  ;;  %v3144_v21 = vmax.f32 %v2908_v13, 0.0 }
 0x33e   :  { %v5206_v36 = vpop.f32.mrf.mxu1  ;;  %v3460_v61 = vmax.f32 %v3140_v34, %v3272_v33 }
 0x33f   :  { %v3268_v30 = vsel %vm2014_vm6, %v3266_v58, %v3267_v7  ;;  %v3270_v8 = vsel %vm2014_vm6, %v3267_v7, %v3269_v35  ;;  %v3142_v24 = vmax.f32 %v2900_v46, 0.0  ;;  %v2911_v31 = vadd.f32 %v5206_v36, %v7239_v53 }
 0x340   :  { %v3458_v28 = vmax.f32 %v3138_v50, %v3268_v30  ;;  %v3459_v20 = vmax.f32 %v3139_v10, %v3270_v8  ;;  %v2902_v38 = vpop.f32.mrf.mxu1  ;;  %v5533_v9 = vpop.permute.xlu1 %5532  ;;  %3524 = vst.msk [vmem:[#allocation2 + $0x10] sm:$0xff] %vm2624_vm8, %v3460_v61  ;;  %v3277_v14 = vrot.slane %v3144_v21, 1 }
 0x341   :  { %v2903_v44 = vadd.f32 %v7239_v53, %v2902_v38  ;;  %v5535_v55 = vunpack.i.h.bf16 %v5533_v9  ;;  %v3273_v57 = vrot.slane %v3142_v24, 1  ;;  %v3145_v59 = vmax.f32 %v2911_v31, 0.0 }
 0x342   :  { %3522 = vst.msk [vmem:[#allocation2] sm:$0xff] %vm2624_vm8, %v3458_v28  ;;  %3523 = vst.msk [vmem:[#allocation2 + $0x8] sm:$0xff] %vm2624_vm8, %v3459_v20  ;;  %v5209_v19 = vpop.f32.mrf.mxu1  ;;  %v5534_v27 = vunpack.i.l.bf16 %v5533_v9 }
 0x343   :  { %v3143_v34 = vmax.f32 %v2903_v44, 0.0  ;;  %v2924_v5 = vadd.f32 %v5209_v19, %v7239_v53  ;;  %v5538_v11 = vpop.permute.xlu0 %5537  ;;  %v3274_v50 = vsel %vm2014_vm6, %v3271_v54, %v3273_v57  ;;  %v3279_v4 = vrot.slane %v3145_v59, 1 }
 0x344   :  { %v5540_v16 = vunpack.i.h.bf16 %v5538_v11  ;;  %v5539_v32 = vunpack.i.l.bf16 %v5538_v11  ;;  %v2915_v10 = vpop.f32.mrf.mxu1  ;;  %v5543_v39 = vpop.permute.xlu1 %5542  ;;  %v3461_v13 = vmax.f32 %v3141_v45, %v3274_v50  ;;  %v2607_v29 = vsel %vm2559_vm7, %v7059_v18, %v5535_v55 }
 0x345   :  { %v3275_v35 = vrot.slane %v3143_v34, 1  ;;  %v2916_v58 = vadd.f32 %v7239_v53, %v2915_v10  ;;  %v3280_v7 = vsel %vm2014_vm6, %v3277_v14, %v3279_v4  ;;  %v5545_v49 = vunpack.i.h.bf16 %v5543_v39 }
 0x346   :  { %v2670_v46 = vsel %vm2624_vm8, %v2605_v47, %v5540_v16  ;;  %v2669_v1 = vsel %vm2624_vm8, %v2604_v17, %v5539_v32  ;;  %v5210_v54 = vpop.f32.mrf.mxu1  ;;  %3525 = vst.msk [vmem:[#allocation2 + $0x18] sm:$0xff] %vm2624_vm8, %v3461_v13  ;;  %v3464_v33 = vmax.f32 %v3144_v21, %v3280_v7  ;;  %v3148_v61 = vmax.f32 %v2924_v5, 0.0 }
 0x347   :  { %v3276_v36 = vsel %vm2014_vm6, %v3273_v57, %v3275_v35  ;;  %v3278_v45 = vsel %vm2014_vm6, %v3275_v35, %v3277_v14  ;;  %v2711_v8 = vpack.c.bf16 %v2670_v46, %v2669_v1  ;;  %v3146_v28 = vmax.f32 %v2916_v58, 0.0 }
 0x348   :  { %v3462_v30 = vmax.f32 %v3142_v24, %v3276_v36  ;;  %v3463_v18 = vmax.f32 %v3143_v34, %v3278_v45  ;;  %v2918_v20 = vpop.f32.mrf.mxu1  ;;  %3528 = vst.msk [vmem:[#allocation2 + $0x30] sm:$0xff] %vm2624_vm8, %v3464_v33  ;;  %v5544_v31 = vunpack.i.l.bf16 %v5543_v39  ;;  %v2672_v38 = vsel %vm2624_vm8, %v2607_v29, %v5545_v49 }
 0x349   :  { %v2927_v9 = vadd.f32 %v5210_v54, %v7239_v53  ;;  %v2919_v26 = vadd.f32 %v7239_v53, %v2918_v20  ;;  %v2606_v21 = vsel %vm2559_vm7, %v7055_v15, %v5534_v27  ;;  %v3281_v24 = vrot.slane %v3146_v28, 1  ;;  %5243 = vmatprep.mubr.msk.bf16.mxu1 %vm2752_vm9, %v2711_v8 }
 0x34a   :  { %3526 = vst.msk [vmem:[#allocation2 + $0x20] sm:$0xff] %vm2624_vm8, %v3462_v30  ;;  %3527 = vst.msk [vmem:[#allocation2 + $0x28] sm:$0xff] %vm2624_vm8, %v3463_v18  ;;  %v2671_v44 = vsel %vm2624_vm8, %v2606_v21, %v5544_v31  ;;  %v3285_v57 = vrot.slane %v3148_v61, 1 }
 0x34b   :  { %v3149_v55 = vmax.f32 %v2927_v9, 0.0  ;;  %v3147_v17 = vmax.f32 %v2919_v26, 0.0  ;;  %v5213_v47 = vpop.f32.mrf.mxu1  ;;  %v3282_v19 = vsel %vm2014_vm6, %v3279_v4, %v3281_v24  ;;  %v2712_v14 = vpack.c.bf16 %v2672_v38, %v2671_v44 }
 0x34c   :  { %v3465_v34 = vmax.f32 %v3145_v59, %v3282_v19  ;;  %v2940_v50 = vadd.f32 %v5213_v47, %v7239_v53  ;;  %v2010_v47 = vsel %vm1821_vm5, 0.0, %v1906_v40 }
 0x34d   :  { %v3287_v5 = vrot.slane %v3149_v55, 1  ;;  %v3283_v11 = vrot.slane %v3147_v17, 1  ;;  %v2931_v16 = vpop.f32.mrf.mxu1  ;;  %5244 = vmatmul.mubr.msk.bf16.gmra.mxu1 %vm2752_vm9, %v2712_v14 }
 0x34e   :  { %v2932_v15 = vadd.f32 %v7239_v53, %v2931_v16  ;;  %3529 = vst.msk [vmem:[#allocation2 + $0x38] sm:$0xff] %vm2624_vm8, %v3465_v34  ;;  %v3152_v35 = vmax.f32 %v2940_v50, 0.0 }
 0x34f   :  { %v3288_v27 = vsel %vm2014_vm6, %v3285_v57, %v3287_v5  ;;  %v3284_v32 = vsel %vm2014_vm6, %v3281_v24, %v3283_v11  ;;  %v3286_v10 = vsel %vm2014_vm6, %v3283_v11, %v3285_v57  ;;  %v5214_v4 = vpop.f32.mrf.mxu1 }
 0x350   :  { %v3468_v39 = vmax.f32 %v3148_v61, %v3288_v27  ;;  %v3466_v59 = vmax.f32 %v3146_v28, %v3284_v32  ;;  %v3467_v13 = vmax.f32 %v3147_v17, %v3286_v10  ;;  %v3150_v29 = vmax.f32 %v2932_v15, 0.0  ;;  %v5548_v61 = vpop.permute.xlu0 %5547 }
 0x351   :  { %v7295_v58 = vadd.f32 %v5214_v4, %v7239_v53  ;;  %v2934_v7 = vpop.f32.mrf.mxu1  ;;  %v3293_v33 = vrot.slane %v3152_v35, 1  ;;  %v5550_v9 = vunpack.i.h.bf16 %v5548_v61  ;;  %v5549_v26 = vunpack.i.l.bf16 %v5548_v61 }
 0x352   :  { %3532 = vst.msk [vmem:[#allocation2 + $0x50] sm:$0xff] %vm2624_vm8, %v3468_v39  ;;  %3530 = vst.msk [vmem:[#allocation2 + $0x40] sm:$0xff] %vm2624_vm8, %v3466_v59  ;;  %v2935_v46 = vadd.f32 %v7239_v53, %v2934_v7  ;;  %v3289_v1 = vrot.slane %v3150_v29, 1 }
 0x353   :  { %3531 = vst.msk [vmem:[#allocation2 + $0x48] sm:$0xff] %vm2624_vm8, %v3467_v13  ;;  %v3153_v49 = vmax.f32 %v7295_v58, 0.0  ;;  %v2608_v34 = vsel %vm2559_vm7, %v2010_v47, %v5549_v26 }
 0x354   :  { %v3151_v54 = vmax.f32 %v2935_v46, 0.0  ;;  %v3290_v36 = vsel %vm2014_vm6, %v3287_v5, %v3289_v1  ;;  %v2609_v5 = vsel %vm2559_vm7, %v7074_v22, %v5550_v9 }
 0x355   :  { %v3295_v45 = vrot.slane %v3153_v49, 1  ;;  %v3469_v30 = vmax.f32 %v3149_v55, %v3290_v36 }
 0x356   :  { %v3291_v18 = vrot.slane %v3151_v54, 1 }
 0x357   :  { %v3296_v8 = vsel %vm2014_vm6, %v3293_v33, %v3295_v45  ;;  %3533 = vst.msk [vmem:[#allocation2 + $0x58] sm:$0xff] %vm2624_vm8, %v3469_v30 }
 0x358   :  { %v3472_v28 = vmax.f32 %v3152_v35, %v3296_v8  ;;  %v3292_v20 = vsel %vm2014_vm6, %v3289_v1, %v3291_v18  ;;  %v3294_v31 = vsel %vm2014_vm6, %v3291_v18, %v3293_v33  ;;  %v5553_v38 = vpop.permute.xlu1 %5552 }
 0x359   :  { %v3470_v21 = vmax.f32 %v3150_v29, %v3292_v20  ;;  %v3471_v24 = vmax.f32 %v3151_v54, %v3294_v31  ;;  %v5555_v44 = vunpack.i.h.bf16 %v5553_v38  ;;  %v5554_v17 = vunpack.i.l.bf16 %v5553_v38 }
 0x35a   :  { %3536 = vst.msk [vmem:[#allocation2 + $0x70] sm:$0xff] %vm2624_vm8, %v3472_v28 }
 0x35b   :  { %3534 = vst.msk [vmem:[#allocation2 + $0x60] sm:$0xff] %vm2624_vm8, %v3470_v21  ;;  %3535 = vst.msk [vmem:[#allocation2 + $0x68] sm:$0xff] %vm2624_vm8, %v3471_v24  ;;  %v5558_v55 = vpop.permute.xlu0 %5557  ;;  %v2611_v16 = vsel %vm2559_vm7, %v7103_v62, %v5555_v44  ;;  %v2610_v15 = vsel %vm2559_vm7, %v7099_v56, %v5554_v17 }
 0x35c   :  { %v5560_v57 = vunpack.i.h.bf16 %v5558_v55  ;;  %v5559_v19 = vunpack.i.l.bf16 %v5558_v55  ;;  %v5563_v14 = vpop.permute.xlu1 %5562  ;;  %v2011_v55 = vsel %vm1821_vm5, 0.0, %v1913_v43 }
 0x35d   :  { %v5565_v11 = vunpack.i.h.bf16 %v5563_v14  ;;  %v5564_v50 = vunpack.i.l.bf16 %v5563_v14 }
 0x35e   :  { %v2674_v23 = vsel %vm2624_vm8, %v2609_v5, %v5560_v57  ;;  %v2673_v40 = vsel %vm2624_vm8, %v2608_v34, %v5559_v19 }
 0x35f   :  { %v2713_v27 = vpack.c.bf16 %v2674_v23, %v2673_v40  ;;  %v2675_v32 = vsel %vm2624_vm8, %v2610_v15, %v5564_v50  ;;  %v2676_v10 = vsel %vm2624_vm8, %v2611_v16, %v5565_v11 }
 0x360   :  { %v2714_v4 = vpack.c.bf16 %v2676_v10, %v2675_v32 }
 0x361   :  { %5247 = vmatprep.mubr.msk.bf16.mxu1 %vm2752_vm9, %v2713_v27 }
 0x362   :  { %5248 = vmatmul.mubr.msk.bf16.gmra.mxu1 %vm2752_vm9, %v2714_v4 }
 0x363   :  { %v5217_v22 = vpop.f32.mrf.mxu1 }
 0x364   :  { %v2956_v62 = vadd.f32 %v5217_v22, %v7239_v53  ;;  %v5568_v28 = vpop.permute.xlu0 %5567 }
 0x365   :  { %v2947_v39 = vpop.f32.mrf.mxu1  ;;  %v5569_v24 = vunpack.i.l.bf16 %v5568_v28 }
 0x366   :  { %v2948_v56 = vadd.f32 %v7239_v53, %v2947_v39  ;;  %v3156_v13 = vmax.f32 %v2956_v62, 0.0 }
 0x367   :  { %v5218_v59 = vpop.f32.mrf.mxu1  ;;  %v2612_v14 = vsel %vm2559_vm7, %v2011_v55, %v5569_v24 }
 0x368   :  { %v3154_v35 = vmax.f32 %v2948_v56, 0.0  ;;  %v7329_v29 = vadd.f32 %v5218_v59, %v7239_v53  ;;  %v3301_v54 = vrot.slane %v3156_v13, 1 }
 0x369   :  { %v2950_v58 = vpop.f32.mrf.mxu1 }
 0x36a   :  { %v3297_v7 = vrot.slane %v3154_v35, 1  ;;  %v3157_v46 = vmax.f32 %v7329_v29, 0.0  ;;  %v2951_v1 = vadd.f32 %v7239_v53, %v2950_v58 }
 0x36c   :  { %v3298_v33 = vsel %vm2014_vm6, %v3295_v45, %v3297_v7  ;;  %v3303_v36 = vrot.slane %v3157_v46, 1  ;;  %v3155_v61 = vmax.f32 %v2951_v1, 0.0  ;;  %v5570_v45 = vunpack.i.h.bf16 %v5568_v28 }
 0x36d   :  { %v3473_v30 = vmax.f32 %v3153_v49, %v3298_v33 }
 0x36e   :  { %v3304_v18 = vsel %vm2014_vm6, %v3301_v54, %v3303_v36  ;;  %v3299_v8 = vrot.slane %v3155_v61, 1  ;;  %v2613_v34 = vsel %vm2559_vm7, %v7118_v37, %v5570_v45 }
 0x36f   :  { %3537 = vst.msk [vmem:[#allocation2 + $0x78] sm:$0xff] %vm2624_vm8, %v3473_v30  ;;  %v3476_v20 = vmax.f32 %v3156_v13, %v3304_v18 }
 0x370   :  { %v3300_v31 = vsel %vm2014_vm6, %v3297_v7, %v3299_v8  ;;  %v3302_v38 = vsel %vm2014_vm6, %v3299_v8, %v3301_v54  ;;  %v5573_v9 = vpop.permute.xlu1 %5572 }
 0x371   :  { %3540 = vst.msk [vmem:[#allocation2 + $0x90] sm:$0xff] %vm2624_vm8, %v3476_v20  ;;  %v3474_v26 = vmax.f32 %v3154_v35, %v3300_v31  ;;  %v3475_v21 = vmax.f32 %v3155_v61, %v3302_v38  ;;  %v5575_v49 = vunpack.i.h.bf16 %v5573_v9  ;;  %v5574_v44 = vunpack.i.l.bf16 %v5573_v9 }
 0x373   :  { %3538 = vst.msk [vmem:[#allocation2 + $0x80] sm:$0xff] %vm2624_vm8, %v3474_v26  ;;  %3539 = vst.msk [vmem:[#allocation2 + $0x88] sm:$0xff] %vm2624_vm8, %v3475_v21  ;;  %v2615_v50 = vsel %vm2559_vm7, %v7142_v41, %v5575_v49  ;;  %v2614_v16 = vsel %vm2559_vm7, %v7139_v6, %v5574_v44  ;;  %v2012_v21 = vsel %vm1821_vm5, 0.0, %v1920_v3 }
 0x374   :  { %v5578_v17 = vpop.permute.xlu0 %5577 }
 0x375   :  { %v5580_v47 = vunpack.i.h.bf16 %v5578_v17  ;;  %v5579_v57 = vunpack.i.l.bf16 %v5578_v17  ;;  %v5583_v19 = vpop.permute.xlu1 %5582 }
 0x376   :  { %v5585_v5 = vunpack.i.h.bf16 %v5583_v19  ;;  %v5584_v11 = vunpack.i.l.bf16 %v5583_v19 }
 0x377   :  { %v2678_v2 = vsel %vm2624_vm8, %v2613_v34, %v5580_v47  ;;  %v2677_v43 = vsel %vm2624_vm8, %v2612_v14, %v5579_v57 }
 0x378   :  { %v2715_v15 = vpack.c.bf16 %v2678_v2, %v2677_v43  ;;  %v2679_v23 = vsel %vm2624_vm8, %v2614_v16, %v5584_v11  ;;  %v2680_v40 = vsel %vm2624_vm8, %v2615_v50, %v5585_v5 }
 0x379   :  { %v2716_v27 = vpack.c.bf16 %v2680_v40, %v2679_v23 }
 0x37a   :  { %5251 = vmatprep.mubr.msk.bf16.mxu1 %vm2752_vm9, %v2715_v15 }
 0x37b   :  { %v5221_v37 = vpop.f32.mrf.mxu1  ;;  %5252 = vmatmul.mubr.msk.bf16.gmra.mxu1 %vm2752_vm9, %v2716_v27 }
 0x37c   :  { %v2972_v41 = vadd.f32 %v5221_v37, %v7239_v53  ;;  %v5588_v61 = vpop.permute.xlu0 %5587 }
 0x37d   :  { %v2963_v32 = vpop.f32.mrf.mxu1  ;;  %v5589_v38 = vunpack.i.l.bf16 %v5588_v61 }
 0x37e   :  { %v2964_v6 = vadd.f32 %v7239_v53, %v2963_v32  ;;  %v3160_v4 = vmax.f32 %v2972_v41, 0.0 }
 0x37f   :  { %v5222_v10 = vpop.f32.mrf.mxu1  ;;  %v2616_v44 = vsel %vm2559_vm7, %v2012_v21, %v5589_v38 }
 0x380   :  { %v3158_v22 = vmax.f32 %v2964_v6, 0.0  ;;  %v7360_v62 = vadd.f32 %v5222_v10, %v7239_v53  ;;  %v3309_v35 = vrot.slane %v3160_v4, 1 }
 0x381   :  { %v2966_v39 = vpop.f32.mrf.mxu1 }
 0x382   :  { %v3305_v56 = vrot.slane %v3158_v22, 1  ;;  %v3161_v59 = vmax.f32 %v7360_v62, 0.0  ;;  %v2967_v13 = vadd.f32 %v7239_v53, %v2966_v39 }
 0x384   :  { %v3306_v29 = vsel %vm2014_vm6, %v3303_v36, %v3305_v56  ;;  %v3311_v58 = vrot.slane %v3161_v59, 1  ;;  %v3159_v7 = vmax.f32 %v2967_v13, 0.0  ;;  %v5590_v36 = vunpack.i.h.bf16 %v5588_v61 }
 0x385   :  { %v3477_v1 = vmax.f32 %v3157_v46, %v3306_v29 }
 0x386   :  { %v3312_v54 = vsel %vm2014_vm6, %v3309_v35, %v3311_v58  ;;  %v3307_v33 = vrot.slane %v3159_v7, 1  ;;  %v2617_v17 = vsel %vm2559_vm7, %v7162_v51, %v5590_v36 }
 0x387   :  { %3541 = vst.msk [vmem:[#allocation2 + $0x98] sm:$0xff] %vm2624_vm8, %v3477_v1  ;;  %v3480_v30 = vmax.f32 %v3160_v4, %v3312_v54 }
 0x388   :  { %v3308_v18 = vsel %vm2014_vm6, %v3305_v56, %v3307_v33  ;;  %v3310_v8 = vsel %vm2014_vm6, %v3307_v33, %v3309_v35  ;;  %v5593_v28 = vpop.permute.xlu1 %5592 }
 0x389   :  { %3544 = vst.msk [vmem:[#allocation2 + $0xb0] sm:$0xff] %vm2624_vm8, %v3480_v30  ;;  %v3478_v20 = vmax.f32 %v3158_v22, %v3308_v18  ;;  %v3479_v31 = vmax.f32 %v3159_v7, %v3310_v8  ;;  %v5595_v46 = vunpack.i.h.bf16 %v5593_v28  ;;  %v5594_v9 = vunpack.i.l.bf16 %v5593_v28 }
 0x38a   :  { %v2013_v30 = vsel %vm1821_vm5, 0.0, %v1927_v42 }
 0x38b   :  { %3542 = vst.msk [vmem:[#allocation2 + $0xa0] sm:$0xff] %vm2624_vm8, %v3478_v20  ;;  %3543 = vst.msk [vmem:[#allocation2 + $0xa8] sm:$0xff] %vm2624_vm8, %v3479_v31  ;;  %v2619_v57 = vsel %vm2559_vm7, %v7186_v48, %v5595_v46  ;;  %v2618_v19 = vsel %vm2559_vm7, %v7183_v60, %v5594_v9 }
 0x38c   :  { %v5598_v26 = vpop.permute.xlu0 %5597 }
 0x38d   :  { %v5600_v45 = vunpack.i.h.bf16 %v5598_v26  ;;  %v5599_v24 = vunpack.i.l.bf16 %v5598_v26  ;;  %v5603_v49 = vpop.permute.xlu1 %5602 }
 0x38e   :  { %v5605_v55 = vunpack.i.h.bf16 %v5603_v49  ;;  %v5604_v47 = vunpack.i.l.bf16 %v5603_v49 }
 0x38f   :  { %v2682_v63 = vsel %vm2624_vm8, %v2617_v17, %v5600_v45  ;;  %v2681_v3 = vsel %vm2624_vm8, %v2616_v44, %v5599_v24 }
 0x390   :  { %v2717_v14 = vpack.c.bf16 %v2682_v63, %v2681_v3  ;;  %v2683_v34 = vsel %vm2624_vm8, %v2618_v19, %v5604_v47  ;;  %v2684_v5 = vsel %vm2624_vm8, %v2619_v57, %v5605_v55 }
 0x391   :  { %v2718_v11 = vpack.c.bf16 %v2684_v5, %v2683_v34 }
 0x392   :  { %5255 = vmatprep.mubr.msk.bf16.mxu1 %vm2752_vm9, %v2717_v14 }
 0x393   :  { %v5225_v51 = vpop.f32.mrf.mxu1  ;;  %5256 = vmatmul.mubr.msk.bf16.gmra.mxu1 %vm2752_vm9, %v2718_v11 }
 0x394   :  { %v2988_v48 = vadd.f32 %v5225_v51, %v7239_v53  ;;  %v5608_v39 = vpop.permute.xlu0 %5607 }
 0x395   :  { %v2979_v50 = vpop.f32.mrf.mxu1  ;;  %v5609_v54 = vunpack.i.l.bf16 %v5608_v39 }
 0x396   :  { %v2980_v60 = vadd.f32 %v7239_v53, %v2979_v50  ;;  %v3164_v2 = vmax.f32 %v2988_v48, 0.0 }
 0x397   :  { %v5226_v16 = vpop.f32.mrf.mxu1  ;;  %v2620_v20 = vsel %vm2559_vm7, %v2013_v30, %v5609_v54 }
 0x398   :  { %v3162_v43 = vmax.f32 %v2980_v60, 0.0  ;;  %v7391_v15 = vadd.f32 %v5226_v16, %v7239_v53  ;;  %v3317_v41 = vrot.slane %v3164_v2, 1 }
 0x399   :  { %v2982_v23 = vpop.f32.mrf.mxu1 }
 0x39a   :  { %v3313_v40 = vrot.slane %v3162_v43, 1  ;;  %v3165_v27 = vmax.f32 %v7391_v15, 0.0  ;;  %v2983_v37 = vadd.f32 %v7239_v53, %v2982_v23 }
 0x39c   :  { %v3314_v32 = vsel %vm2014_vm6, %v3311_v58, %v3313_v40  ;;  %v3319_v6 = vrot.slane %v3165_v27, 1  ;;  %v3163_v10 = vmax.f32 %v2983_v37, 0.0  ;;  %v5610_v58 = vunpack.i.h.bf16 %v5608_v39 }
 0x39d   :  { %v3481_v4 = vmax.f32 %v3161_v59, %v3314_v32 }
 0x39e   :  { %v3320_v22 = vsel %vm2014_vm6, %v3317_v41, %v3319_v6  ;;  %v3315_v62 = vrot.slane %v3163_v10, 1  ;;  %v2621_v31 = vsel %vm2559_vm7, %v7206_v0, %v5610_v58 }
 0x39f   :  { %3545 = vst.msk [vmem:[#allocation2 + $0xb8] sm:$0xff] %vm2624_vm8, %v3481_v4  ;;  %v3484_v56 = vmax.f32 %v3164_v2, %v3320_v22 }
 0x3a0   :  { %v3316_v13 = vsel %vm2014_vm6, %v3313_v40, %v3315_v62  ;;  %v3318_v35 = vsel %vm2014_vm6, %v3315_v62, %v3317_v41  ;;  %v5613_v29 = vpop.permute.xlu1 %5612 }
 0x3a1   :  { %3548 = vst.msk [vmem:[#allocation2 + $0xd0] sm:$0xff] %vm2624_vm8, %v3484_v56  ;;  %v3482_v7 = vmax.f32 %v3162_v43, %v3316_v13  ;;  %v3483_v1 = vmax.f32 %v3163_v10, %v3318_v35  ;;  %v5615_v59 = vunpack.i.h.bf16 %v5613_v29  ;;  %v5614_v33 = vunpack.i.l.bf16 %v5613_v29 }
 0x3a3   :  { %3546 = vst.msk [vmem:[#allocation2 + $0xc0] sm:$0xff] %vm2624_vm8, %v3482_v7  ;;  %3547 = vst.msk [vmem:[#allocation2 + $0xc8] sm:$0xff] %vm2624_vm8, %v3483_v1  ;;  %v2623_v46 = vsel %vm2559_vm7, %v7230_v12, %v5615_v59  ;;  %v2622_v9 = vsel %vm2559_vm7, %v7227_v25, %v5614_v33 }
 0x3a4   :  { %v5618_v61 = vpop.permute.xlu0 %5617 }
 0x3a5   :  { %v5620_v18 = vunpack.i.h.bf16 %v5618_v61  ;;  %v5619_v8 = vunpack.i.l.bf16 %v5618_v61  ;;  %v5623_v28 = vpop.permute.xlu1 %5622 }
 0x3a6   :  { %v5625_v36 = vunpack.i.h.bf16 %v5623_v28  ;;  %v5624_v38 = vunpack.i.l.bf16 %v5623_v28 }
 0x3a7   :  { %v2686_v52 = vsel %vm2624_vm8, %v2621_v31, %v5620_v18  ;;  %v2685_v42 = vsel %vm2624_vm8, %v2620_v20, %v5619_v8 }
 0x3a8   :  { %v2719_v26 = vpack.c.bf16 %v2686_v52, %v2685_v42  ;;  %v2687_v21 = vsel %vm2624_vm8, %v2622_v9, %v5624_v38  ;;  %v2688_v45 = vsel %vm2624_vm8, %v2623_v46, %v5625_v36 }
 0x3a9   :  { %v2720_v24 = vpack.c.bf16 %v2688_v45, %v2687_v21 }
 0x3aa   :  { %5259 = vmatprep.mubr.msk.bf16.mxu1 %vm2752_vm9, %v2719_v26 }
 0x3ab   :  { %v5229_v0 = vpop.f32.mrf.mxu1  ;;  %5260 = vmatmul.mubr.msk.bf16.gmra.mxu1 %vm2752_vm9, %v2720_v24 }
 0x3ac   :  { %v3004_v12 = vadd.f32 %v5229_v0, %v7239_v53 }
 0x3ad   :  { %v2995_v49 = vpop.f32.mrf.mxu1 }
 0x3ae   :  { %v2996_v25 = vadd.f32 %v7239_v53, %v2995_v49  ;;  %v3168_v17 = vmax.f32 %v3004_v12, 0.0 }
 0x3af   :  { %v5230_v44 = vpop.f32.mrf.mxu1 }
 0x3b0   :  { %v3166_v55 = vmax.f32 %v2996_v25, 0.0  ;;  %v3007_v47 = vadd.f32 %v5230_v44, %v7239_v53  ;;  %v3325_v14 = vrot.slane %v3168_v17, 1 }
 0x3b1   :  { %v2998_v57 = vpop.f32.mrf.mxu1 }
 0x3b2   :  { %v3321_v19 = vrot.slane %v3166_v55, 1  ;;  %v3169_v63 = vmax.f32 %v3007_v47, 0.0  ;;  %v2999_v3 = vadd.f32 %v7239_v53, %v2998_v57 }
 0x3b4   :  { %v3322_v34 = vsel %vm2014_vm6, %v3319_v6, %v3321_v19  ;;  %v3327_v5 = vrot.slane %v3169_v63, 1  ;;  %v3167_v11 = vmax.f32 %v2999_v3, 0.0 }
 0x3b5   :  { %v3485_v51 = vmax.f32 %v3165_v27, %v3322_v34 }
 0x3b6   :  { %v3328_v48 = vsel %vm2014_vm6, %v3325_v14, %v3327_v5  ;;  %v3323_v50 = vrot.slane %v3167_v11, 1 }
 0x3b7   :  { %3549 = vst.msk [vmem:[#allocation2 + $0xd8] sm:$0xff] %vm2624_vm8, %v3485_v51  ;;  %v3488_v60 = vmax.f32 %v3168_v17, %v3328_v48 }
 0x3b8   :  { %v3324_v16 = vsel %vm2014_vm6, %v3321_v19, %v3323_v50  ;;  %v3326_v2 = vsel %vm2014_vm6, %v3323_v50, %v3325_v14 }
 0x3b9   :  { %3552 = vst.msk [vmem:[#allocation2 + $0xf0] sm:$0xff] %vm2624_vm8, %v3488_v60  ;;  %v3486_v43 = vmax.f32 %v3166_v55, %v3324_v16  ;;  %v3487_v15 = vmax.f32 %v3167_v11, %v3326_v2 }
 0x3bb   :  { %3550 = vst.msk [vmem:[#allocation2 + $0xe0] sm:$0xff] %vm2624_vm8, %v3486_v43  ;;  %3551 = vst.msk [vmem:[#allocation2 + $0xe8] sm:$0xff] %vm2624_vm8, %v3487_v15 }
 0x3c3   :  { %v5233_v23 = vpop.f32.mrf.mxu1 }
 0x3c4   :  { %v3020_v40 = vadd.f32 %v5233_v23, %v7239_v53 }
 0x3c5   :  { %v3011_v27 = vpop.f32.mrf.mxu1 }
 0x3c6   :  { %v3012_v37 = vadd.f32 %v7239_v53, %v3011_v27  ;;  %v3172_v32 = vmax.f32 %v3020_v40, 0.0 }
 0x3c7   :  { %v5234_v41 = vpop.f32.mrf.mxu1 }
 0x3c8   :  { %v3170_v6 = vmax.f32 %v3012_v37, 0.0  ;;  %v3023_v10 = vadd.f32 %v5234_v41, %v7239_v53  ;;  %v3333_v56 = vrot.slane %v3172_v32, 1 }
 0x3c9   :  { %v3014_v4 = vpop.f32.mrf.mxu1 }
 0x3ca   :  { %v3329_v22 = vrot.slane %v3170_v6, 1  ;;  %v3173_v62 = vmax.f32 %v3023_v10, 0.0  ;;  %v3015_v39 = vadd.f32 %v7239_v53, %v3014_v4 }
 0x3cc   :  { %v3330_v13 = vsel %vm2014_vm6, %v3327_v5, %v3329_v22  ;;  %v3335_v35 = vrot.slane %v3173_v62, 1  ;;  %v3171_v29 = vmax.f32 %v3015_v39, 0.0  ;;  %v5691_v39 = vld [vmem:[%s7985_s5 + $0xf8] sm:$0xff]  }
 0x3cd   :  { %v3489_v7 = vmax.f32 %v3169_v63, %v3330_v13  ;;  %5059 = vmatprep.subr.bf16.mxu1 %v5691_v39 }
 0x3ce   :  { %v3336_v1 = vsel %vm2014_vm6, %v3333_v56, %v3335_v35  ;;  %v3331_v58 = vrot.slane %v3171_v29, 1 }
 0x3cf   :  { %3553 = vst.msk [vmem:[#allocation2 + $0xf8] sm:$0xff] %vm2624_vm8, %v3489_v7  ;;  %v3492_v54 = vmax.f32 %v3172_v32, %v3336_v1  ;;  %v5692_v7 = vld [vmem:[%s7985_s5 + $0xb8] sm:$0xff]  }
 0x3d0   :  { %v3332_v59 = vsel %vm2014_vm6, %v3329_v22, %v3331_v58  ;;  %v3334_v33 = vsel %vm2014_vm6, %v3331_v58, %v3333_v56  ;;  %v5689_v22 = vld [vmem:[%s7985_s5 + $0x78] sm:$0xff]   ;;  %5060 = vmatpush3.bf16.msra.mxu1 %v5692_v7 }
 0x3d1   :  { %3556 = vst.msk [vmem:[#allocation2 + $0x110] sm:$0xff] %vm2624_vm8, %v3492_v54  ;;  %v3490_v61 = vmax.f32 %v3170_v6, %v3332_v59  ;;  %v3491_v30 = vmax.f32 %v3171_v29, %v3334_v33  ;;  %5037 = vmatprep.subr.bf16.mxu0 %v5689_v22 }
 0x3d3   :  { %3554 = vst.msk [vmem:[#allocation2 + $0x100] sm:$0xff] %vm2624_vm8, %v3490_v61  ;;  %3555 = vst.msk [vmem:[#allocation2 + $0x108] sm:$0xff] %vm2624_vm8, %v3491_v30 }
 0x3db   :  { %v5237_v18 = vpop.f32.mrf.mxu1 }
 0x3dc   :  { %v3036_v8 = vadd.f32 %v5237_v18, %v7239_v53 }
 0x3dd   :  { %v3027_v28 = vpop.f32.mrf.mxu1 }
 0x3de   :  { %v3028_v20 = vadd.f32 %v7239_v53, %v3027_v28  ;;  %v3176_v36 = vmax.f32 %v3036_v8, 0.0 }
 0x3df   :  { %v5238_v31 = vpop.f32.mrf.mxu1 }
 0x3e0   :  { %v3174_v38 = vmax.f32 %v3028_v20, 0.0  ;;  %v3039_v46 = vadd.f32 %v5238_v31, %v7239_v53  ;;  %v3341_v21 = vrot.slane %v3176_v36, 1 }
 0x3e1   :  { %v3030_v9 = vpop.f32.mrf.mxu1 }
 0x3e2   :  { %v3337_v52 = vrot.slane %v3174_v38, 1  ;;  %v3177_v42 = vmax.f32 %v3039_v46, 0.0  ;;  %v3031_v26 = vadd.f32 %v7239_v53, %v3030_v9  ;;  %v5693_v9 = vld [vmem:[%s7985_s5 + $0x70] sm:$0xff]  }
 0x3e4   :  { %v3338_v45 = vsel %vm2014_vm6, %v3335_v35, %v3337_v52  ;;  %v3343_v24 = vrot.slane %v3177_v42, 1  ;;  %v3175_v0 = vmax.f32 %v3031_v26, 0.0 }
 0x3e5   :  { %v3493_v12 = vmax.f32 %v3173_v62, %v3338_v45  ;;  %v5690_v62 = vld [vmem:[%s7985_s5 + $0x38] sm:$0xff]   ;;  %v5697_v45 = vld [vmem:[%s7985_s5 + $0x68] sm:$0xff]  }
 0x3e6   :  { %v3344_v49 = vsel %vm2014_vm6, %v3341_v21, %v3343_v24  ;;  %v3339_v25 = vrot.slane %v3175_v0, 1  ;;  %5038 = vmatpush3.bf16.msra.mxu0 %v5690_v62 }
 0x3e7   :  { %3557 = vst.msk [vmem:[#allocation2 + $0x118] sm:$0xff] %vm2624_vm8, %v3493_v12  ;;  %v3496_v44 = vmax.f32 %v3176_v36, %v3344_v49  ;;  %5039 = vmatprep.subr.bf16.mxu0 %v5693_v9  ;;  %v5699_v12 = vld [vmem:[%s7985_s5 + $0xe8] sm:$0xff]  }
 0x3e8   :  { %v3340_v17 = vsel %vm2014_vm6, %v3337_v52, %v3339_v25  ;;  %v3342_v55 = vsel %vm2014_vm6, %v3339_v25, %v3341_v21  ;;  %v5694_v52 = vld [vmem:[%s7985_s5 + $0x30] sm:$0xff]  }
 0x3e9   :  { %3560 = vst.msk [vmem:[#allocation2 + $0x130] sm:$0xff] %vm2624_vm8, %v3496_v44  ;;  %v3494_v47 = vmax.f32 %v3174_v38, %v3340_v17  ;;  %v3495_v57 = vmax.f32 %v3175_v0, %v3342_v55  ;;  %v5696_v21 = vld [vmem:[%s7985_s5 + $0xb0] sm:$0xff]   ;;  %v5698_v44 = vld [vmem:[%s7985_s5 + $0x28] sm:$0xff]   ;;  %v5701_v55 = vld [vmem:[%s7985_s5 + $0x60] sm:$0xff]  }
 0x3ea   :  { %5040 = vmatpush3.bf16.msra.mxu0 %v5694_v52  ;;  %v5700_v17 = vld [vmem:[%s7985_s5 + $0xa8] sm:$0xff]  }
 0x3eb   :  { %3558 = vst.msk [vmem:[#allocation2 + $0x120] sm:$0xff] %vm2624_vm8, %v3494_v47  ;;  %3559 = vst.msk [vmem:[#allocation2 + $0x128] sm:$0xff] %vm2624_vm8, %v3495_v57  ;;  %5041 = vmatprep.subr.bf16.mxu0 %v5697_v45  ;;  %v5703_v47 = vld [vmem:[%s7985_s5 + $0xe0] sm:$0xff]  }
 0x3ec   :  { %v5702_v57 = vld [vmem:[%s7985_s5 + $0x20] sm:$0xff]  }
 0x3ee   :  { %5042 = vmatpush3.bf16.msra.mxu0 %v5698_v44 }
 0x3ef   :  { %5043 = vmatprep.subr.bf16.mxu0 %v5701_v55 }
 0x3f2   :  { %5044 = vmatpush3.bf16.msra.mxu0 %v5702_v57 }
 0x3f3   :  { %v5241_v19 = vpop.f32.mrf.mxu1 }
 0x3f4   :  { %v3052_v63 = vadd.f32 %v5241_v19, %v7239_v53  ;;  %v5704_v19 = vld [vmem:[%s7985_s5 + $0xa0] sm:$0xff]  }
 0x3f5   :  { %v3043_v3 = vpop.f32.mrf.mxu1 }
 0x3f6   :  { %v3044_v14 = vadd.f32 %v7239_v53, %v3043_v3  ;;  %v3180_v5 = vmax.f32 %v3052_v63, 0.0  ;;  %v5705_v63 = vld [vmem:[%s7985_s5 + $0x58] sm:$0xff]  }
 0x3f7   :  { %v5242_v34 = vpop.f32.mrf.mxu1  ;;  %v5707_v3 = vld [vmem:[%s7985_s5 + $0xd8] sm:$0xff]   ;;  %5045 = vmatprep.subr.bf16.mxu0 %v5705_v63 }
 0x3f8   :  { %v3178_v11 = vmax.f32 %v3044_v14, 0.0  ;;  %v3055_v51 = vadd.f32 %v5242_v34, %v7239_v53  ;;  %v3349_v2 = vrot.slane %v3180_v5, 1 }
 0x3f9   :  { %v3046_v48 = vpop.f32.mrf.mxu1 }
 0x3fa   :  { %v3345_v50 = vrot.slane %v3178_v11, 1  ;;  %v3181_v60 = vmax.f32 %v3055_v51, 0.0  ;;  %v3047_v16 = vadd.f32 %v7239_v53, %v3046_v48  ;;  %v5708_v51 = vld [vmem:[%s7985_s5 + $0x98] sm:$0xff]  }
 0x3fc   :  { %v3346_v43 = vsel %vm2014_vm6, %v3343_v24, %v3345_v50  ;;  %v3351_v15 = vrot.slane %v3181_v60, 1  ;;  %v3179_v23 = vmax.f32 %v3047_v16, 0.0 }
 0x3fd   :  { %v3497_v40 = vmax.f32 %v3177_v42, %v3346_v43  ;;  %v5695_v42 = vld [vmem:[%s7985_s5 + $0xf0] sm:$0xff]  }
 0x3fe   :  { %v3352_v27 = vsel %vm2014_vm6, %v3349_v2, %v3351_v15  ;;  %v3347_v37 = vrot.slane %v3179_v23, 1  ;;  %5061 = vmatprep.subr.bf16.mxu1 %v5695_v42 }
 0x3ff   :  { %3561 = vst.msk [vmem:[#allocation2 + $0x138] sm:$0xff] %vm2624_vm8, %v3497_v40  ;;  %v3500_v41 = vmax.f32 %v3180_v5, %v3352_v27  ;;  %5062 = vmatpush3.bf16.msra.mxu1 %v5696_v21  ;;  %v5710_v40 = vld [vmem:[%s7985_s5 + $0x10] sm:$0xff]  }
 0x400   :  { %v3348_v32 = vsel %vm2014_vm6, %v3345_v50, %v3347_v37  ;;  %v3350_v6 = vsel %vm2014_vm6, %v3347_v37, %v3349_v2  ;;  %5063 = vmatprep.subr.bf16.mxu1 %v5699_v12  ;;  %v5709_v50 = vld [vmem:[%s7985_s5 + $0x50] sm:$0xff]  }
 0x401   :  { %3564 = vst.msk [vmem:[#allocation2 + $0x150] sm:$0xff] %vm2624_vm8, %v3500_v41  ;;  %v3498_v10 = vmax.f32 %v3178_v11, %v3348_v32  ;;  %v3499_v4 = vmax.f32 %v3179_v23, %v3350_v6  ;;  %v5706_v11 = vld [vmem:[%s7985_s5 + $0x18] sm:$0xff]   ;;  %v5712_v27 = vld [vmem:[%s7985_s5 + $0x90] sm:$0xff]   ;;  %v7565_v32 = vld [vmem:[%s7984_s4] ss:$0 sm:$0xff] }
 0x402   :  { %5046 = vmatpush3.bf16.msra.mxu0 %v5706_v11  ;;  %v5713_v6 = vld [vmem:[%s7985_s5 + $0x48] sm:$0xff]  }
 0x403   :  { %3562 = vst.msk [vmem:[#allocation2 + $0x140] sm:$0xff] %vm2624_vm8, %v3498_v10  ;;  %3563 = vst.msk [vmem:[#allocation2 + $0x148] sm:$0xff] %vm2624_vm8, %v3499_v4  ;;  %5064 = vmatpush3.bf16.msra.mxu1 %v5700_v17  ;;  %5047 = vmatprep.subr.bf16.mxu0 %v5709_v50  ;;  %v5715_v10 = vld [vmem:[%s7985_s5 + $0xc8] sm:$0xff]  }
 0x404   :  { %5065 = vmatprep.subr.bf16.mxu1 %v5703_v47 }
 0x406   :  { %5048 = vmatpush3.bf16.msra.mxu0 %v5710_v40  ;;  %v7623_v40 = vld [vmem:[#allocation2 + $0x2] ss:$32 sm:$0x2] }
 0x407   :  { %5066 = vmatpush3.bf16.msra.mxu1 %v5704_v19  ;;  %5049 = vmatprep.subr.bf16.mxu0 %v5713_v6  ;;  %v7630_v6 = vld [vmem:[#allocation2 + $0x1c] ss:$32 sm:$0x2] }
 0x408   :  { %5067 = vmatprep.subr.bf16.mxu1 %v5707_v3 }
 0x40b   :  { %5068 = vmatpush3.bf16.msra.mxu1 %v5708_v51  ;;  %v7611_v51 = vld [vmem:[#allocation2 + $0x12] ss:$32 sm:$0x2] }
 0x40d   :  { %v5245_v56 = vpop.f32.mrf.mxu1 }
 0x40e   :  { %v3068_v13 = vadd.f32 %v5245_v56, %v7239_v53 }
 0x40f   :  { %v3059_v35 = vpop.f32.mrf.mxu1 }
 0x410   :  { %v3060_v29 = vadd.f32 %v7239_v53, %v3059_v35  ;;  %v3184_v58 = vmax.f32 %v3068_v13, 0.0  ;;  %v5714_v13 = vld [vmem:[%s7985_s5 + $0x8] sm:$0xff]  }
 0x411   :  { %v5246_v1 = vpop.f32.mrf.mxu1  ;;  %v5716_v35 = vld [vmem:[%s7985_s5 + $0x88] sm:$0xff]   ;;  %5050 = vmatpush3.bf16.msra.mxu0 %v5714_v13  ;;  %v3877_v13 = vld [vmem:[#allocation2 + $0x12] ss:$32 sm:$0x4] }
 0x412   :  { %v3182_v54 = vmax.f32 %v3060_v29, 0.0  ;;  %v7482_v59 = vadd.f32 %v5246_v1, %v7239_v53  ;;  %v3357_v8 = vrot.slane %v3184_v58, 1 }
 0x413   :  { %v3062_v33 = vpop.f32.mrf.mxu1 }
 0x414   :  { %v3353_v61 = vrot.slane %v3182_v54, 1  ;;  %v3185_v30 = vmax.f32 %v7482_v59, 0.0  ;;  %v3063_v18 = vadd.f32 %v7239_v53, %v3062_v33 }
 0x416   :  { %v3354_v28 = vsel %vm2014_vm6, %v3351_v15, %v3353_v61  ;;  %v7489_v20 = vrot.slane %v3185_v30, 1  ;;  %v3183_v31 = vmax.f32 %v3063_v18, 0.0 }
 0x417   :  { %v3501_v36 = vmax.f32 %v3181_v60, %v3354_v28  ;;  %v5711_v60 = vld [vmem:[%s7985_s5 + $0xd0] sm:$0xff]  }
 0x418   :  { %v3360_v38 = vsel %vm2014_vm6, %v3357_v8, %v7489_v20  ;;  %v3355_v46 = vrot.slane %v3183_v31, 1  ;;  %5069 = vmatprep.subr.bf16.mxu1 %v5711_v60 }
 0x419   :  { %3565 = vst.msk [vmem:[#allocation2 + $0x158] sm:$0xff] %vm2624_vm8, %v3501_v36  ;;  %v3504_v26 = vmax.f32 %v3184_v58, %v3360_v38  ;;  %5070 = vmatpush3.bf16.msra.mxu1 %v5712_v27 }
 0x41a   :  { %v3356_v24 = vsel %vm2014_vm6, %v3353_v61, %v3355_v46  ;;  %v3358_v0 = vsel %vm2014_vm6, %v3355_v46, %v3357_v8  ;;  %5071 = vmatprep.subr.bf16.mxu1 %v5715_v10  ;;  %v3746_v10 = vld [vmem:[#allocation2 + $0xa] ss:$32 sm:$0x1] }
 0x41b   :  { %3568 = vst.msk [vmem:[#allocation2 + $0x170] sm:$0xff] %vm2624_vm8, %v3504_v26  ;;  %v3502_v49 = vmax.f32 %v3182_v54, %v3356_v24  ;;  %v3503_v25 = vmax.f32 %v3183_v31, %v3358_v0 }
 0x41d   :  { %3566 = vst.msk [vmem:[#allocation2 + $0x160] sm:$0xff] %vm2624_vm8, %v3502_v49  ;;  %3567 = vst.msk [vmem:[#allocation2 + $0x168] sm:$0xff] %vm2624_vm8, %v3503_v25  ;;  %5072 = vmatpush3.bf16.msra.mxu1 %v5716_v35  ;;  %v3749_v35 = vld [vmem:[#allocation2 + $0xa] ss:$32 sm:$0x4] }
 0x422   :  { %v5249_v14 = vpop.f32.mrf.mxu1 }
 0x423   :  { %v3084_v34 = vadd.f32 %v5249_v14, %v7239_v53 }
 0x424   :  { %v3075_v5 = vpop.f32.mrf.mxu1 }
 0x425   :  { %v3076_v48 = vadd.f32 %v7239_v53, %v3075_v5  ;;  %v3188_v2 = vmax.f32 %v3084_v34, 0.0 }
 0x426   :  { %v5250_v16 = vpop.f32.mrf.mxu1 }
 0x427   :  { %v3186_v43 = vmax.f32 %v3076_v48, 0.0  ;;  %v3087_v15 = vadd.f32 %v5250_v16, %v7239_v53  ;;  %v3365_v4 = vrot.slane %v3188_v2, 1  ;;  %v7615_v16 = vld [vmem:[#allocation2 + $0xa] ss:$32 sm:$0x2] }
 0x428   :  { %v3078_v23 = vpop.f32.mrf.mxu1 }
 0x429   :  { %v3361_v37 = vrot.slane %v3186_v43, 1  ;;  %v3189_v41 = vmax.f32 %v3087_v15, 0.0  ;;  %v3079_v53 = vadd.f32 %v7565_v32, %v3078_v23  ;;  %v3874_v15 = vld [vmem:[#allocation2 + $0x12] ss:$32 sm:$0x1] }
 0x42a   :  { %v7621_v23 = vld [vmem:[#allocation2 + $0xe] ss:$32 sm:$0x2] }
 0x42b   :  { %v3362_v22 = vsel %vm2014_vm6, %v7489_v20, %v3361_v37  ;;  %v3367_v62 = vrot.slane %v3189_v41, 1  ;;  %v3187_v39 = vmax.f32 %v3079_v53, 0.0 }
 0x42c   :  { %v3505_v56 = vmax.f32 %v3185_v30, %v3362_v22  ;;  %v3778_v22 = vld [vmem:[#allocation2 + $0xc] ss:$32 sm:$0x1] }
 0x42d   :  { %v3368_v29 = vsel %vm2014_vm6, %v3365_v4, %v3367_v62  ;;  %v3363_v7 = vrot.slane %v3187_v39, 1 }
 0x42e   :  { %3569 = vst.msk [vmem:[#allocation2 + $0x178] sm:$0xff] %vm2624_vm8, %v3505_v56  ;;  %v3508_v1 = vmax.f32 %v3188_v2, %v3368_v29  ;;  %v7617_v2 = vld [vmem:[#allocation2 + $0x14] ss:$32 sm:$0x2] }
 0x42f   :  { %v3364_v58 = vsel %vm2014_vm6, %v3361_v37, %v3363_v7  ;;  %v3366_v54 = vsel %vm2014_vm6, %v3363_v7, %v3365_v4  ;;  %v3906_v4 = vld [vmem:[#allocation2 + $0x14] ss:$32 sm:$0x1]  ;;  %v7634_v56 = vld [vmem:[#allocation2 + $0x1a] ss:$32 sm:$0x2] }
 0x430   :  { %3572 = vst.msk [vmem:[#allocation2 + $0x190] sm:$0xff] %vm2624_vm8, %v3508_v1  ;;  %v3506_v59 = vmax.f32 %v3186_v43, %v3364_v58  ;;  %v3507_v33 = vmax.f32 %v3187_v39, %v3366_v54  ;;  %v7619_v43 = vld [vmem:[#allocation2 + $0xc] ss:$32 sm:$0x2] }
 0x431   :  { %v7636_v29 = vld [vmem:[#allocation2 + $0xe] ss:$32 sm:$0x1]  ;;  %v7638_v7 = vld [vmem:[#allocation2 + $0x2] ss:$32 sm:$0x1] }
 0x432   :  { %3570 = vst.msk [vmem:[#allocation2 + $0x180] sm:$0xff] %vm2624_vm8, %v3506_v59  ;;  %3571 = vst.msk [vmem:[#allocation2 + $0x188] sm:$0xff] %vm2624_vm8, %v3507_v33  ;;  %v7640_v1 = vld [vmem:[#allocation2 + $0x4] ss:$32 sm:$0x2]  ;;  %v3876_v33 = vor.u32 %v7611_v51, %v3874_v15 }
 0x433   :  { %v7644_v59 = vld [vmem:[#allocation2 + $0x1c] ss:$32 sm:$0x1]  ;;  %v7668_v51 = vld [vmem:[#allocation2 + $0xc] ss:$32 sm:$0x8] }
 0x434   :  { %v7676_v15 = vld [vmem:[#allocation2 + $0x6] ss:$32 sm:$0x8] }
 0x43b   :  { %v5253_v61 = vpop.f32.mrf.mxu1 }
 0x43c   :  { %v3100_v30 = vadd.f32 %v7565_v32, %v5253_v61  ;;  %v3909_v61 = vld [vmem:[#allocation2 + $0x14] ss:$32 sm:$0x4] }
 0x43d   :  { %v3091_v18 = vpop.f32.mrf.mxu1 }
 0x43e   :  { %v3092_v8 = vadd.f32 %v7565_v32, %v3091_v18  ;;  %v3192_v20 = vmax.f32 %v3100_v30, 0.0  ;;  %v3781_v30 = vld [vmem:[#allocation2 + $0xc] ss:$32 sm:$0x4] }
 0x43f   :  { %v5254_v28 = vpop.f32.mrf.mxu1  ;;  %v3682_v18 = vld [vmem:[#allocation2 + $0x6] ss:$32 sm:$0x1] }
 0x440   :  { %v3190_v31 = vmax.f32 %v3092_v8, 0.0  ;;  %v3103_v36 = vadd.f32 %v7565_v32, %v5254_v28  ;;  %v3373_v42 = vrot.slane %v3192_v20, 1  ;;  %v7647_v8 = vld [vmem:[#allocation2 + $0x1e] ss:$32 sm:$0x2] }
 0x441   :  { %v3094_v38 = vpop.f32.mrf.mxu1 }
 0x442   :  { %v3369_v46 = vrot.slane %v3190_v31, 1  ;;  %v3193_v9 = vmax.f32 %v3103_v36, 0.0  ;;  %v3095_v52 = vadd.f32 %v7565_v32, %v3094_v38  ;;  %v3908_v36 = vor.u32 %v7617_v2, %v3906_v4 }
 0x443   :  { %v3780_v38 = vor.u32 %v7619_v43, %v3778_v22  ;;  %v7672_v43 = vld [vmem:[#allocation2 + $0xe] ss:$32 sm:$0x8]  ;;  %v4071_v22 = vld [vmem:[#allocation2 + $0x1e] ss:$32 sm:$0x8] }
 0x444   :  { %v3370_v26 = vsel %vm2014_vm6, %v3367_v62, %v3369_v46  ;;  %v3375_v21 = vrot.slane %v3193_v9, 1  ;;  %v3191_v45 = vmax.f32 %v3095_v52, 0.0  ;;  %v7632_v62 = vld [vmem:[#allocation2 + $0x6] ss:$32 sm:$0x2] }
 0x445   :  { %v3509_v24 = vmax.f32 %v3189_v41, %v3370_v26  ;;  %v3685_v52 = vld [vmem:[#allocation2 + $0x6] ss:$32 sm:$0x4]  ;;  %v3653_v26 = vld [vmem:[#allocation2 + $0x4] ss:$32 sm:$0x4] }
 0x446   :  { %v3376_v0 = vsel %vm2014_vm6, %v3373_v42, %v3375_v21  ;;  %v3371_v12 = vrot.slane %v3191_v45, 1 }
 0x447   :  { %3573 = vst.msk [vmem:[#allocation2 + $0x198] sm:$0xff] %vm2624_vm8, %v3509_v24  ;;  %v3512_v49 = vmax.f32 %v3192_v20, %v3376_v0  ;;  %v4002_v20 = vld [vmem:[#allocation2 + $0x1a] ss:$32 sm:$0x1] }
 0x448   :  { %v3372_v25 = vsel %vm2014_vm6, %v3369_v46, %v3371_v12  ;;  %v3374_v44 = vsel %vm2014_vm6, %v3371_v12, %v3373_v42  ;;  %v3813_v46 = vld [vmem:[#allocation2 + $0xe] ss:$32 sm:$0x4]  ;;  %v3650_v42 = vld [vmem:[#allocation2 + $0x4] ss:$32 sm:$0x1] }
 0x449   :  { %3576 = vst.msk [vmem:[#allocation2 + $0x1b0] sm:$0xff] %vm2624_vm8, %v3512_v49  ;;  %v3510_v17 = vmax.f32 %v3190_v31, %v3372_v25  ;;  %v3511_v55 = vmax.f32 %v3191_v45, %v3374_v44  ;;  %v3748_v31 = vor.u32 %v7615_v16, %v3746_v10  ;;  %v4037_v0 = vld [vmem:[#allocation2 + $0x1c] ss:$32 sm:$0x4]  ;;  %v3812_v49 = vor.u32 %v7621_v23, %v7636_v29 }
 0x44a   :  { %v4005_v12 = vld [vmem:[#allocation2 + $0x1a] ss:$32 sm:$0x4]  ;;  %v3620_v25 = vor.u32 %v7623_v40, %v7638_v7  ;;  %v4066_v44 = vld [vmem:[#allocation2 + $0x1e] ss:$32 sm:$0x1]  ;;  %v3878_v16 = vor.u32 %v3877_v13, %v3876_v33  ;;  %v3652_v23 = vor.u32 %v7640_v1, %v3650_v42 }
 0x44b   :  { %3574 = vst.msk [vmem:[#allocation2 + $0x1a0] sm:$0xff] %vm2624_vm8, %v3510_v17  ;;  %3575 = vst.msk [vmem:[#allocation2 + $0x1a8] sm:$0xff] %vm2624_vm8, %v3511_v55  ;;  %v4069_v17 = vld [vmem:[#allocation2 + $0x1e] ss:$32 sm:$0x4]  ;;  %v3750_v2 = vor.u32 %v3749_v35, %v3748_v31  ;;  %v4068_v4 = vor.u32 %v7647_v8, %v4066_v44  ;;  %v3814_v35 = vor.u32 %v3813_v46, %v3812_v49 }
 0x44c   :  { %v3938_v55 = vld [vmem:[#allocation2 + $0x16] ss:$32 sm:$0x1]  ;;  %v7685_v10 = vld [vmem:[#allocation2 + $0x4] ss:$32 sm:$0x8]  ;;  %v3654_v1 = vor.u32 %v3653_v26, %v3652_v23 }
 0x44d   :  { %v3943_v40 = vld [vmem:[#allocation2 + $0x16] ss:$32 sm:$0x8]  ;;  %v3913_v13 = vld [vmem:[#allocation2 + $0x14] ss:$32 sm:$0x10] }
 0x44e   :  { %v3785_v33 = vld [vmem:[#allocation2 + $0xc] ss:$32 sm:$0x10]  ;;  %v4041_v31 = vld [vmem:[#allocation2 + $0x1c] ss:$32 sm:$0x10] }
 0x44f   :  { %v4009_v8 = vld [vmem:[#allocation2 + $0x1a] ss:$32 sm:$0x10]  ;;  %v4073_v42 = vld [vmem:[#allocation2 + $0x1e] ss:$32 sm:$0x10] }
 0x450   :  { %v3883_v26 = vld [vmem:[#allocation2 + $0x12] ss:$32 sm:$0x20] }
 0x453   :  { %v5257_v47 = vpop.f32.mrf.mxu1 }
 0x454   :  { %v3116_v57 = vadd.f32 %v7565_v32, %v5257_v47  ;;  %v3941_v47 = vld [vmem:[#allocation2 + $0x16] ss:$32 sm:$0x4] }
 0x455   :  { %v3107_v19 = vpop.f32.mrf.mxu1 }
 0x456   :  { %v7605_v63 = vadd.f32 %v7565_v32, %v3107_v19  ;;  %v3196_v14 = vmax.f32 %v3116_v57, 0.0 }
 0x457   :  { %v5258_v3 = vpop.f32.mrf.mxu1 }
 0x458   :  { %v3194_v34 = vmax.f32 %v7605_v63, 0.0  ;;  %v7609_v5 = vadd.f32 %v7565_v32, %v5258_v3  ;;  %v3381_v27 = vrot.slane %v3196_v14, 1  ;;  %v4036_v63 = vor.u32 %v7630_v6, %v7644_v59  ;;  %v7662_v3 = vld [vmem:[#allocation2 + $0x12] ss:$32 sm:$0x8] }
 0x459   :  { %v3110_v11 = vpop.f32.mrf.mxu1  ;;  %v3782_v6 = vor.u32 %v3781_v30, %v3780_v38  ;;  %v3689_v30 = vld [vmem:[#allocation2 + $0x6] ss:$32 sm:$0x10] }
 0x45a   :  { %v3377_v48 = vrot.slane %v3194_v34, 1  ;;  %v3197_v50 = vmax.f32 %v7609_v5, 0.0  ;;  %v3111_v60 = vadd.f32 %v7565_v32, %v3110_v11  ;;  %v7666_v11 = vld [vmem:[#allocation2 + $0x14] ss:$32 sm:$0x8] }
 0x45c   :  { %v3378_v37 = vsel %vm2014_vm6, %v3375_v21, %v3377_v48  ;;  %v7628_v41 = vrot.slane %v3197_v50, 1  ;;  %v3195_v53 = vmax.f32 %v3111_v60, 0.0  ;;  %v3939_v21 = vld [vmem:[#allocation2 + $0x16] ss:$32 sm:$0x2]  ;;  %v4004_v60 = vor.u32 %v7634_v56, %v4002_v20 }
 0x45d   :  { %v3513_v39 = vmax.f32 %v3193_v9, %v3378_v37  ;;  %v3621_v9 = vld [vmem:[#allocation2 + $0x2] ss:$32 sm:$0x4]  ;;  %v7683_v37 = vld [vmem:[#allocation2 + $0x1a] ss:$32 sm:$0x8] }
 0x45e   :  { %v3384_v58 = vsel %vm2014_vm6, %v3381_v27, %v7628_v41  ;;  %v3379_v54 = vrot.slane %v3195_v53, 1  ;;  %v3753_v56 = vld [vmem:[#allocation2 + $0xa] ss:$32 sm:$0x10]  ;;  %v3622_v29 = vor.u32 %v3621_v9, %v3620_v25  ;;  %v4006_v59 = vor.u32 %v4005_v12, %v4004_v60 }
 0x45f   :  { %3577 = vst.msk [vmem:[#allocation2 + $0x1b8] sm:$0xff] %vm2624_vm8, %v3513_v39  ;;  %v3516_v28 = vmax.f32 %v3196_v14, %v3384_v58  ;;  %v7664_v14 = vld [vmem:[#allocation2 + $0xa] ss:$32 sm:$0x8]  ;;  %v3784_v9 = vor.u32 %v7668_v51, %v3782_v6 }
 0x460   :  { %v3380_v45 = vsel %vm2014_vm6, %v3377_v48, %v3379_v54  ;;  %v3382_v24 = vsel %vm2014_vm6, %v3379_v54, %v3381_v27  ;;  %v3684_v48 = vor.u32 %v7632_v62, %v3682_v18  ;;  %v7681_v27 = vld [vmem:[#allocation2 + $0x1c] ss:$32 sm:$0x8]  ;;  %v3940_v62 = vor.u32 %v3939_v21, %v3938_v55  ;;  %v3881_v39 = vld [vmem:[#allocation2 + $0x12] ss:$32 sm:$0x10] }
 0x461   :  { %3580 = vst.msk [vmem:[#allocation2 + $0x1d0] sm:$0xff] %vm2624_vm8, %v3516_v28  ;;  %v3514_v57 = vmax.f32 %v3194_v34, %v3380_v45  ;;  %v3515_v19 = vmax.f32 %v3195_v53, %v3382_v24  ;;  %v7674_v34 = vld [vmem:[#allocation2 + $0x2] ss:$32 sm:$0x8]  ;;  %v3910_v53 = vor.u32 %v3909_v61, %v3908_v36  ;;  %v4038_v54 = vor.u32 %v4037_v0, %v4036_v63 }
 0x462   :  { %v3686_v7 = vor.u32 %v3685_v52, %v3684_v48  ;;  %v3945_v58 = vld [vmem:[#allocation2 + $0x16] ss:$32 sm:$0x10]  ;;  %v3817_v18 = vld [vmem:[#allocation2 + $0xe] ss:$32 sm:$0x10]  ;;  %v4070_v28 = vor.u32 %v4069_v17, %v4068_v4  ;;  %v3942_v20 = vor.u32 %v3941_v47, %v3940_v62  ;;  %v3880_v36 = vor.u32 %v7662_v3, %v3878_v16 }
 0x463   :  { %3578 = vst.msk [vmem:[#allocation2 + $0x1c0] sm:$0xff] %vm2624_vm8, %v3514_v57  ;;  %3579 = vst.msk [vmem:[#allocation2 + $0x1c8] sm:$0xff] %vm2624_vm8, %v3515_v19  ;;  %v3625_v61 = vld [vmem:[#allocation2 + $0x2] ss:$32 sm:$0x10]  ;;  %v3752_v38 = vor.u32 %v7664_v14, %v3750_v2  ;;  %v3912_v46 = vor.u32 %v7666_v11, %v3910_v53  ;;  %v3816_v24 = vor.u32 %v7672_v43, %v3814_v35 }
 0x464   :  { %v3657_v52 = vld [vmem:[#allocation2 + $0x4] ss:$32 sm:$0x10]  ;;  %v3755_v21 = vld [vmem:[#allocation2 + $0xa] ss:$32 sm:$0x20]  ;;  %v3624_v0 = vor.u32 %v7674_v34, %v3622_v29  ;;  %v3688_v12 = vor.u32 %v7676_v15, %v3686_v7  ;;  %v3944_v49 = vor.u32 %v3943_v40, %v3942_v20  ;;  %v4040_v25 = vor.u32 %v7681_v27, %v4038_v54 }
 0x465   :  { %v3915_v45 = vld [vmem:[#allocation2 + $0x14] ss:$32 sm:$0x20]  ;;  %v4008_v44 = vor.u32 %v7683_v37, %v4006_v59  ;;  %v3787_v17 = vld [vmem:[#allocation2 + $0xc] ss:$32 sm:$0x20]  ;;  %v3656_v19 = vor.u32 %v7685_v10, %v3654_v1  ;;  %v4072_v63 = vor.u32 %v4071_v22, %v4070_v28  ;;  %v3882_v11 = vor.u32 %v3881_v39, %v3880_v36 }
 0x466   :  { %v3819_v55 = vld [vmem:[#allocation2 + $0xe] ss:$32 sm:$0x20]  ;;  %v3627_v47 = vld [vmem:[#allocation2 + $0x2] ss:$32 sm:$0x20]  ;;  %v3754_v48 = vor.u32 %v3753_v56, %v3752_v38  ;;  %v3914_v60 = vor.u32 %v3913_v13, %v3912_v46  ;;  %v7700_v16 = vor.u32 %v3945_v58, %v3944_v49  ;;  %v3786_v34 = vor.u32 %v3785_v33, %v3784_v9 }
 0x467   :  { %v7697_v57 = vld [vmem:[#allocation2 + $0x6] ss:$32 sm:$0x20]  ;;  %v4043_v3 = vld [vmem:[#allocation2 + $0x1c] ss:$32 sm:$0x20]  ;;  %v3818_v23 = vor.u32 %v3817_v18, %v3816_v24  ;;  %v3626_v40 = vor.u32 %v3625_v61, %v3624_v0  ;;  %v7702_v27 = vor.u32 %v3689_v30, %v3688_v12  ;;  %v4042_v53 = vor.u32 %v4041_v31, %v4040_v25 }
 0x468   :  { %v4011_v14 = vld [vmem:[#allocation2 + $0x1a] ss:$32 sm:$0x20]  ;;  %v3885_v51 = vld [vmem:[#allocation2 + $0x12] ss:$32 sm:$0x40]  ;;  %v4010_v6 = vor.u32 %v4009_v8, %v4008_v44  ;;  %v7704_v22 = vor.u32 %v3657_v52, %v3656_v19  ;;  %v7706_v62 = vor.u32 %v4073_v42, %v4072_v63  ;;  %v3884_v35 = vor.u32 %v3883_v26, %v3882_v11 }
 0x469   :  { %7996 = vst [vmem:[#allocation6_spill] sm:$0xff] %v7700_v16  ;;  %v3757_v2 = vld [vmem:[#allocation2 + $0xa] ss:$32 sm:$0x40]  ;;  %v3756_v7 = vor.u32 %v3755_v21, %v3754_v48  ;;  %v3916_v1 = vor.u32 %v3915_v45, %v3914_v60  ;;  %v3788_v33 = vor.u32 %v3787_v17, %v3786_v34  ;;  %v3820_v18 = vor.u32 %v3819_v55, %v3818_v23 }
 0x46a   :  { %v3917_v43 = vld [vmem:[#allocation2 + $0x14] ss:$32 sm:$0x40]  ;;  %v3789_v15 = vld [vmem:[#allocation2 + $0xc] ss:$32 sm:$0x40]  ;;  %v3628_v61 = vor.u32 %v3627_v47, %v3626_v40  ;;  %v4044_v20 = vor.u32 %v4043_v3, %v4042_v53  ;;  %v4012_v8 = vor.u32 %v4011_v14, %v4010_v6  ;;  %v7726_v38 = vor.u32 %v3885_v51, %v3884_v35 }
 0x46b   :  { %v5261_v37 = vpop.f32.mrf.mxu1  ;;  %v3821_v10 = vld [vmem:[#allocation2 + $0xe] ss:$32 sm:$0x40]  ;;  %v3629_v4 = vld [vmem:[#allocation2 + $0x2] ss:$32 sm:$0x40]  ;;  %v7730_v52 = vor.u32 %v3757_v2, %v3756_v7  ;;  %v7732_v42 = vor.u32 %v3917_v43, %v3916_v1  ;;  %v7736_v21 = vor.u32 %v3789_v15, %v3788_v33 }
 0x46c   :  { %7997 = vst [vmem:[#allocation7_spill] sm:$0xff] %v7706_v62  ;;  %v7709_v39 = vadd.f32 %v7565_v32, %v5261_v37  ;;  %v4045_v56 = vld [vmem:[#allocation2 + $0x1c] ss:$32 sm:$0x40]  ;;  %v7738_v45 = vor.u32 %v3821_v10, %v3820_v18  ;;  %v7747_v44 = vor.u32 %v3629_v4, %v3628_v61 }
 0x46d   :  { %v4013_v13 = vld [vmem:[#allocation2 + $0x1a] ss:$32 sm:$0x40]  ;;  %v7711_v29 = vld [vmem:[#allocation2 + $0x12] ss:$32 sm:$0x80]  ;;  %v3123_v58 = vpop.f32.mrf.mxu1  ;;  %v7751_v47 = vor.u32 %v4045_v56, %v4044_v20 }
 0x46e   :  { %v7713_v54 = vld [vmem:[#allocation2 + $0xa] ss:$32 sm:$0x80]  ;;  %v7715_v59 = vld [vmem:[#allocation2 + $0x14] ss:$32 sm:$0x80]  ;;  %v7720_v28 = vadd.f32 %v7565_v32, %v3123_v58  ;;  %v7753_v63 = vor.u32 %v4013_v13, %v4012_v8 }
 0x46f   :  { %v7722_v31 = vld [vmem:[#allocation2 + $0x1c] ss:$32 sm:$0x80]  ;;  %v7724_v36 = vld [vmem:[#allocation2 + $0x1a] ss:$32 sm:$0x80]  ;;  %v5262_v46 = vpop.f32.mrf.mxu1 }
 0x470   :  { %v7728_v9 = vld [vmem:[#allocation2 + $0x112] ss:$32 sm:$0x2]  ;;  %v7734_v26 = vld [vmem:[#allocation2 + $0x114] ss:$32 sm:$0x2]  ;;  %v3135_v12 = vadd.f32 %v7565_v32, %v5262_v46 }
 0x471   :  { %v3200_v24 = vmax.f32 %v7709_v39, 0.0  ;;  %v3198_v0 = vmax.f32 %v7720_v28, 0.0  ;;  %v7743_v49 = vld [vmem:[#allocation2 + $0x112] ss:$32 sm:$0x1]  ;;  %v3126_v55 = vpop.f32.mrf.mxu1 }
 0x472   :  { %v7745_v25 = vld [vmem:[#allocation2 + $0x114] ss:$32 sm:$0x1]  ;;  %v7749_v17 = vld [vmem:[#allocation2 + $0x116] ss:$32 sm:$0x2]  ;;  %v3127_v60 = vadd.f32 %v7565_v32, %v3126_v55  ;;  %v3892_v6 = vor.u32 %v7728_v9, %v7743_v49 }
 0x473   :  { %v4051_v19 = vld [vmem:[#allocation2 + $0x11c] ss:$32 sm:$0x2]  ;;  %v3763_v14 = vld [vmem:[#allocation2 + $0x10a] ss:$32 sm:$0x2] }
 0x474   :  { %v3385_v51 = vrot.slane %v3198_v0, 1  ;;  %v3201_v48 = vmax.f32 %v3135_v12, 0.0  ;;  %v4050_v2 = vld [vmem:[#allocation2 + $0x11c] ss:$32 sm:$0x1]  ;;  %v3389_v39 = vrot.slane %v3200_v24, 1 }
 0x475   :  { %v4018_v43 = vld [vmem:[#allocation2 + $0x11a] ss:$32 sm:$0x1]  ;;  %v7764_v23 = vld [vmem:[#allocation2 + $0x116] ss:$32 sm:$0x1]  ;;  %v4052_v58 = vor.u32 %v4051_v19, %v4050_v2 }
 0x476   :  { %v4019_v34 = vld [vmem:[#allocation2 + $0x11a] ss:$32 sm:$0x2]  ;;  %v4053_v37 = vld [vmem:[#allocation2 + $0x11c] ss:$32 sm:$0x4]  ;;  %v3386_v56 = vsel %vm2014_vm6, %v7628_v41, %v3385_v51 }
 0x477   :  { %v3893_v10 = vld [vmem:[#allocation2 + $0x112] ss:$32 sm:$0x4]  ;;  %v3762_v32 = vld [vmem:[#allocation2 + $0x10a] ss:$32 sm:$0x1]  ;;  %v3517_v1 = vmax.f32 %v3197_v50, %v3386_v56  ;;  %v4020_v18 = vor.u32 %v4019_v34, %v4018_v43  ;;  %v4054_v2 = vor.u32 %v4053_v37, %v4052_v58 }
 0x478   :  { %v3391_v13 = vrot.slane %v3201_v48, 1  ;;  %v3199_v35 = vmax.f32 %v3127_v60, 0.0  ;;  %v4021_v7 = vld [vmem:[#allocation2 + $0x11a] ss:$32 sm:$0x4]  ;;  %v3764_v55 = vor.u32 %v3763_v14, %v3762_v32  ;;  %v3894_v32 = vor.u32 %v3893_v10, %v3892_v6 }
 0x479   :  { %v4055_v33 = vld [vmem:[#allocation2 + $0x11c] ss:$32 sm:$0x8]  ;;  %v3765_v61 = vld [vmem:[#allocation2 + $0x10a] ss:$32 sm:$0x4]  ;;  %v4022_v43 = vor.u32 %v4021_v7, %v4020_v18 }
 0x47a   :  { %v7778_v20 = vld [vmem:[#allocation2 + $0x10c] ss:$32 sm:$0x2]  ;;  %v7780_v8 = vld [vmem:[#allocation2 + $0x10e] ss:$32 sm:$0x2]  ;;  %v3392_v12 = vsel %vm2014_vm6, %v3389_v39, %v3391_v13  ;;  %v3766_v7 = vor.u32 %v3765_v61, %v3764_v55  ;;  %v4056_v18 = vor.u32 %v4055_v33, %v4054_v2 }
 0x47b   :  { %v7782_v46 = vld [vmem:[#allocation2 + $0x102] ss:$32 sm:$0x2]  ;;  %v7784_v9 = vld [vmem:[#allocation2 + $0x106] ss:$32 sm:$0x2]  ;;  %v3520_v19 = vmax.f32 %v3200_v24, %v3392_v12 }
 0x47c   :  { %v3457_v5 = vsel %vm2014_vm6, %v3391_v13, 0.0  ;;  %v3387_v50 = vrot.slane %v3199_v35, 1  ;;  %v4023_v49 = vld [vmem:[#allocation2 + $0x11a] ss:$32 sm:$0x8]  ;;  %3581 = vst.msk [vmem:[#allocation2 + $0x1d8] sm:$0xff] %vm2624_vm8, %v3517_v1 }
 0x47d   :  { %v3521_v60 = vmax.f32 %v3201_v48, %v3457_v5  ;;  %v3895_v34 = vld [vmem:[#allocation2 + $0x112] ss:$32 sm:$0x8]  ;;  %v3767_v56 = vld [vmem:[#allocation2 + $0x10a] ss:$32 sm:$0x8]  ;;  %v4024_v12 = vor.u32 %v4023_v49, %v4022_v43 }
 0x47e   :  { %v3925_v30 = vld [vmem:[#allocation2 + $0x114] ss:$32 sm:$0x4]  ;;  %v3794_v11 = vld [vmem:[#allocation2 + $0x10c] ss:$32 sm:$0x1]  ;;  %v3388_v14 = vsel %vm2014_vm6, %v3385_v51, %v3387_v50  ;;  %v3390_v24 = vsel %vm2014_vm6, %v3387_v50, %v3389_v39 }
 0x47f   :  { %v3797_v15 = vld [vmem:[#allocation2 + $0x10c] ss:$32 sm:$0x4]  ;;  %v3826_v3 = vld [vmem:[#allocation2 + $0x10e] ss:$32 sm:$0x1]  ;;  %v3518_v1 = vmax.f32 %v3198_v0, %v3388_v14  ;;  %v3519_v58 = vmax.f32 %v3199_v35, %v3390_v24  ;;  %v3796_v55 = vor.u32 %v7778_v20, %v3794_v11 }
 0x480   :  { %v7791_v53 = vld [vmem:[#allocation2 + $0x102] ss:$32 sm:$0x1]  ;;  %v7793_v40 = vld [vmem:[#allocation2 + $0x106] ss:$32 sm:$0x1]  ;;  %v3828_v28 = vor.u32 %v7780_v8, %v3826_v3 }
 0x481   :  { %v7795_v13 = vld [vmem:[#allocation2 + $0x104] ss:$32 sm:$0x2]  ;;  %v7797_v41 = vld [vmem:[#allocation2 + $0x11e] ss:$32 sm:$0x2]  ;;  %v3636_v0 = vor.u32 %v7782_v46, %v7791_v53  ;;  %v3700_v35 = vor.u32 %v7784_v9, %v7793_v40  ;;  %v7998_v53 = vor.u32 %v7734_v26, %v7745_v25  ;;  %v3798_v46 = vor.u32 %v3797_v15, %v3796_v55 }
 0x482   :  { %v4057_v48 = vld [vmem:[#allocation2 + $0x11c] ss:$32 sm:$0x10]  ;;  %v4025_v37 = vld [vmem:[#allocation2 + $0x11a] ss:$32 sm:$0x10]  ;;  %v7999_v25 = vor.u32 %v7749_v17, %v7764_v23 }
 0x483   :  { %3584 = vst.msk [vmem:[#allocation2 + $0x1f0] sm:$0xff] %vm2624_vm8, %v3520_v19  ;;  %3585 = vst.msk [vmem:[#allocation2 + $0x1f8] sm:$0xff] %vm2624_vm8, %v3521_v60  ;;  %v3897_v5 = vld [vmem:[#allocation2 + $0x112] ss:$32 sm:$0x10]  ;;  %v4058_v33 = vor.u32 %v4057_v48, %v4056_v18  ;;  %v4026_v49 = vor.u32 %v4025_v37, %v4024_v12  ;;  %v3896_v19 = vor.u32 %v3895_v34, %v3894_v32 }
 0x484   :  { %v3769_v4 = vld [vmem:[#allocation2 + $0x10a] ss:$32 sm:$0x10]  ;;  %v3927_v16 = vld [vmem:[#allocation2 + $0x114] ss:$32 sm:$0x8]  ;;  %v3768_v60 = vor.u32 %v3767_v56, %v3766_v7  ;;  %v3926_v8 = vor.u32 %v3925_v30, %v7998_v53 }
 0x485   :  { %v3799_v51 = vld [vmem:[#allocation2 + $0x10c] ss:$32 sm:$0x8]  ;;  %v3829_v62 = vld [vmem:[#allocation2 + $0x10e] ss:$32 sm:$0x4]  ;;  %v3898_v56 = vor.u32 %v3897_v5, %v3896_v19 }
 0x486   :  { %v7805_v39 = vld [vmem:[#allocation2 + $0x104] ss:$32 sm:$0x1]  ;;  %v7807_v50 = vld [vmem:[#allocation2 + $0x11e] ss:$32 sm:$0x1]  ;;  %v3770_v37 = vor.u32 %v3769_v4, %v3768_v60  ;;  %v3928_v12 = vor.u32 %v3927_v16, %v3926_v8  ;;  %v3800_v26 = vor.u32 %v3799_v51, %v3798_v46  ;;  %v3830_v30 = vor.u32 %v3829_v62, %v3828_v28 }
 0x487   :  { %v3957_v6 = vld [vmem:[#allocation2 + $0x116] ss:$32 sm:$0x4]  ;;  %v4059_v10 = vld [vmem:[#allocation2 + $0x11c] ss:$32 sm:$0x20]  ;;  %v3668_v40 = vor.u32 %v7795_v13, %v7805_v39  ;;  %v4084_v9 = vor.u32 %v7797_v41, %v7807_v50 }
 0x488   :  { %v4027_v61 = vld [vmem:[#allocation2 + $0x11a] ss:$32 sm:$0x20]  ;;  %3582 = vst.msk [vmem:[#allocation2 + $0x1e0] sm:$0xff] %vm2624_vm8, %v3518_v1  ;;  %3583 = vst.msk [vmem:[#allocation2 + $0x1e8] sm:$0xff] %vm2624_vm8, %v3519_v58  ;;  %v4060_v24 = vor.u32 %v4059_v10, %v4058_v33  ;;  %v7827_v15 = vor.u32 %v3957_v6, %v7999_v25 }
 0x489   :  { %v3929_v2 = vld [vmem:[#allocation2 + $0x114] ss:$32 sm:$0x10]  ;;  %v3801_v43 = vld [vmem:[#allocation2 + $0x10c] ss:$32 sm:$0x10]  ;;  %v4028_v34 = vor.u32 %v4027_v61, %v4026_v49 }
 0x48a   :  { %v3637_v14 = vld [vmem:[#allocation2 + $0x102] ss:$32 sm:$0x4]  ;;  %v3701_v11 = vld [vmem:[#allocation2 + $0x106] ss:$32 sm:$0x4]  ;;  %v3930_v19 = vor.u32 %v3929_v2, %v3928_v12  ;;  %v3802_v16 = vor.u32 %v3801_v43, %v3800_v26 }
 0x48b   :  { %v3899_v20 = vld [vmem:[#allocation2 + $0x112] ss:$32 sm:$0x20]  ;;  %v3771_v3 = vld [vmem:[#allocation2 + $0x10a] ss:$32 sm:$0x20]  ;;  %v3638_v51 = vor.u32 %v3637_v14, %v3636_v0  ;;  %v3702_v28 = vor.u32 %v3701_v11, %v3700_v35  ;;  %v8000_v0 = vor.u32 %v7722_v31, %v7751_v47  ;;  %v8001_v35 = vor.u32 %v7724_v36, %v7753_v63 }
 0x48c   :  { %v3901_v48 = vld [vmem:[#allocation2 + $0x112] ss:$32 sm:$0x40]  ;;  %v3773_v32 = vld [vmem:[#allocation2 + $0x10a] ss:$32 sm:$0x40]  ;;  %v3900_v39 = vor.u32 %v3899_v20, %v3898_v56  ;;  %v3772_v50 = vor.u32 %v3771_v3, %v3770_v37 }
 0x48d   :  { %v3831_v7 = vld [vmem:[#allocation2 + $0x10e] ss:$32 sm:$0x8]  ;;  %v3639_v1 = vld [vmem:[#allocation2 + $0x102] ss:$32 sm:$0x8] }
 0x48e   :  { %v4061_v58 = vld [vmem:[#allocation2 + $0x11c] ss:$32 sm:$0x40]  ;;  %v4029_v18 = vld [vmem:[#allocation2 + $0x11a] ss:$32 sm:$0x40]  ;;  %v3902_v6 = vor.u32 %v3901_v48, %v3900_v39  ;;  %v3774_v8 = vor.u32 %v3773_v32, %v3772_v50 }
 0x48f   :  { %v4062_v13 = vor.u32 %v4061_v58, %v4060_v24  ;;  %v4030_v41 = vor.u32 %v4029_v18, %v4028_v34  ;;  %v3931_v5 = vld [vmem:[#allocation2 + $0x114] ss:$32 sm:$0x20]  ;;  %v3803_v10 = vld [vmem:[#allocation2 + $0x10c] ss:$32 sm:$0x20]  ;;  %v3832_v58 = vor.u32 %v3831_v7, %v3830_v30  ;;  %v3640_v18 = vor.u32 %v3639_v1, %v3638_v51 }
 0x490   :  { %v3833_v4 = vld [vmem:[#allocation2 + $0x10e] ss:$32 sm:$0x10]  ;;  %v3669_v61 = vld [vmem:[#allocation2 + $0x104] ss:$32 sm:$0x4]  ;;  %v3932_v34 = vor.u32 %v3931_v5, %v3930_v19  ;;  %v3804_v56 = vor.u32 %v3803_v10, %v3802_v16 }
 0x491   :  { %v4085_v55 = vld [vmem:[#allocation2 + $0x11e] ss:$32 sm:$0x4]  ;;  %v4063_v33 = vld [vmem:[#allocation2 + $0x11c] ss:$32 sm:$0x80]  ;;  %v3834_v1 = vor.u32 %v3833_v4, %v3832_v58  ;;  %v3670_v39 = vor.u32 %v3669_v61, %v3668_v40  ;;  %v8002_v40 = vor.u32 %v7711_v29, %v7726_v38  ;;  %v8003_v61 = vor.u32 %v7713_v54, %v7730_v52 }
 0x492   :  { %v4031_v49 = vld [vmem:[#allocation2 + $0x11a] ss:$32 sm:$0x80]  ;;  %v3641_v62 = vld [vmem:[#allocation2 + $0x102] ss:$32 sm:$0x10]  ;;  %v4064_v17 = vor.u32 %v4063_v33, %v4062_v13  ;;  %v4086_v31 = vor.u32 %v4085_v55, %v4084_v9 }
 0x493   :  { %v3703_v60 = vld [vmem:[#allocation2 + $0x106] ss:$32 sm:$0x8]  ;;  %v4032_v23 = vor.u32 %v4031_v49, %v4030_v41  ;;  %v3903_v53 = vld [vmem:[#allocation2 + $0x112] ss:$32 sm:$0x80]  ;;  %v3642_v63 = vor.u32 %v3641_v62, %v3640_v18 }
 0x494   :  { %v3933_v20 = vld [vmem:[#allocation2 + $0x114] ss:$32 sm:$0x40]  ;;  %v3671_v3 = vld [vmem:[#allocation2 + $0x104] ss:$32 sm:$0x8]  ;;  %v5636_v2 = vpack.i.bf16 %v4064_v17, %v8000_v0  ;;  %v3904_v14 = vor.u32 %v3903_v53, %v3902_v6  ;;  %v3704_v50 = vor.u32 %v3703_v60, %v3702_v28 }
 0x495   :  { %v4087_v46 = vld [vmem:[#allocation2 + $0x11e] ss:$32 sm:$0x8]  ;;  %v3775_v24 = vld [vmem:[#allocation2 + $0x10a] ss:$32 sm:$0x80]  ;;  %v5626_v43 = vpack.i.bf16 %v4032_v23, %v8001_v35  ;;  %v3934_v41 = vor.u32 %v3933_v20, %v3932_v34  ;;  %v3672_v51 = vor.u32 %v3671_v3, %v3670_v39 }
 0x496   :  { %v3805_v37 = vld [vmem:[#allocation2 + $0x10c] ss:$32 sm:$0x40]  ;;  %v3776_v11 = vor.u32 %v3775_v24, %v3774_v8  ;;  %v3935_v48 = vld [vmem:[#allocation2 + $0x114] ss:$32 sm:$0x80]  ;;  %5637 = vrot.lane.b32.xlu0 %v5636_v2, %s5761_s28  ;;  %v4088_v4 = vor.u32 %v4087_v46, %v4086_v31  ;;  %v5631_v9 = vpack.i.bf16 %v3904_v14, %v8002_v40 }
 0x497   :  { %v3791_v32 = vld [vmem:[#allocation2 + $0xc] ss:$32 sm:$0x80]  ;;  %v3835_v12 = vld [vmem:[#allocation2 + $0x10e] ss:$32 sm:$0x20]  ;;  %5627 = vrot.lane.b32.xlu1 %v5626_v43, %s5760_s26  ;;  %v3806_v36 = vor.u32 %v3805_v37, %v3804_v56  ;;  %v3936_v33 = vor.u32 %v3935_v48, %v3934_v41 }
 0x498   :  { %v3705_v26 = vld [vmem:[#allocation2 + $0x106] ss:$32 sm:$0x10]  ;;  %v3673_v25 = vld [vmem:[#allocation2 + $0x104] ss:$32 sm:$0x10]  ;;  %v3836_v49 = vor.u32 %v3835_v12, %v3834_v1  ;;  %v5646_v55 = vpack.i.bf16 %v3776_v11, %v8003_v61  ;;  %v3792_v29 = vor.u32 %v3791_v32, %v7736_v21 }
 0x499   :  { %v7835_v13 = vld [vmem:[#allocation2 + $0x116] ss:$32 sm:$0x8]  ;;  %v3807_v7 = vld [vmem:[#allocation2 + $0x10c] ss:$32 sm:$0x80]  ;;  %v3706_v20 = vor.u32 %v3705_v26, %v3704_v50  ;;  %v3674_v54 = vor.u32 %v3673_v25, %v3672_v51  ;;  %v8005_v50 = vor.u32 %v7697_v57, %v7702_v27 }
 0x49a   :  { %v3643_v30 = vld [vmem:[#allocation2 + $0x102] ss:$32 sm:$0x20]  ;;  %v4089_v47 = vld [vmem:[#allocation2 + $0x11e] ss:$32 sm:$0x10]  ;;  %v3808_v17 = vor.u32 %v3807_v7, %v3806_v36  ;;  %v3960_v52 = vor.u32 %v7835_v13, %v7827_v15  ;;  %5647 = vrot.lane.b32.xlu0 %v5646_v55, %s5760_s26  ;;  %v8004_v15 = vor.u32 %v7715_v59, %v7732_v42 }
 0x49b   :  { %v3707_v5 = vld [vmem:[#allocation2 + $0x106] ss:$32 sm:$0x20]  ;;  %v3675_v10 = vld [vmem:[#allocation2 + $0x104] ss:$32 sm:$0x20]  ;;  %v3644_v28 = vor.u32 %v3643_v30, %v3642_v63  ;;  %5632 = vrot.lane.b32.xlu1 %v5631_v9, %s5760_s26  ;;  %v4090_v37 = vor.u32 %v4089_v47, %v4088_v4 }
 0x49c   :  { %v3837_v19 = vld [vmem:[#allocation2 + $0x10e] ss:$32 sm:$0x40]  ;;  %v3645_v16 = vld [vmem:[#allocation2 + $0x102] ss:$32 sm:$0x40]  ;;  %v5641_v0 = vpack.i.bf16 %v3936_v33, %v8004_v15  ;;  %v3708_v2 = vor.u32 %v3707_v5, %v3706_v20  ;;  %v3676_v43 = vor.u32 %v3675_v10, %v3674_v54  ;;  %v5656_v11 = vpack.i.bf16 %v3808_v17, %v3792_v29 }
 0x49d   :  { %v3823_v23 = vld [vmem:[#allocation2 + $0xe] ss:$32 sm:$0x80]  ;;  %v3659_v60 = vld [vmem:[#allocation2 + $0x4] ss:$32 sm:$0x20]  ;;  %v3838_v21 = vor.u32 %v3837_v19, %v3836_v49  ;;  %v3646_v24 = vor.u32 %v3645_v16, %v3644_v28 }
 0x49e   :  { %v3839_v62 = vld [vmem:[#allocation2 + $0x10e] ss:$32 sm:$0x80]  ;;  %v5717_v6 = vld [vmem:[%s7985_s5 + $0x40] sm:$0xff]   ;;  %v3824_v41 = vor.u32 %v3823_v23, %v7738_v45  ;;  %v3660_v59 = vor.u32 %v3659_v60, %v7704_v22  ;;  %5657 = vrot.lane.b32.xlu0 %v5656_v11, %s5761_s28  ;;  %v8006_v9 = vld [vmem:[#allocation7_spill] sm:$0xff] }
 0x49f   :  { %v5718_v53 = vld [vmem:[%s7985_s5] sm:$0xff]   ;;  %v4091_v58 = vld [vmem:[#allocation2 + $0x11e] ss:$32 sm:$0x20]  ;;  %5051 = vmatprep.subr.bf16.mxu0 %v5717_v6  ;;  %v3840_v48 = vor.u32 %v3839_v62, %v3838_v21  ;;  %5642 = vrot.lane.b32.xlu1 %v5641_v0, %s5761_s28  ;;  %v8007_v55 = vld [vmem:[#allocation6_spill] sm:$0xff] }
 0x4a0   :  { %v3631_v38 = vld [vmem:[#allocation2 + $0x2] ss:$32 sm:$0x80]  ;;  %v3693_v34 = vld [vmem:[#allocation2 + $0x6] ss:$32 sm:$0x40]  ;;  %5052 = vmatpush3.bf16.msra.mxu0 %v5718_v53  ;;  %v4092_v1 = vor.u32 %v4091_v58, %v4090_v37 }
 0x4a1   :  { %v3647_v8 = vld [vmem:[#allocation2 + $0x102] ss:$32 sm:$0x80]  ;;  %v3661_v56 = vld [vmem:[#allocation2 + $0x4] ss:$32 sm:$0x40]  ;;  %v3632_v39 = vor.u32 %v3631_v38, %v7747_v44  ;;  %v3694_v45 = vor.u32 %v3693_v34, %v8005_v50  ;;  %v5666_v49 = vpack.i.bf16 %v3840_v48, %v3824_v41 }
 0x4a2   :  { %v5719_v3 = vld [vmem:[%s7985_s5 + $0xc0] sm:$0xff]   ;;  %v3961_v18 = vld [vmem:[#allocation2 + $0x116] ss:$32 sm:$0x10]  ;;  %v3648_v32 = vor.u32 %v3647_v8, %v3646_v24  ;;  %v3662_v5 = vor.u32 %v3661_v56, %v3660_v59 }
 0x4a3   :  { %v5720_v46 = vld [vmem:[%s7985_s5 + $0x80] sm:$0xff]   ;;  %5073 = vmatprep.subr.bf16.mxu1 %v5719_v3  ;;  %v4075_v12 = vld [vmem:[#allocation2 + $0x1e] ss:$32 sm:$0x20]  ;;  %v3962_v30 = vor.u32 %v3961_v18, %v3960_v52  ;;  %s5762_s5 = smov 96  }
 0x4a4   :  { %v3709_v35 = vld [vmem:[#allocation2 + $0x106] ss:$32 sm:$0x40]  ;;  %v3677_v14 = vld [vmem:[#allocation2 + $0x104] ss:$32 sm:$0x40]  ;;  %5074 = vmatpush3.bf16.msra.mxu1 %v5720_v46  ;;  %v5651_v19 = vpack.i.bf16 %v3648_v32, %v3632_v39  ;;  %v4076_v44 = vor.u32 %v4075_v12, %v8006_v9  ;;  %5667 = vrot.lane.b32.xlu0 %v5666_v49, %s5762_s5 }
 0x4a5   :  { %v4093_v26 = vld [vmem:[#allocation2 + $0x11e] ss:$32 sm:$0x40]  ;;  %v3947_v25 = vld [vmem:[#allocation2 + $0x16] ss:$32 sm:$0x20]  ;;  %v3710_v47 = vor.u32 %v3709_v35, %v3708_v2  ;;  %v3678_v63 = vor.u32 %v3677_v14, %v3676_v43 }
 0x4a6   :  { %v3963_v13 = vld [vmem:[#allocation2 + $0x116] ss:$32 sm:$0x20]  ;;  %v3711_v7 = vld [vmem:[#allocation2 + $0x106] ss:$32 sm:$0x80]  ;;  %v4094_v10 = vor.u32 %v4093_v26, %v4092_v1  ;;  %v3948_v17 = vor.u32 %v3947_v25, %v8007_v55  ;;  %5652 = vrot.lane.b32.xlu1 %v5651_v19, %s5760_s26 }
 0x4a7   :  { %v3679_v42 = vld [vmem:[#allocation2 + $0x104] ss:$32 sm:$0x80]  ;;  %v3695_v31 = vld [vmem:[#allocation2 + $0x6] ss:$32 sm:$0x80]  ;;  %v3964_v22 = vor.u32 %v3963_v13, %v3962_v30  ;;  %v3712_v16 = vor.u32 %v3711_v7, %v3710_v47 }
 0x4a8   :  { %v3663_v36 = vld [vmem:[#allocation2 + $0x4] ss:$32 sm:$0x80]  ;;  %v3965_v33 = vld [vmem:[#allocation2 + $0x116] ss:$32 sm:$0x40]  ;;  %v3680_v51 = vor.u32 %v3679_v42, %v3678_v63  ;;  %v3696_v57 = vor.u32 %v3695_v31, %v3694_v45 }
 0x4a9   :  { %v4077_v4 = vld [vmem:[#allocation2 + $0x1e] ss:$32 sm:$0x40]  ;;  %v3949_v40 = vld [vmem:[#allocation2 + $0x16] ss:$32 sm:$0x40]  ;;  %v3664_v27 = vor.u32 %v3663_v36, %v3662_v5  ;;  %v3966_v62 = vor.u32 %v3965_v33, %v3964_v22 }
 0x4aa   :  { %v4095_v61 = vld [vmem:[#allocation2 + $0x11e] ss:$32 sm:$0x80]  ;;  %v3967_v23 = vld [vmem:[#allocation2 + $0x116] ss:$32 sm:$0x80]  ;;  %v4078_v28 = vor.u32 %v4077_v4, %v4076_v44  ;;  %v3950_v6 = vor.u32 %v3949_v40, %v3948_v17  ;;  %v5671_v29 = vpack.i.bf16 %v3712_v16, %v3696_v57 }
 0x4ab   :  { %v4079_v60 = vld [vmem:[#allocation2 + $0x1e] ss:$32 sm:$0x80]  ;;  %v3951_v53 = vld [vmem:[#allocation2 + $0x16] ss:$32 sm:$0x80]  ;;  %v5661_v38 = vpack.i.bf16 %v3680_v51, %v3664_v27  ;;  %v4096_v8 = vor.u32 %v4095_v61, %v4094_v10  ;;  %v3968_v20 = vor.u32 %v3967_v23, %v3966_v62 }
 0x4ac   :  { %5672 = vrot.lane.b32.xlu0 %v5671_v29, %s5762_s5  ;;  %v4080_v54 = vor.u32 %v4079_v60, %v4078_v28  ;;  %v3952_v52 = vor.u32 %v3951_v53, %v3950_v6  ;;  %v3843_v21 = vld [vmem:[#allocation2 + $0x10] ss:$32 sm:$0x2]  ;;  %v3715_v24 = vld [vmem:[#allocation2 + $0x8] ss:$32 sm:$0x2] }
 0x4ad   :  { %5662 = vrot.lane.b32.xlu1 %v5661_v38, %s5761_s28  ;;  %v3971_v34 = vld [vmem:[#allocation2 + $0x18] ss:$32 sm:$0x2]  ;;  %v3842_v56 = vld [vmem:[#allocation2 + $0x10] ss:$32 sm:$0x1] }
 0x4ae   :  { %v5676_v3 = vpack.i.bf16 %v4096_v8, %v4080_v54  ;;  %v5681_v46 = vpack.i.bf16 %v3968_v20, %v3952_v52  ;;  %v3845_v37 = vld [vmem:[#allocation2 + $0x10] ss:$32 sm:$0x4]  ;;  %v3717_v58 = vld [vmem:[#allocation2 + $0x8] ss:$32 sm:$0x4]  ;;  %v3844_v25 = vor.u32 %v3843_v21, %v3842_v56 }
 0x4af   :  { %v3714_v18 = vld [vmem:[#allocation2 + $0x8] ss:$32 sm:$0x1]  ;;  %v3587_v15 = vld [vmem:[#allocation2] ss:$32 sm:$0x2] }
 0x4b0   :  { %5677 = vrot.lane.b32.xlu0 %v5676_v3, %s5762_s5  ;;  %v3987_v0 = vld [vmem:[#allocation2 + $0x118] ss:$32 sm:$0x2]  ;;  %v3589_v2 = vld [vmem:[#allocation2] ss:$32 sm:$0x4]  ;;  %v3716_v59 = vor.u32 %v3715_v24, %v3714_v18  ;;  %v3846_v10 = vor.u32 %v3845_v37, %v3844_v25 }
 0x4b1   :  { %5682 = vrot.lane.b32.xlu1 %v5681_v46, %s5762_s5  ;;  %v3586_v35 = vld [vmem:[#allocation2] ss:$32 sm:$0x1]  ;;  %v3973_v43 = vld [vmem:[#allocation2 + $0x18] ss:$32 sm:$0x4] }
 0x4b2   :  { %v3986_v14 = vld [vmem:[#allocation2 + $0x118] ss:$32 sm:$0x1]  ;;  %v3847_v48 = vld [vmem:[#allocation2 + $0x10] ss:$32 sm:$0x8]  ;;  %v3588_v50 = vor.u32 %v3587_v15, %v3586_v35  ;;  %v3718_v33 = vor.u32 %v3717_v58, %v3716_v59 }
 0x4b3   :  { %v3970_v11 = vld [vmem:[#allocation2 + $0x18] ss:$32 sm:$0x1]  ;;  %v3859_v32 = vld [vmem:[#allocation2 + $0x110] ss:$32 sm:$0x2]  ;;  %v3988_v30 = vor.u32 %v3987_v0, %v3986_v14  ;;  %v3848_v62 = vor.u32 %v3847_v48, %v3846_v10 }
 0x4b4   :  { %v3719_v12 = vld [vmem:[#allocation2 + $0x8] ss:$32 sm:$0x8]  ;;  %v3989_v26 = vld [vmem:[#allocation2 + $0x118] ss:$32 sm:$0x4]  ;;  %v3972_v5 = vor.u32 %v3971_v34, %v3970_v11  ;;  %v3590_v55 = vor.u32 %v3589_v2, %v3588_v50 }
 0x4b5   :  { %v3858_v13 = vld [vmem:[#allocation2 + $0x110] ss:$32 sm:$0x1]  ;;  %v3730_v41 = vld [vmem:[#allocation2 + $0x108] ss:$32 sm:$0x1]  ;;  %v3990_v16 = vor.u32 %v3989_v26, %v3988_v30  ;;  %v3720_v60 = vor.u32 %v3719_v12, %v3718_v33 }
 0x4b6   :  { %v3731_v7 = vld [vmem:[#allocation2 + $0x108] ss:$32 sm:$0x2]  ;;  %v3591_v42 = vld [vmem:[#allocation2] ss:$32 sm:$0x8]  ;;  %v3860_v4 = vor.u32 %v3859_v32, %v3858_v13  ;;  %v3974_v27 = vor.u32 %v3973_v43, %v3972_v5 }
 0x4b7   :  { %v3975_v1 = vld [vmem:[#allocation2 + $0x18] ss:$32 sm:$0x8]  ;;  %v3849_v39 = vld [vmem:[#allocation2 + $0x10] ss:$32 sm:$0x10]  ;;  %v3732_v44 = vor.u32 %v3731_v7, %v3730_v41  ;;  %v3592_v21 = vor.u32 %v3591_v42, %v3590_v55 }
 0x4b8   :  { %v3861_v31 = vld [vmem:[#allocation2 + $0x110] ss:$32 sm:$0x4]  ;;  %v3721_v47 = vld [vmem:[#allocation2 + $0x8] ss:$32 sm:$0x10]  ;;  %v3976_v34 = vor.u32 %v3975_v1, %v3974_v27  ;;  %v3850_v56 = vor.u32 %v3849_v39, %v3848_v62 }
 0x4b9   :  { %v3602_v36 = vld [vmem:[#allocation2 + $0x100] ss:$32 sm:$0x1]  ;;  %v3991_v45 = vld [vmem:[#allocation2 + $0x118] ss:$32 sm:$0x8]  ;;  %v3862_v20 = vor.u32 %v3861_v31, %v3860_v4  ;;  %v3722_v58 = vor.u32 %v3721_v47, %v3720_v60 }
 0x4ba   :  { %v3603_v63 = vld [vmem:[#allocation2 + $0x100] ss:$32 sm:$0x2]  ;;  %v3733_v22 = vld [vmem:[#allocation2 + $0x108] ss:$32 sm:$0x4]  ;;  %v3992_v38 = vor.u32 %v3991_v45, %v3990_v16 }
 0x4bb   :  { %v3593_v49 = vld [vmem:[#allocation2] ss:$32 sm:$0x10]  ;;  %v3977_v19 = vld [vmem:[#allocation2 + $0x18] ss:$32 sm:$0x10]  ;;  %v3604_v53 = vor.u32 %v3603_v63, %v3602_v36  ;;  %v3734_v3 = vor.u32 %v3733_v22, %v3732_v44 }
 0x4bc   :  { %v3851_v51 = vld [vmem:[#allocation2 + $0x10] ss:$32 sm:$0x20]  ;;  %v3723_v9 = vld [vmem:[#allocation2 + $0x8] ss:$32 sm:$0x20]  ;;  %v3594_v12 = vor.u32 %v3593_v49, %v3592_v21  ;;  %v3978_v25 = vor.u32 %v3977_v19, %v3976_v34 }
 0x4bd   :  { %v3863_v40 = vld [vmem:[#allocation2 + $0x110] ss:$32 sm:$0x8]  ;;  %v3605_v61 = vld [vmem:[#allocation2 + $0x100] ss:$32 sm:$0x4]  ;;  %v3852_v13 = vor.u32 %v3851_v51, %v3850_v56  ;;  %v3724_v42 = vor.u32 %v3723_v9, %v3722_v58 }
 0x4be   :  { %v3993_v23 = vld [vmem:[#allocation2 + $0x118] ss:$32 sm:$0x10]  ;;  %v3735_v28 = vld [vmem:[#allocation2 + $0x108] ss:$32 sm:$0x8]  ;;  %v3606_v15 = vor.u32 %v3605_v61, %v3604_v53  ;;  %v3864_v43 = vor.u32 %v3863_v40, %v3862_v20 }
 0x4bf   :  { %v3595_v6 = vld [vmem:[#allocation2] ss:$32 sm:$0x20]  ;;  %v3979_v29 = vld [vmem:[#allocation2 + $0x18] ss:$32 sm:$0x20]  ;;  %v3994_v2 = vor.u32 %v3993_v23, %v3992_v38  ;;  %v3736_v48 = vor.u32 %v3735_v28, %v3734_v3 }
 0x4c0   :  { %v3853_v8 = vld [vmem:[#allocation2 + $0x10] ss:$32 sm:$0x40]  ;;  %v3725_v52 = vld [vmem:[#allocation2 + $0x8] ss:$32 sm:$0x40]  ;;  %v3596_v63 = vor.u32 %v3595_v6, %v3594_v12  ;;  %v3980_v45 = vor.u32 %v3979_v29, %v3978_v25 }
 0x4c1   :  { %v3865_v54 = vld [vmem:[#allocation2 + $0x110] ss:$32 sm:$0x10]  ;;  %v3607_v46 = vld [vmem:[#allocation2 + $0x100] ss:$32 sm:$0x8]  ;;  %v7887_v5 = vor.u32 %v3853_v8, %v3852_v13  ;;  %v3726_v33 = vor.u32 %v3725_v52, %v3724_v42 }
 0x4c2   :  { %v3995_v24 = vld [vmem:[#allocation2 + $0x118] ss:$32 sm:$0x20]  ;;  %v3737_v37 = vld [vmem:[#allocation2 + $0x108] ss:$32 sm:$0x10]  ;;  %v3608_v1 = vor.u32 %v3607_v46, %v3606_v15  ;;  %v3866_v39 = vor.u32 %v3865_v54, %v3864_v43 }
 0x4c3   :  { %v3597_v18 = vld [vmem:[#allocation2] ss:$32 sm:$0x40]  ;;  %v3981_v0 = vld [vmem:[#allocation2 + $0x18] ss:$32 sm:$0x40]  ;;  %v3996_v30 = vor.u32 %v3995_v24, %v3994_v2  ;;  %v3738_v31 = vor.u32 %v3737_v37, %v3736_v48 }
 0x4c4   :  { %v7881_v35 = vld [vmem:[#allocation2 + $0x10] ss:$32 sm:$0x80]  ;;  %v3727_v11 = vld [vmem:[#allocation2 + $0x8] ss:$32 sm:$0x80]  ;;  %v3598_v9 = vor.u32 %v3597_v18, %v3596_v63  ;;  %v3982_v44 = vor.u32 %v3981_v0, %v3980_v45 }
 0x4c5   :  { %v3867_v14 = vld [vmem:[#allocation2 + $0x110] ss:$32 sm:$0x20]  ;;  %v3609_v32 = vld [vmem:[#allocation2 + $0x100] ss:$32 sm:$0x10]  ;;  %v3856_v61 = vor.u32 %v7881_v35, %v7887_v5  ;;  %v3728_v27 = vor.u32 %v3727_v11, %v3726_v33 }
 0x4c6   :  { %v3997_v26 = vld [vmem:[#allocation2 + $0x118] ss:$32 sm:$0x40]  ;;  %v3739_v7 = vld [vmem:[#allocation2 + $0x108] ss:$32 sm:$0x20]  ;;  %v3610_v49 = vor.u32 %v3609_v32, %v3608_v1  ;;  %v3868_v51 = vor.u32 %v3867_v14, %v3866_v39 }
 0x4c7   :  { %v7885_v47 = vld [vmem:[#allocation2] ss:$32 sm:$0x80]  ;;  %v3983_v50 = vld [vmem:[#allocation2 + $0x18] ss:$32 sm:$0x80]  ;;  %v3998_v19 = vor.u32 %v3997_v26, %v3996_v30  ;;  %v3740_v4 = vor.u32 %v3739_v7, %v3738_v31 }
 0x4c8   :  { %v3611_v36 = vld [vmem:[#allocation2 + $0x100] ss:$32 sm:$0x20]  ;;  %v3869_v10 = vld [vmem:[#allocation2 + $0x110] ss:$32 sm:$0x40]  ;;  %v3600_v3 = vor.u32 %v7885_v47, %v3598_v9  ;;  %v3984_v21 = vor.u32 %v3983_v50, %v3982_v44 }
 0x4c9   :  { %v3741_v22 = vld [vmem:[#allocation2 + $0x108] ss:$32 sm:$0x40]  ;;  %v3999_v16 = vld [vmem:[#allocation2 + $0x118] ss:$32 sm:$0x80]  ;;  %v3612_v60 = vor.u32 %v3611_v36, %v3610_v49  ;;  %v3870_v6 = vor.u32 %v3869_v10, %v3868_v51 }
 0x4ca   :  { %v3613_v40 = vld [vmem:[#allocation2 + $0x100] ss:$32 sm:$0x40]  ;;  %v3871_v55 = vld [vmem:[#allocation2 + $0x110] ss:$32 sm:$0x80]  ;;  %v3742_v53 = vor.u32 %v3741_v22, %v3740_v4  ;;  %v4000_v46 = vor.u32 %v3999_v16, %v3998_v19 }
 0x4cb   :  { %v3743_v23 = vld [vmem:[#allocation2 + $0x108] ss:$32 sm:$0x80]  ;;  %v3615_v8 = vld [vmem:[#allocation2 + $0x100] ss:$32 sm:$0x80]  ;;  %v3614_v52 = vor.u32 %v3613_v40, %v3612_v60  ;;  %v3872_v24 = vor.u32 %v3871_v55, %v3870_v6 }
 0x4cc   :  { %v3744_v34 = vor.u32 %v3743_v23, %v3742_v53  ;;  %v5721_v5 = vld [vmem:[%s7987_s7 + $0x18] sm:$0xff]  }
 0x4cd   :  { %v3616_v58 = vor.u32 %v3615_v8, %v3614_v52  ;;  %v5723_v52 = vld [vmem:[%s7987_s7 + $0x8] sm:$0xff]  }
 0x508   :  { %v7877_v17 = vpop.permute.xlu0 %5637 }
 0x509   :  { %v7879_v57 = vpop.permute.xlu1 %5627  ;;  %v5640_v12 = vunpack.i.h.bf16 %v7877_v17  ;;  %v5639_v7 = vunpack.i.l.bf16 %v7877_v17 }
 0x50a   :  { %v5629_v56 = vunpack.i.l.bf16 %v7879_v57  ;;  %v5630_v26 = vunpack.i.h.bf16 %v7879_v57 }
 0x50c   :  { %v5648_v59 = vpop.permute.xlu0 %5647  ;;  %v4214_v17 = vsel %vm2624_vm8, %v4000_v46, %v5630_v26  ;;  %v5725_v46 = vld [vmem:[%s7989_s9 + $0x38] sm:$0xff]  }
 0x50d   :  { %v7883_v41 = vpop.permute.xlu1 %5632  ;;  %v5650_v29 = vunpack.i.h.bf16 %v5648_v59  ;;  %v5649_v38 = vunpack.i.l.bf16 %v5648_v59  ;;  %v4213_v59 = vsel %vm2624_vm8, %v3984_v21, %v5629_v56  ;;  %v4216_v60 = vsel %vm4195_vm10, %v4214_v17, %v5640_v12  ;;  %v5726_v21 = vld [vmem:[%s7989_s9 + $0x30] sm:$0xff]   ;;  %v5729_v56 = vld [vmem:[%s7989_s9 + $0x18] sm:$0xff]  }
 0x50e   :  { %v5635_v42 = vunpack.i.h.bf16 %v7883_v41  ;;  %v5634_v50 = vunpack.i.l.bf16 %v7883_v41  ;;  %v4215_v40 = vsel %vm4195_vm10, %v4213_v59, %v5639_v7 }
 0x50f   :  { %v4202_v15 = vsel %vm2624_vm8, %v3744_v34, %v5650_v29  ;;  %v4201_v0 = vsel %vm2624_vm8, %v3728_v27, %v5649_v38  ;;  %v5728_v34 = vld [vmem:[%s7989_s9 + $0x20] sm:$0xff]  }
 0x510   :  { %v5658_v28 = vpop.permute.xlu0 %5657  ;;  %v4208_v19 = vsel %vm2624_vm8, %v3872_v24, %v5635_v42  ;;  %v4207_v27 = vsel %vm2624_vm8, %v3856_v61, %v5634_v50  ;;  %v5763_v61 = vmov 0.0   ;;  %v5727_v24 = vld [vmem:[%s7989_s9 + $0x28] sm:$0xff]  }
 0x511   :  { %v7891_v62 = vpop.permute.xlu1 %5642  ;;  %v5660_v20 = vunpack.i.h.bf16 %v5658_v28  ;;  %v5659_v54 = vunpack.i.l.bf16 %v5658_v28  ;;  %5263 = vmatprep.subr.bf16.mxu0 %v5763_v61  ;;  %5275 = vmatprep.subr.bf16.mxu1 %v5763_v61 }
 0x512   :  { %v5645_v57 = vunpack.i.h.bf16 %v7891_v62  ;;  %v5644_v22 = vunpack.i.l.bf16 %v7891_v62 }
 0x513   :  { %v4203_v14 = vsel %vm4195_vm10, %v4201_v0, %v5659_v54  ;;  %v4204_v11 = vsel %vm4195_vm10, %v4202_v15, %v5660_v20  ;;  %v5722_v54 = vld [vmem:[%s7987_s7 + $0x10] sm:$0xff]  }
 0x514   :  { %v4210_v62 = vsel %vm4195_vm10, %v4208_v19, %v5645_v57  ;;  %v4209_v6 = vsel %vm4195_vm10, %v4207_v27, %v5644_v22  ;;  %v4928_v19 = vld [vmem:[%s7990_s10] ss:$0 sm:$0xff] }
 0x516   :  { %v5668_v37 = vpop.permute.xlu0 %5667 }
 0x517   :  { %v5670_v2 = vunpack.i.h.bf16 %v5668_v37  ;;  %v5669_v43 = vunpack.i.l.bf16 %v5668_v37 }
 0x518   :  { %v5653_v18 = vpop.permute.xlu1 %5652 }
 0x519   :  { %v5655_v48 = vunpack.i.h.bf16 %v5653_v18  ;;  %v5654_v32 = vunpack.i.l.bf16 %v5653_v18  ;;  %v4205_v25 = vsel %vm4198_vm11, %v4203_v14, %v5669_v43  ;;  %v4206_v13 = vsel %vm4198_vm11, %v4204_v11, %v5670_v2  ;;  %v4889_v2 = vld [vmem:[%s7986_s6] ss:$0 sm:$0xff] }
 0x51a   :  { %v4220_v39 = vpack.c.bf16 %v4206_v13, %v4205_v25 }
 0x51b   :  { %v4194_v45 = vsel %vm2624_vm8, %v3616_v58, %v5655_v48  ;;  %v4193_v10 = vsel %vm2624_vm8, %v3600_v3, %v5654_v32  ;;  %v5724_v3 = vld [vmem:[%s7987_s7] sm:$0xff]  }
 0x51c   :  { %4518 = vmatprep.mubr.bf16.mxu0 %v4220_v39  ;;  %v5730_v39 = vld [vmem:[%s7989_s9 + $0x10] sm:$0xff]  }
 0x51e   :  { %v5673_v1 = vpop.permute.xlu0 %5672 }
 0x51f   :  { %v5663_v30 = vpop.permute.xlu1 %5662  ;;  %v5675_v31 = vunpack.i.h.bf16 %v5673_v1  ;;  %v5674_v47 = vunpack.i.l.bf16 %v5673_v1 }
 0x520   :  { %v5665_v36 = vunpack.i.h.bf16 %v5663_v30  ;;  %v5664_v63 = vunpack.i.l.bf16 %v5663_v30 }
 0x522   :  { %v4196_v33 = vsel %vm4195_vm10, %v4193_v10, %v5664_v63  ;;  %v4197_v49 = vsel %vm4195_vm10, %v4194_v45, %v5665_v36  ;;  %v5678_v51 = vpop.permute.xlu0 %5677  ;;  %v4922_v36 = vld [vmem:[%s7988_s8] ss:$0 sm:$0xff] }
 0x523   :  { %v4199_v16 = vsel %vm4198_vm11, %v4196_v33, %v5674_v47  ;;  %v4200_v41 = vsel %vm4198_vm11, %v4197_v49, %v5675_v31  ;;  %v5683_v4 = vpop.permute.xlu1 %5682  ;;  %v5680_v44 = vunpack.i.h.bf16 %v5678_v51  ;;  %v5679_v55 = vunpack.i.l.bf16 %v5678_v51  ;;  %v5731_v31 = vld [vmem:[%s7989_s9 + $0x8] sm:$0xff]   ;;  %v5732_v47 = vld [vmem:[%s7989_s9] sm:$0xff]   ;;  %s5765_s9 = smov [#allocation3]  }
 0x524   :  { %v4219_v9 = vpack.c.bf16 %v4200_v41, %v4199_v16  ;;  %v5685_v23 = vunpack.i.h.bf16 %v5683_v4  ;;  %v5684_v28 = vunpack.i.l.bf16 %v5683_v4  ;;  %s4776_s18 = sshll.u32 %s5765_s9, 4  ;;  %s4777_s18 = int_to_ptr.vmem [resolvable:$true] %s4776_s18 }
 0x525   :  { %v4217_v29 = vsel %vm4198_vm11, %v4215_v40, %v5679_v55  ;;  %v4218_v38 = vsel %vm4198_vm11, %v4216_v60, %v5680_v44  ;;  %s5735_s8 = scalar_lea.vmem %s4777_s18, 256  ;;  %p5740_p1 = scmp.lt.s32.totalorder %s4777_s18, %s4777_s18 }
 0x526   :  { %v4212_v53 = vsel %vm4198_vm11, %v4210_v62, %v5685_v23  ;;  %4519 = vmatmul.mubr.bf16.vlgmr.msra.gmra.mxu0 %v4219_v9  ;;  %v4211_v8 = vsel %vm4198_vm11, %v4209_v6, %v5684_v28  ;;  %v4222_v20 = vpack.c.bf16 %v4218_v38, %v4217_v29  ;;  %p5736_p0 = scmp.ne.s32.totalorder %s4777_s18, %s5735_s8  ;;  %p5741_p2 = scmp.lt.s32.totalorder %s5735_s8, %s5735_s8 }
 0x527   :  { %v4221_v35 = vpack.c.bf16 %v4212_v53, %v4211_v8  ;;  %5264 = vmatpush3.bf16.msra.mxu0 %v5721_v5  ;;  %5271 = vmatprep.mubr.msk.bf16.mxu0 %vm5764_vm12, %v5763_v61 }
 0x528   :  { %4559 = vmatprep.mubr.bf16.mxu1 %v4222_v20  ;;  %5265 = vmatprep.subr.bf16.mxu0 %v5763_v61  ;;  %p5742_p3 = por %p5741_p2, %p5740_p1 }
 0x529   :  { %4560 = vmatmul.mubr.bf16.vlgmr.msra.gmra.mxu1 %v4221_v35 }
 0x52a   :  { %5291 = vmatprep.mubr.msk.bf16.mxu1 %vm5764_vm12, %v5763_v61  ;;  %5276 = vmatpush3.bf16.msra.mxu1 %v5725_v46  ;;  %p5743_p4 = pnand %p5742_p3, %p5736_p0 }
 0x52b   :  { %5266 = vmatpush3.bf16.msra.mxu0 %v5722_v54  ;;  %5277 = vmatprep.subr.bf16.mxu1 %v5763_v61 }
 0x52c   :  { %5267 = vmatprep.subr.bf16.mxu0 %v5763_v61 }
 0x52e   :  { %5278 = vmatpush3.bf16.msra.mxu1 %v5726_v21 }
 0x52f   :  { %5268 = vmatpush3.bf16.msra.mxu0 %v5723_v52  ;;  %5279 = vmatprep.subr.bf16.mxu1 %v5763_v61 }
 0x530   :  { %5269 = vmatprep.subr.bf16.mxu0 %v5763_v61 }
 0x532   :  { %5280 = vmatpush3.bf16.msra.mxu1 %v5727_v24 }
 0x533   :  { %5270 = vmatpush3.bf16.msra.mxu0 %v5724_v3  ;;  %5281 = vmatprep.subr.bf16.mxu1 %v5763_v61 }
 0x536   :  { %5282 = vmatpush3.bf16.msra.mxu1 %v5728_v34 }
 0x537   :  { %5283 = vmatprep.subr.bf16.mxu1 %v5763_v61 }
 0x53a   :  { %5284 = vmatpush3.bf16.msra.mxu1 %v5729_v56 }
 0x53b   :  { %5285 = vmatprep.subr.bf16.mxu1 %v5763_v61 }
 0x53e   :  { %5286 = vmatpush3.bf16.msra.mxu1 %v5730_v39 }
 0x53f   :  { %5287 = vmatprep.subr.bf16.mxu1 %v5763_v61 }
 0x542   :  { %5288 = vmatpush3.bf16.msra.mxu1 %v5731_v31 }
 0x543   :  { %5289 = vmatprep.subr.bf16.mxu1 %v5763_v61 }
 0x546   :  { %5290 = vmatpush3.bf16.msra.mxu1 %v5732_v47 }
 0x5e6   :  { %v5053_v37 = vpop.f32.mrf.mxu0 }
 0x5e8   :  { %v5054_v58 = vpop.f32.mrf.mxu0 }
 0x5e9   :  { %v5075_v15 = vpop.f32.mrf.mxu1  ;;  %v5055_v0 = vadd.f32 %v5054_v58, %v5053_v37 }
 0x5ea   :  { %v5056_v18 = vpop.f32.mrf.mxu0 }
 0x5eb   :  { %v5076_v14 = vpop.f32.mrf.mxu1  ;;  %v4521_v12 = vadd.f32 %v5055_v0, %v4889_v2 }
 0x5ec   :  { %v5057_v43 = vpop.f32.mrf.mxu0  ;;  %v5077_v48 = vadd.f32 %v5076_v14, %v5075_v15 }
 0x5ed   :  { %v5058_v11 = vadd.f32 %v5057_v43, %v5056_v18  ;;  %v5078_v32 = vpop.f32.mrf.mxu1 }
 0x5ee   :  { %v4562_v13 = vadd.f32 %v5077_v48, %v4521_v12 }
 0x5ef   :  { %v5079_v26 = vpop.f32.mrf.mxu1  ;;  %v4524_v25 = vadd.f32 %v5058_v11, %v4889_v2 }
 0x5f0   :  { %v5080_v7 = vadd.f32 %v5079_v26, %v5078_v32  ;;  %v4568_v42 = vmax.f32 %v4562_v13, 0.0 }
 0x5f2   :  { %v4565_v59 = vadd.f32 %v5080_v7, %v4524_v25 }
 0x5f4   :  { %v4569_v1 = vmax.f32 %v4565_v59, 0.0 }
 0x5f6   :  { %v4570_v30 = vpack.c.bf16 %v4569_v1, %v4568_v42 }
 0x5f8   :  { %5272 = vmatmul.mubr.msk.bf16.vlgmr.msra.gmra.mxu0 %vm4195_vm10, %v4570_v30 }
 0x6b8   :  { %v4647_v63 = vpop.f32.mrf.mxu0 }
 0x6b9   :  { %v4648_v57 = vadd.f32 %v4922_v36, %v4647_v63 }
 0x6ba   :  { %v5273_v50 = vpop.f32.mrf.mxu0 }
 0x6bb   :  { %v4654_v22 = vmax.f32 %v4648_v57, 0.0 }
 0x6bc   :  { %v4650_v45 = vpop.f32.mrf.mxu0 }
 0x6bd   :  { %v4651_v10 = vadd.f32 %v4922_v36, %v4650_v45 }
 0x6be   :  { %v5274_v17 = vpop.f32.mrf.mxu0 }
 0x6bf   :  { %v4655_v33 = vmax.f32 %v4651_v10, 0.0 }
 0x6c1   :  { %v4656_v49 = vpack.c.bf16 %v4655_v33, %v4654_v22 }
 0x6c3   :  { %5292 = vmatmul.mubr.bf16.vlgmr.msra.gmra.mxu1 %v4656_v49 }
 0x783   :  { %v4762_v16 = vpop.f32.mrf.mxu1 }
 0x784   :  { %v4763_v41 = vadd.f32 %v4928_v19, %v4762_v16 }
 0x785   :  { %v5293_v51 = vpop.f32.mrf.mxu1 }
 0x786   :  { %4769 = vst.msk [vmem:[#allocation3] sm:$0xff] %vm2624_vm8, %v4763_v41 }
 0x787   :  { %v4765_v4 = vpop.f32.mrf.mxu1 }
 0x788   :  { %v4766_v40 = vadd.f32 %v4928_v19, %v4765_v4 }
 0x789   :  { %v5294_v9 = vpop.f32.mrf.mxu1 }
 0x78a   :  { %4770 = vst.msk [vmem:[#allocation3 + $0x8] sm:$0xff] %vm2624_vm8, %v4766_v40 }
 0x78b   :  { %5746 = shalt.err (!%p5743_p4)
}
 0x78c   :  { %s5766_s10 = smov 128   ;;  %s5767_s19 = smov 8  }
 0x78d   :  { %4782 = dma.vmem_to_hbm [thread:$0]  %s4777_s18, 256, %s7991_s11, [#allocation4], %s5766_s10, %s5766_s10, %s5767_s19  }
 0x78e   :  { %5755 = dma.done.wait [#allocation4], 256  }
 0x78f   :  { %5756 = vsyncadd [#allocation4], 4294967040 }
 0x790   :  { %4786 = vsyncpa [#allocation4], 1 }

</bundles_post_ra>
